<compile_context>
chip_gen: v7x
topology: tpu7x:2x2x1
jax: 0.10.0
libtpu: 0.0.40
codegen_flags: <defaults>
</compile_context>

<pallas_src>
import functools

import jax
import jax.numpy as jnp
from jax import lax
from jax.experimental import pallas as pl
from jax.experimental.pallas import tpu as pltpu


def _basic_block_kernel(*refs, stride, kh_size, kw_size, ho, wo, has_sc_conv):
    """Fused BasicBlock forward for one batch element (NHWC, f32 in/out)."""
    if has_sc_conv:
        (x_ref, w1_ref, s1_ref, b1_ref, w2_ref, s2_ref, b2_ref,
         wsc_ref, ssc_ref, bsc_ref, o_ref, xpad_ref, mid_ref) = refs
    else:
        (x_ref, w1_ref, s1_ref, b1_ref, w2_ref, s2_ref, b2_ref,
         o_ref, xpad_ref, mid_ref) = refs
        wsc_ref = ssc_ref = bsc_ref = None

    _, h, w, cin = x_ref.shape
    c = s1_ref.shape[1]
    m = ho * wo

    # ---- pad=1 halo for conv1, built in VMEM (no HBM pad copy of x) --------
    xpad_ref[...] = jnp.zeros_like(xpad_ref)
    xpad_ref[1:h + 1, 1:w + 1, :] = x_ref[0]

    def tap(src_ref, kh, kw, ci):
        # Ref-side window read of one conv tap (comes out of the load, not an
        # in-register relayout of the whole tile).
        if stride == 1:
            win = src_ref[pl.ds(kh, ho), pl.ds(kw, wo), :]
        else:
            span_h = (ho - 1) * stride + 1
            span_w = (wo - 1) * stride + 1
            win = src_ref[pl.ds(kh, span_h), pl.ds(kw, span_w), :]
            win = win[::stride, ::stride, :]
        return win.reshape(m, ci)

    def conv3x3(src_ref, w_ref, ci):
        # im2col: one (M, KH*KW*Ci) x (KH*KW*Ci, C) bf16 MXU matmul with f32
        # accumulation instead of KH*KW tiny K=Ci matmuls.
        lhs = jnp.concatenate(
            [tap(src_ref, kh, kw, ci)
             for kh in range(kh_size) for kw in range(kw_size)], axis=-1)
        return jnp.dot(lhs.astype(jnp.bfloat16), w_ref[...],
                       preferred_element_type=jnp.float32)

    # ---- conv1 + bn1 + relu (dropout == identity in eval) ------------------
    out1 = conv3x3(xpad_ref, w1_ref, cin) * s1_ref[...] + b1_ref[...]
    out1 = jnp.maximum(out1, 0.0)

    # ---- keep out1 resident in VMEM, with its pad=1 halo for conv2 ---------
    mid_ref[...] = jnp.zeros_like(mid_ref)
    mid_ref[1:ho + 1, 1:wo + 1, :] = out1.reshape(ho, wo, c)

    # ---- shortcut -----------------------------------------------------------
    if has_sc_conv:
        xs = x_ref[0]
        if stride != 1:
            xs = xs[::stride, ::stride, :]
        xs = xs.reshape(m, cin).astype(jnp.bfloat16)
        sc = jnp.dot(xs, wsc_ref[...], preferred_element_type=jnp.float32)
        sc = sc * ssc_ref[...] + bsc_ref[...]
    else:
        sc = x_ref[0].reshape(m, c)            # identity shortcut, f32

    # ---- conv2 + bn2 + residual + relu (f32 epilogue) -----------------------
    out2 = conv3x3(mid_ref, w2_ref, c) * s2_ref[...] + b2_ref[...] + sc
    out2 = jnp.maximum(out2, 0.0)
    o_ref[0] = out2.reshape(ho, wo, c)


def fold_bn(gamma, beta, mean, var, eps=1e-5):
    scale = gamma / jnp.sqrt(var + eps)
    return scale, beta - mean * scale


def basic_block_forward(x_nchw, params, stride, needs_shortcut):
    """Fused Pallas implementation of BasicBlock.forward (NCHW in/out)."""
    x = jnp.transpose(x_nchw, (0, 2, 3, 1)).astype(jnp.float32)   # NHWC
    n, h, w, cin = x.shape
    kh, kw, _, c = params["w1"].shape
    ho = (h + 2 - kh) // stride + 1
    wo = (w + 2 - kw) // stride + 1

    s1, b1 = fold_bn(*params["bn1"])
    s2, b2 = fold_bn(*params["bn2"])

    # im2col weight layout + bf16 for the MXU (BN scale/bias stay f32).
    w1 = params["w1"].reshape(kh * kw * cin, c).astype(jnp.bfloat16)
    w2 = params["w2"].reshape(kh * kw * c, c).astype(jnp.bfloat16)

    def vec(v):
        return v.reshape(1, c).astype(jnp.float32)

    args = [x, w1, vec(s1), vec(b1), w2, vec(s2), vec(b2)]
    in_specs = [
        pl.BlockSpec((1, h, w, cin), lambda i: (i, 0, 0, 0)),
        pl.BlockSpec((kh * kw * cin, c), lambda i: (0, 0)),
        pl.BlockSpec((1, c), lambda i: (0, 0)),
        pl.BlockSpec((1, c), lambda i: (0, 0)),
        pl.BlockSpec((kh * kw * c, c), lambda i: (0, 0)),
        pl.BlockSpec((1, c), lambda i: (0, 0)),
        pl.BlockSpec((1, c), lambda i: (0, 0)),
    ]
    if needs_shortcut:
        ss, bs = fold_bn(*params["bn_sc"])
        args += [params["w_sc"].reshape(cin, c).astype(jnp.bfloat16),
                 vec(ss), vec(bs)]
        in_specs += [pl.BlockSpec((cin, c), lambda i: (0, 0)),
                     pl.BlockSpec((1, c), lambda i: (0, 0)),
                     pl.BlockSpec((1, c), lambda i: (0, 0))]

    kernel = functools.partial(
        _basic_block_kernel, stride=stride, kh_size=kh, kw_size=kw,
        ho=ho, wo=wo, has_sc_conv=needs_shortcut)

    out = pl.pallas_call(
        kernel,
        out_shape=jax.ShapeDtypeStruct((n, ho, wo, c), jnp.float32),
        grid=(n,),
        in_specs=in_specs,
        out_specs=pl.BlockSpec((1, ho, wo, c), lambda i: (i, 0, 0, 0)),
        scratch_shapes=[
            pltpu.VMEM((h + 2, w + 2, cin), jnp.float32),    # padded x halo
            pltpu.VMEM((ho + 2, wo + 2, c), jnp.float32),    # padded out1 halo
        ],
        compiler_params=pltpu.CompilerParams(
            dimension_semantics=("parallel",),
            vmem_limit_bytes=32 * 1024 * 1024),
    )(*args)
    return jnp.transpose(out, (0, 3, 1, 2))                       # NCHW


def init_basic_block_params(key, in_planes, planes, stride):
    """Deterministic, PyTorch-shaped parameter init (weights OIHW -> HWIO)."""
    expansion = 1
    needs_shortcut = (stride != 1) or (in_planes != expansion * planes)
    keys = jax.random.split(key, 6)

    def conv_w(k, cout, cin, ksz):
        fan_in = cin * ksz * ksz
        bound = 1.0 / jnp.sqrt(jnp.float32(fan_in))
        w_oihw = jax.random.uniform(k, (cout, cin, ksz, ksz), jnp.float32,
                                    -bound, bound)
        return jnp.transpose(w_oihw, (2, 3, 1, 0))       # -> HWIO

    def bn_p(k, ch):
        k1, k2, k3, k4 = jax.random.split(k, 4)
        gamma = jax.random.uniform(k1, (ch,), jnp.float32, 0.5, 1.5)
        beta = 0.1 * jax.random.normal(k2, (ch,), jnp.float32)
        mean = 0.1 * jax.random.normal(k3, (ch,), jnp.float32)
        var = jax.random.uniform(k4, (ch,), jnp.float32, 0.5, 1.5)
        return (gamma, beta, mean, var)

    params = {
        "w1": conv_w(keys[0], planes, in_planes, 3),
        "bn1": bn_p(keys[1], planes),
        "w2": conv_w(keys[2], planes, planes, 3),
        "bn2": bn_p(keys[3], planes),
    }
    if needs_shortcut:
        params["w_sc"] = conv_w(keys[4], expansion * planes, in_planes, 1)
        params["bn_sc"] = bn_p(keys[5], expansion * planes)
    return params, needs_shortcut


def basic_block_reference(x_nchw, params, stride, needs_shortcut):
    """Plain-JAX reference (lax.conv, bf16 conv inputs / f32 accumulation)."""
    x = jnp.transpose(x_nchw, (0, 2, 3, 1)).astype(jnp.float32)

    def conv(a, w, s, pad):
        return lax.conv_general_dilated(
            a.astype(jnp.bfloat16), w.astype(jnp.bfloat16),
            window_strides=(s, s), padding=((pad, pad), (pad, pad)),
            dimension_numbers=("NHWC", "HWIO", "NHWC"),
            preferred_element_type=jnp.float32)

    def bn(a, bnp):
        g, b, m, v = bnp
        return (a - m) / jnp.sqrt(v + 1e-5) * g + b

    out1 = jax.nn.relu(bn(conv(x, params["w1"], stride, 1), params["bn1"]))
    out = bn(conv(out1, params["w2"], 1, 1), params["bn2"])
    if needs_shortcut:
        sc = bn(conv(x, params["w_sc"], stride, 0), params["bn_sc"])
    else:
        sc = x
    out = jax.nn.relu(out + sc)
    return jnp.transpose(out, (0, 3, 1, 2))


if __name__ == "__main__":
    key = jax.random.PRNGKey(0)
    k_x, k_p = jax.random.split(key)

    # Small shapes consistent with the module: N=2, in_planes=4, planes=8,
    # H=W=16, stride=1  (in_planes != planes -> 1x1-conv shortcut path).
    N, IN_PLANES, PLANES, H, W, STRIDE = 2, 4, 8, 16, 16, 1

    x = jax.random.normal(k_x, (N, IN_PLANES, H, W), jnp.float32)
    params, needs_shortcut = init_basic_block_params(
        k_p, IN_PLANES, PLANES, STRIDE)

    out = jax.block_until_ready(
        basic_block_forward(x, params, STRIDE, needs_shortcut))
    ref = jax.block_until_ready(
        basic_block_reference(x, params, STRIDE, needs_shortcut))

    assert out.shape == (N, PLANES, H // STRIDE, W // STRIDE), out.shape
    # bf16 MXU inputs (both kernel and reference) -> loosened tolerance.
    max_err = float(jnp.max(jnp.abs(out - ref)))
    assert jnp.allclose(out, ref, rtol=1e-2, atol=1e-2), max_err

    print("KERNEL_OK")
</pallas_src>

<mosaic_0001>
module attributes {stable_mosaic.version = 11 : i64} {
  func.func @_basic_block_kernel(%arg0: i32, %arg1: memref<1x16x16x4xf32, #tpu.memory_space<vmem>>, %arg2: memref<36x8xbf16, #tpu.memory_space<vmem>>, %arg3: memref<1x8xf32, #tpu.memory_space<vmem>>, %arg4: memref<1x8xf32, #tpu.memory_space<vmem>>, %arg5: memref<72x8xbf16, #tpu.memory_space<vmem>>, %arg6: memref<1x8xf32, #tpu.memory_space<vmem>>, %arg7: memref<1x8xf32, #tpu.memory_space<vmem>>, %arg8: memref<4x8xbf16, #tpu.memory_space<vmem>>, %arg9: memref<1x8xf32, #tpu.memory_space<vmem>>, %arg10: memref<1x8xf32, #tpu.memory_space<vmem>>, %arg11: memref<1x16x16x8xf32, #tpu.memory_space<vmem>>, %arg12: memref<18x18x4xf32, #tpu.memory_space<vmem>>, %arg13: memref<18x18x8xf32, #tpu.memory_space<vmem>>) attributes {dimension_semantics = [#tpu.dimension_semantics<parallel>], iteration_bounds = array<i64: 2>, scalar_prefetch = 0 : i64, scratch_operands = 2 : i64, tpu.core_type = #tpu.core_type<tc>, window_params = [{transform_indices = @transform_0, window_bounds = array<i64: 1, 16, 16, 4>}, {pipeline_mode = #tpu.pipeline_mode<synchronous>, transform_indices = @transform_1, window_bounds = array<i64: 36, 8>}, {pipeline_mode = #tpu.pipeline_mode<synchronous>, transform_indices = @transform_2, window_bounds = array<i64: 1, 8>}, {pipeline_mode = #tpu.pipeline_mode<synchronous>, transform_indices = @transform_3, window_bounds = array<i64: 1, 8>}, {pipeline_mode = #tpu.pipeline_mode<synchronous>, transform_indices = @transform_4, window_bounds = array<i64: 72, 8>}, {pipeline_mode = #tpu.pipeline_mode<synchronous>, transform_indices = @transform_5, window_bounds = array<i64: 1, 8>}, {pipeline_mode = #tpu.pipeline_mode<synchronous>, transform_indices = @transform_6, window_bounds = array<i64: 1, 8>}, {pipeline_mode = #tpu.pipeline_mode<synchronous>, transform_indices = @transform_7, window_bounds = array<i64: 4, 8>}, {pipeline_mode = #tpu.pipeline_mode<synchronous>, transform_indices = @transform_8, window_bounds = array<i64: 1, 8>}, {pipeline_mode = #tpu.pipeline_mode<synchronous>, transform_indices = @transform_9, window_bounds = array<i64: 1, 8>}, {transform_indices = @transform_10, window_bounds = array<i64: 1, 16, 16, 8>}]} {
    %cst = arith.constant 0.000000e+00 : f32
    %0 = vector.broadcast %cst : f32 to vector<18x18x4xf32>
    %c0 = arith.constant 0 : index
    %c0_0 = arith.constant 0 : index
    %c0_1 = arith.constant 0 : index
    %1 = vector.load %arg12[%c0, %c0_0, %c0_1] : memref<18x18x4xf32, #tpu.memory_space<vmem>>, vector<18x18x4xf32>
    tpu.vector_store %arg12[%c0, %c0_0, %c0_1], %0 {strides = array<i32>} : memref<18x18x4xf32, #tpu.memory_space<vmem>>, vector<18x18x4xf32>,
    %c0_2 = arith.constant 0 : index
    %c0_3 = arith.constant 0 : index
    %c0_4 = arith.constant 0 : index
    %c0_5 = arith.constant 0 : index
    %2 = vector.load %arg1[%c0_2, %c0_3, %c0_4, %c0_5] : memref<1x16x16x4xf32, #tpu.memory_space<vmem>>, vector<1x16x16x4xf32>
    %3 = vector.shape_cast %2 : vector<1x16x16x4xf32> to vector<16x16x4xf32>
    %c1 = arith.constant 1 : index
    %c1_6 = arith.constant 1 : index
    %c0_7 = arith.constant 0 : index
    %4 = vector.load %arg12[%c1, %c1_6, %c0_7] : memref<18x18x4xf32, #tpu.memory_space<vmem>>, vector<16x16x4xf32>
    tpu.vector_store %arg12[%c1, %c1_6, %c0_7], %3 {strides = array<i32>} : memref<18x18x4xf32, #tpu.memory_space<vmem>>, vector<16x16x4xf32>,
    %c0_8 = arith.constant 0 : index
    %c0_9 = arith.constant 0 : index
    %c0_10 = arith.constant 0 : index
    %5 = vector.load %arg12[%c0_8, %c0_9, %c0_10] : memref<18x18x4xf32, #tpu.memory_space<vmem>>, vector<16x16x4xf32>
    %6 = vector.shape_cast %5 : vector<16x16x4xf32> to vector<256x4xf32>
    %c0_11 = arith.constant 0 : index
    %c1_12 = arith.constant 1 : index
    %c0_13 = arith.constant 0 : index
    %7 = vector.load %arg12[%c0_11, %c1_12, %c0_13] : memref<18x18x4xf32, #tpu.memory_space<vmem>>, vector<16x16x4xf32>
    %8 = vector.shape_cast %7 : vector<16x16x4xf32> to vector<256x4xf32>
    %c0_14 = arith.constant 0 : index
    %c2 = arith.constant 2 : index
    %c0_15 = arith.constant 0 : index
    %9 = vector.load %arg12[%c0_14, %c2, %c0_15] : memref<18x18x4xf32, #tpu.memory_space<vmem>>, vector<16x16x4xf32>
    %10 = vector.shape_cast %9 : vector<16x16x4xf32> to vector<256x4xf32>
    %c1_16 = arith.constant 1 : index
    %c0_17 = arith.constant 0 : index
    %c0_18 = arith.constant 0 : index
    %11 = vector.load %arg12[%c1_16, %c0_17, %c0_18] : memref<18x18x4xf32, #tpu.memory_space<vmem>>, vector<16x16x4xf32>
    %12 = vector.shape_cast %11 : vector<16x16x4xf32> to vector<256x4xf32>
    %c1_19 = arith.constant 1 : index
    %c1_20 = arith.constant 1 : index
    %c0_21 = arith.constant 0 : index
    %13 = vector.load %arg12[%c1_19, %c1_20, %c0_21] : memref<18x18x4xf32, #tpu.memory_space<vmem>>, vector<16x16x4xf32>
    %14 = vector.shape_cast %13 : vector<16x16x4xf32> to vector<256x4xf32>
    %c1_22 = arith.constant 1 : index
    %c2_23 = arith.constant 2 : index
    %c0_24 = arith.constant 0 : index
    %15 = vector.load %arg12[%c1_22, %c2_23, %c0_24] : memref<18x18x4xf32, #tpu.memory_space<vmem>>, vector<16x16x4xf32>
    %16 = vector.shape_cast %15 : vector<16x16x4xf32> to vector<256x4xf32>
    %c2_25 = arith.constant 2 : index
    %c0_26 = arith.constant 0 : index
    %c0_27 = arith.constant 0 : index
    %17 = vector.load %arg12[%c2_25, %c0_26, %c0_27] : memref<18x18x4xf32, #tpu.memory_space<vmem>>, vector<16x16x4xf32>
    %18 = vector.shape_cast %17 : vector<16x16x4xf32> to vector<256x4xf32>
    %c2_28 = arith.constant 2 : index
    %c1_29 = arith.constant 1 : index
    %c0_30 = arith.constant 0 : index
    %19 = vector.load %arg12[%c2_28, %c1_29, %c0_30] : memref<18x18x4xf32, #tpu.memory_space<vmem>>, vector<16x16x4xf32>
    %20 = vector.shape_cast %19 : vector<16x16x4xf32> to vector<256x4xf32>
    %c2_31 = arith.constant 2 : index
    %c2_32 = arith.constant 2 : index
    %c0_33 = arith.constant 0 : index
    %21 = vector.load %arg12[%c2_31, %c2_32, %c0_33] : memref<18x18x4xf32, #tpu.memory_space<vmem>>, vector<16x16x4xf32>
    %22 = vector.shape_cast %21 : vector<16x16x4xf32> to vector<256x4xf32>
    %23 = tpu.concatenate %6, %8, %10, %12, %14, %16, %18, %20, %22 in 1 : vector<256x4xf32>, vector<256x4xf32>, vector<256x4xf32>, vector<256x4xf32>, vector<256x4xf32>, vector<256x4xf32>, vector<256x4xf32>, vector<256x4xf32>, vector<256x4xf32> -> vector<256x36xf32>
    %24 = arith.truncf %23 : vector<256x36xf32> to vector<256x36xbf16>
    %c0_34 = arith.constant 0 : index
    %c0_35 = arith.constant 0 : index
    %25 = vector.load %arg2[%c0_34, %c0_35] : memref<36x8xbf16, #tpu.memory_space<vmem>>, vector<36x8xbf16>
    %cst_36 = arith.constant dense<0.000000e+00> : vector<256x8xf32>
    %26 = tpu.matmul %24, %25, %cst_36 {dimension_numbers = #tpu.dot_dimension_numbers<[1], [0], [0], [1], [0, 0, 1, 1], [], []>} : vector<256x36xbf16>, vector<36x8xbf16>, vector<256x8xf32> -> vector<256x8xf32>
    %c0_37 = arith.constant 0 : index
    %c0_38 = arith.constant 0 : index
    %27 = vector.load %arg3[%c0_37, %c0_38] : memref<1x8xf32, #tpu.memory_space<vmem>>, vector<1x8xf32>
    %28 = vector.broadcast %27 : vector<1x8xf32> to vector<256x8xf32>
    %29 = arith.mulf %26, %28 : vector<256x8xf32>
    %c0_39 = arith.constant 0 : index
    %c0_40 = arith.constant 0 : index
    %30 = vector.load %arg4[%c0_39, %c0_40] : memref<1x8xf32, #tpu.memory_space<vmem>>, vector<1x8xf32>
    %31 = vector.broadcast %30 : vector<1x8xf32> to vector<256x8xf32>
    %32 = arith.addf %29, %31 : vector<256x8xf32>
    %cst_41 = arith.constant 0.000000e+00 : f32
    %33 = vector.broadcast %cst_41 : f32 to vector<256x8xf32>
    %34 = arith.maximumf %32, %33 : vector<256x8xf32>
    %cst_42 = arith.constant 0.000000e+00 : f32
    %35 = vector.broadcast %cst_42 : f32 to vector<18x18x8xf32>
    %c0_43 = arith.constant 0 : index
    %c0_44 = arith.constant 0 : index
    %c0_45 = arith.constant 0 : index
    %36 = vector.load %arg13[%c0_43, %c0_44, %c0_45] : memref<18x18x8xf32, #tpu.memory_space<vmem>>, vector<18x18x8xf32>
    tpu.vector_store %arg13[%c0_43, %c0_44, %c0_45], %35 {strides = array<i32>} : memref<18x18x8xf32, #tpu.memory_space<vmem>>, vector<18x18x8xf32>,
    %37 = vector.shape_cast %34 : vector<256x8xf32> to vector<16x16x8xf32>
    %c1_46 = arith.constant 1 : index
    %c1_47 = arith.constant 1 : index
    %c0_48 = arith.constant 0 : index
    %38 = vector.load %arg13[%c1_46, %c1_47, %c0_48] : memref<18x18x8xf32, #tpu.memory_space<vmem>>, vector<16x16x8xf32>
    tpu.vector_store %arg13[%c1_46, %c1_47, %c0_48], %37 {strides = array<i32>} : memref<18x18x8xf32, #tpu.memory_space<vmem>>, vector<16x16x8xf32>,
    %c0_49 = arith.constant 0 : index
    %c0_50 = arith.constant 0 : index
    %c0_51 = arith.constant 0 : index
    %c0_52 = arith.constant 0 : index
    %39 = vector.load %arg1[%c0_49, %c0_50, %c0_51, %c0_52] : memref<1x16x16x4xf32, #tpu.memory_space<vmem>>, vector<1x16x16x4xf32>
    %40 = vector.shape_cast %39 : vector<1x16x16x4xf32> to vector<16x16x4xf32>
    %41 = vector.shape_cast %40 : vector<16x16x4xf32> to vector<256x4xf32>
    %42 = arith.truncf %41 : vector<256x4xf32> to vector<256x4xbf16>
    %c0_53 = arith.constant 0 : index
    %c0_54 = arith.constant 0 : index
    %43 = vector.load %arg8[%c0_53, %c0_54] : memref<4x8xbf16, #tpu.memory_space<vmem>>, vector<4x8xbf16>
    %cst_55 = arith.constant dense<0.000000e+00> : vector<256x8xf32>
    %44 = tpu.matmul %42, %43, %cst_55 {dimension_numbers = #tpu.dot_dimension_numbers<[1], [0], [0], [1], [0, 0, 1, 1], [], []>} : vector<256x4xbf16>, vector<4x8xbf16>, vector<256x8xf32> -> vector<256x8xf32>
    %c0_56 = arith.constant 0 : index
    %c0_57 = arith.constant 0 : index
    %45 = vector.load %arg9[%c0_56, %c0_57] : memref<1x8xf32, #tpu.memory_space<vmem>>, vector<1x8xf32>
    %46 = vector.broadcast %45 : vector<1x8xf32> to vector<256x8xf32>
    %47 = arith.mulf %44, %46 : vector<256x8xf32>
    %c0_58 = arith.constant 0 : index
    %c0_59 = arith.constant 0 : index
    %48 = vector.load %arg10[%c0_58, %c0_59] : memref<1x8xf32, #tpu.memory_space<vmem>>, vector<1x8xf32>
    %49 = vector.broadcast %48 : vector<1x8xf32> to vector<256x8xf32>
    %50 = arith.addf %47, %49 : vector<256x8xf32>
    %c0_60 = arith.constant 0 : index
    %c0_61 = arith.constant 0 : index
    %c0_62 = arith.constant 0 : index
    %51 = vector.load %arg13[%c0_60, %c0_61, %c0_62] : memref<18x18x8xf32, #tpu.memory_space<vmem>>, vector<16x16x8xf32>
    %52 = vector.shape_cast %51 : vector<16x16x8xf32> to vector<256x8xf32>
    %c0_63 = arith.constant 0 : index
    %c1_64 = arith.constant 1 : index
    %c0_65 = arith.constant 0 : index
    %53 = vector.load %arg13[%c0_63, %c1_64, %c0_65] : memref<18x18x8xf32, #tpu.memory_space<vmem>>, vector<16x16x8xf32>
    %54 = vector.shape_cast %53 : vector<16x16x8xf32> to vector<256x8xf32>
    %c0_66 = arith.constant 0 : index
    %c2_67 = arith.constant 2 : index
    %c0_68 = arith.constant 0 : index
    %55 = vector.load %arg13[%c0_66, %c2_67, %c0_68] : memref<18x18x8xf32, #tpu.memory_space<vmem>>, vector<16x16x8xf32>
    %56 = vector.shape_cast %55 : vector<16x16x8xf32> to vector<256x8xf32>
    %c1_69 = arith.constant 1 : index
    %c0_70 = arith.constant 0 : index
    %c0_71 = arith.constant 0 : index
    %57 = vector.load %arg13[%c1_69, %c0_70, %c0_71] : memref<18x18x8xf32, #tpu.memory_space<vmem>>, vector<16x16x8xf32>
    %58 = vector.shape_cast %57 : vector<16x16x8xf32> to vector<256x8xf32>
    %c1_72 = arith.constant 1 : index
    %c1_73 = arith.constant 1 : index
    %c0_74 = arith.constant 0 : index
    %59 = vector.load %arg13[%c1_72, %c1_73, %c0_74] : memref<18x18x8xf32, #tpu.memory_space<vmem>>, vector<16x16x8xf32>
    %60 = vector.shape_cast %59 : vector<16x16x8xf32> to vector<256x8xf32>
    %c1_75 = arith.constant 1 : index
    %c2_76 = arith.constant 2 : index
    %c0_77 = arith.constant 0 : index
    %61 = vector.load %arg13[%c1_75, %c2_76, %c0_77] : memref<18x18x8xf32, #tpu.memory_space<vmem>>, vector<16x16x8xf32>
    %62 = vector.shape_cast %61 : vector<16x16x8xf32> to vector<256x8xf32>
    %c2_78 = arith.constant 2 : index
    %c0_79 = arith.constant 0 : index
    %c0_80 = arith.constant 0 : index
    %63 = vector.load %arg13[%c2_78, %c0_79, %c0_80] : memref<18x18x8xf32, #tpu.memory_space<vmem>>, vector<16x16x8xf32>
    %64 = vector.shape_cast %63 : vector<16x16x8xf32> to vector<256x8xf32>
    %c2_81 = arith.constant 2 : index
    %c1_82 = arith.constant 1 : index
    %c0_83 = arith.constant 0 : index
    %65 = vector.load %arg13[%c2_81, %c1_82, %c0_83] : memref<18x18x8xf32, #tpu.memory_space<vmem>>, vector<16x16x8xf32>
    %66 = vector.shape_cast %65 : vector<16x16x8xf32> to vector<256x8xf32>
    %c2_84 = arith.constant 2 : index
    %c2_85 = arith.constant 2 : index
    %c0_86 = arith.constant 0 : index
    %67 = vector.load %arg13[%c2_84, %c2_85, %c0_86] : memref<18x18x8xf32, #tpu.memory_space<vmem>>, vector<16x16x8xf32>
    %68 = vector.shape_cast %67 : vector<16x16x8xf32> to vector<256x8xf32>
    %69 = tpu.concatenate %52, %54, %56, %58, %60, %62, %64, %66, %68 in 1 : vector<256x8xf32>, vector<256x8xf32>, vector<256x8xf32>, vector<256x8xf32>, vector<256x8xf32>, vector<256x8xf32>, vector<256x8xf32>, vector<256x8xf32>, vector<256x8xf32> -> vector<256x72xf32>
    %70 = arith.truncf %69 : vector<256x72xf32> to vector<256x72xbf16>
    %c0_87 = arith.constant 0 : index
    %c0_88 = arith.constant 0 : index
    %71 = vector.load %arg5[%c0_87, %c0_88] : memref<72x8xbf16, #tpu.memory_space<vmem>>, vector<72x8xbf16>
    %cst_89 = arith.constant dense<0.000000e+00> : vector<256x8xf32>
    %72 = tpu.matmul %70, %71, %cst_89 {dimension_numbers = #tpu.dot_dimension_numbers<[1], [0], [0], [1], [0, 0, 1, 1], [], []>} : vector<256x72xbf16>, vector<72x8xbf16>, vector<256x8xf32> -> vector<256x8xf32>
    %c0_90 = arith.constant 0 : index
    %c0_91 = arith.constant 0 : index
    %73 = vector.load %arg6[%c0_90, %c0_91] : memref<1x8xf32, #tpu.memory_space<vmem>>, vector<1x8xf32>
    %74 = vector.broadcast %73 : vector<1x8xf32> to vector<256x8xf32>
    %75 = arith.mulf %72, %74 : vector<256x8xf32>
    %c0_92 = arith.constant 0 : index
    %c0_93 = arith.constant 0 : index
    %76 = vector.load %arg7[%c0_92, %c0_93] : memref<1x8xf32, #tpu.memory_space<vmem>>, vector<1x8xf32>
    %77 = vector.broadcast %76 : vector<1x8xf32> to vector<256x8xf32>
    %78 = arith.addf %75, %77 : vector<256x8xf32>
    %79 = arith.addf %78, %50 : vector<256x8xf32>
    %cst_94 = arith.constant 0.000000e+00 : f32
    %80 = vector.broadcast %cst_94 : f32 to vector<256x8xf32>
    %81 = arith.maximumf %79, %80 : vector<256x8xf32>
    %82 = vector.shape_cast %81 : vector<256x8xf32> to vector<16x16x8xf32>
    %c0_95 = arith.constant 0 : index
    %c0_96 = arith.constant 0 : index
    %c0_97 = arith.constant 0 : index
    %c0_98 = arith.constant 0 : index
    %83 = vector.load %arg11[%c0_95, %c0_96, %c0_97, %c0_98] : memref<1x16x16x8xf32, #tpu.memory_space<vmem>>, vector<1x16x16x8xf32>
    %84 = vector.shape_cast %83 : vector<1x16x16x8xf32> to vector<16x16x8xf32>
    %85 = vector.shape_cast %82 : vector<16x16x8xf32> to vector<1x16x16x8xf32>
    tpu.vector_store %arg11[%c0_95, %c0_96, %c0_97, %c0_98], %85 {strides = array<i32>} : memref<1x16x16x8xf32, #tpu.memory_space<vmem>>, vector<1x16x16x8xf32>,
    return
  }
  func.func @transform_0(%arg0: i32) -> (i32, i32, i32, i32) {
    %c0_i32 = arith.constant 0 : i32
    %c0_i32_0 = arith.constant 0 : i32
    %c0_i32_1 = arith.constant 0 : i32
    %c0_i32_2 = arith.constant 0 : i32
    return %arg0, %c0_i32, %c0_i32_0, %c0_i32_1 : i32, i32, i32, i32
  }
  func.func @transform_1(%arg0: i32) -> (i32, i32) {
    %c0_i32 = arith.constant 0 : i32
    %c0_i32_0 = arith.constant 0 : i32
    %c0_i32_1 = arith.constant 0 : i32
    return %c0_i32, %c0_i32_0 : i32, i32
  }
  func.func @transform_2(%arg0: i32) -> (i32, i32) {
    %c0_i32 = arith.constant 0 : i32
    %c0_i32_0 = arith.constant 0 : i32
    %c0_i32_1 = arith.constant 0 : i32
    return %c0_i32, %c0_i32_0 : i32, i32
  }
  func.func @transform_3(%arg0: i32) -> (i32, i32) {
    %c0_i32 = arith.constant 0 : i32
    %c0_i32_0 = arith.constant 0 : i32
    %c0_i32_1 = arith.constant 0 : i32
    return %c0_i32, %c0_i32_0 : i32, i32
  }
  func.func @transform_4(%arg0: i32) -> (i32, i32) {
    %c0_i32 = arith.constant 0 : i32
    %c0_i32_0 = arith.constant 0 : i32
    %c0_i32_1 = arith.constant 0 : i32
    return %c0_i32, %c0_i32_0 : i32, i32
  }
  func.func @transform_5(%arg0: i32) -> (i32, i32) {
    %c0_i32 = arith.constant 0 : i32
    %c0_i32_0 = arith.constant 0 : i32
    %c0_i32_1 = arith.constant 0 : i32
    return %c0_i32, %c0_i32_0 : i32, i32
  }
  func.func @transform_6(%arg0: i32) -> (i32, i32) {
    %c0_i32 = arith.constant 0 : i32
    %c0_i32_0 = arith.constant 0 : i32
    %c0_i32_1 = arith.constant 0 : i32
    return %c0_i32, %c0_i32_0 : i32, i32
  }
  func.func @transform_7(%arg0: i32) -> (i32, i32) {
    %c0_i32 = arith.constant 0 : i32
    %c0_i32_0 = arith.constant 0 : i32
    %c0_i32_1 = arith.constant 0 : i32
    return %c0_i32, %c0_i32_0 : i32, i32
  }
  func.func @transform_8(%arg0: i32) -> (i32, i32) {
    %c0_i32 = arith.constant 0 : i32
    %c0_i32_0 = arith.constant 0 : i32
    %c0_i32_1 = arith.constant 0 : i32
    return %c0_i32, %c0_i32_0 : i32, i32
  }
  func.func @transform_9(%arg0: i32) -> (i32, i32) {
    %c0_i32 = arith.constant 0 : i32
    %c0_i32_0 = arith.constant 0 : i32
    %c0_i32_1 = arith.constant 0 : i32
    return %c0_i32, %c0_i32_0 : i32, i32
  }
  func.func @transform_10(%arg0: i32) -> (i32, i32, i32, i32) {
    %c0_i32 = arith.constant 0 : i32
    %c0_i32_0 = arith.constant 0 : i32
    %c0_i32_1 = arith.constant 0 : i32
    %c0_i32_2 = arith.constant 0 : i32
    return %arg0, %c0_i32, %c0_i32_0, %c0_i32_1 : i32, i32, i32, i32
  }
}

</mosaic_0001>

<bundles_post_ra>
// kernel: tpu_custom_call.1
= control target key start
LH: loop header
LB: loop body
LE: loop exit
PB: predicated region body
PF: predicated region fallthrough
CT: control target
= control target key end

     0   :  { %s6559_s13 = smov 0   ;;  %s9665_s0 = inlined_call_operand.vmem [shape: f32[2,16,16,4], index: 0, kind: input, shape index: {}]   ;;  %s9666_s1 = inlined_call_operand.vmem [shape: bf16[36,8], index: 1, kind: input, shape index: {}]   ;;  %s9667_s2 = inlined_call_operand.vmem [shape: f32[1,8], index: 2, kind: input, shape index: {}]   ;;  %s9668_s3 = inlined_call_operand.vmem [shape: f32[1,8], index: 3, kind: input, shape index: {}]   ;;  %s9669_s4 = inlined_call_operand.vmem [shape: bf16[72,8], index: 4, kind: input, shape index: {}]   ;;  %s9670_s5 = inlined_call_operand.vmem [shape: f32[1,8], index: 5, kind: input, shape index: {}]   ;;  %s9671_s6 = inlined_call_operand.vmem [shape: f32[1,8], index: 6, kind: input, shape index: {}]   ;;  %s9672_s7 = inlined_call_operand.vmem [shape: bf16[4,8], index: 7, kind: input, shape index: {}]   ;;  %s9673_s8 = inlined_call_operand.vmem [shape: f32[1,8], index: 8, kind: input, shape index: {}]   ;;  %s9674_s9 = inlined_call_operand.vmem [shape: f32[1,8], index: 9, kind: input, shape index: {}]   ;;  %s9675_s10 = inlined_call_operand.vmem [shape: f32[2,16,16,8], index: 10, kind: output, shape index: {}]  }
   0x1 LB: > { %s4913_s14 = sadd.s32 4294967295, %s6489_s13   ;;  %p4917_p0 = scmp.ge.s32.totalorder %s6489_s13, 1  ;;  %s6489_s13 = sphi %s6559_s13, %s20_s13  }
   0x2   : > { %p312_p1 = scmp.lt.s32.totalorder %s6489_s13, 3 }
   0x4   : > { %p313_p2 = pnand %p4917_p0, %p312_p1 }
   0x6   : > { %316 = sbr.rel (%p313_p2) target bundleno = 1193 (0x4a9), region = 60 }
   0xd   : > { %vm361_vm0 = vcmask 31744   ;;  %vm364_vm1 = vcmask 25600   ;;  %p6569_p3 = scmp.lt.s32.totalorder %s4913_s14, 1  ;;  %v9676_v0 = vmov 0.0   ;;  %s6492_s20 = smov 4   ;;  %vm1827_vm2 = vcmask 64512  }
   0xe   : > { %362 = vst.msk [vmem:[#allocation2] sm:$0xff] %vm361_vm0, %v9676_v0  ;;  %363 = vst.msk [vmem:[#allocation2 + $0x8] sm:$0xff] %vm361_vm0, %v9676_v0  ;;  %s6493_s21 = smov 8   ;;  %s6494_s22 = smov 12   ;;  %vm2143_vm3 = vcmask 1041408   ;;  %vm1860_vm4 = vcmask 97280  }
   0xf   : > { %365 = vst.msk [vmem:[#allocation2 + $0x10] sm:$0x3] %vm364_vm1, %v9676_v0  ;;  %368 = vst.msk [vmem:[#allocation2 + $0x28] sm:$0x3] %vm364_vm1, %v9676_v0  ;;  %s9903_s14 = smov (!%p6569_p3, %s4913_s14), 1  ;;  %s6495_s23 = smov 16  }
  0x10   : > { %366 = vst.msk [vmem:[#allocation2 + $0x18] sm:$0xff] %vm361_vm0, %v9676_v0  ;;  %367 = vst.msk [vmem:[#allocation2 + $0x20] sm:$0xff] %vm361_vm0, %v9676_v0  ;;  %s4986_s16 = sshll.u32 %s9903_s14, 8  ;;  %s6496_s24 = smov 20   ;;  %vm1893_vm5 = vcmask 130048   ;;  %vm1926_vm6 = vcmask 162816  }
  0x11   : > { %369 = vst.msk [vmem:[#allocation2 + $0x30] sm:$0xff] %vm361_vm0, %v9676_v0  ;;  %370 = vst.msk [vmem:[#allocation2 + $0x38] sm:$0xff] %vm361_vm0, %v9676_v0  ;;  %s6693_s19 = scalar_lea.vmem %s9665_s0, %s4986_s16  ;;  %s6497_s25 = smov 24   ;;  %vm1959_vm7 = vcmask 195584   ;;  %vm1992_vm8 = vcmask 228352   ;;  %vm2025_vm9 = vcmask 261120  }
  0x12   : > { %371 = vst.msk [vmem:[#allocation2 + $0x40] sm:$0x3] %vm364_vm1, %v9676_v0  ;;  %374 = vst.msk [vmem:[#allocation2 + $0x58] sm:$0x3] %vm364_vm1, %v9676_v0  ;;  %v419_v1 = vld [vmem:[%s6693_s19 + $0x10] sm:$0xff]  ;;  %v420_v2 = vld [vmem:[%s6693_s19 + $0x18] sm:$0xff]  ;;  %s9455_s18 = scalar_lea.vmem %s9675_s10, %s4986_s16 }
  0x13   : > { %372 = vst.msk [vmem:[#allocation2 + $0x48] sm:$0xff] %vm361_vm0, %v9676_v0  ;;  %373 = vst.msk [vmem:[#allocation2 + $0x50] sm:$0xff] %vm361_vm0, %v9676_v0  ;;  %v417_v3 = vld [vmem:[%s6693_s19] sm:$0xff]  ;;  %v418_v4 = vld [vmem:[%s6693_s19 + $0x8] sm:$0xff]  ;;  %s6498_s12 = smov 28   ;;  %s6499_s15 = smov 32  }
  0x14   : > { %375 = vst.msk [vmem:[#allocation2 + $0x60] sm:$0xff] %vm361_vm0, %v9676_v0  ;;  %376 = vst.msk [vmem:[#allocation2 + $0x68] sm:$0xff] %vm361_vm0, %v9676_v0  ;;  %v421_v5 = vld [vmem:[%s6693_s19 + $0x20] sm:$0xff]  ;;  %v422_v6 = vld [vmem:[%s6693_s19 + $0x28] sm:$0xff]  ;;  %vm2094_vm10 = vcmask 293888   ;;  %vm2420_vm11 = vcmask 58368  }
  0x15   : > { %377 = vst.msk [vmem:[#allocation2 + $0x70] sm:$0x3] %vm364_vm1, %v9676_v0  ;;  %380 = vst.msk [vmem:[#allocation2 + $0x88] sm:$0x3] %vm364_vm1, %v9676_v0  ;;  %v514_v7 = vld [vmem:[#allocation2 + $0x1] sm:$0xff]  ;;  %v423_v9 = vld [vmem:[%s6693_s19 + $0x30] sm:$0xff] }
  0x16   : > { %378 = vst.msk [vmem:[#allocation2 + $0x78] sm:$0xff] %vm361_vm0, %v9676_v0  ;;  %379 = vst.msk [vmem:[#allocation2 + $0x80] sm:$0xff] %vm361_vm0, %v9676_v0  ;;  %v515_v8 = vld [vmem:[#allocation2 + $0x9] sm:$0xff]  ;;  %v424_v11 = vld [vmem:[%s6693_s19 + $0x38] sm:$0xff]  ;;  %s6500_s27 = smov 40   ;;  %s6501_s28 = smov 48  }
  0x17   : > { %381 = vst.msk [vmem:[#allocation2 + $0x90] sm:$0xff] %vm361_vm0, %v9676_v0  ;;  %382 = vst.msk [vmem:[#allocation2 + $0x98] sm:$0xff] %vm361_vm0, %v9676_v0  ;;  %v5186_v10 = vpack.i.bf16 %v515_v8, %v514_v7  ;;  %v425_v12 = vld [vmem:[%s6693_s19 + $0x40] sm:$0xff]  ;;  %v426_v13 = vld [vmem:[%s6693_s19 + $0x48] sm:$0xff]  ;;  %s6502_s29 = smov 56   ;;  %s6503_s30 = smov 64  }
  0x18   : > { %383 = vst.msk [vmem:[#allocation2 + $0xa0] sm:$0x3] %vm364_vm1, %v9676_v0  ;;  %386 = vst.msk [vmem:[#allocation2 + $0xb8] sm:$0x3] %vm364_vm1, %v9676_v0  ;;  %v427_v14 = vld [vmem:[%s6693_s19 + $0x50] sm:$0xff]  ;;  %v428_v15 = vld [vmem:[%s6693_s19 + $0x58] sm:$0xff] }
  0x19   : > { %384 = vst.msk [vmem:[#allocation2 + $0xa8] sm:$0xff] %vm361_vm0, %v9676_v0  ;;  %385 = vst.msk [vmem:[#allocation2 + $0xb0] sm:$0xff] %vm361_vm0, %v9676_v0  ;;  %v429_v16 = vld [vmem:[%s6693_s19 + $0x60] sm:$0xff]  ;;  %5187 = vrot.lane.b32.xlu0 %v5186_v10, %s6492_s20  ;;  %v430_v17 = vld [vmem:[%s6693_s19 + $0x68] sm:$0xff]  ;;  %vm4519_vm12 = vcmask 1043456   ;;  %vm4286_vm13 = vcmask 326656  }
  0x1a   : > { %387 = vst.msk [vmem:[#allocation2 + $0xc0] sm:$0xff] %vm361_vm0, %v9676_v0  ;;  %388 = vst.msk [vmem:[#allocation2 + $0xc8] sm:$0xff] %vm361_vm0, %v9676_v0  ;;  %v431_v18 = vld [vmem:[%s6693_s19 + $0x70] sm:$0xff]  ;;  %v432_v19 = vld [vmem:[%s6693_s19 + $0x78] sm:$0xff]  ;;  %vm4319_vm14 = vcmask 392192   ;;  %vm4352_vm15 = vcmask 457728  }
  0x1b   : > { %389 = vst.msk [vmem:[#allocation2 + $0xd0] sm:$0x3] %vm364_vm1, %v9676_v0  ;;  %392 = vst.msk [vmem:[#allocation2 + $0xe8] sm:$0x3] %vm364_vm1, %v9676_v0  ;;  %v433_v20 = vld [vmem:[%s6693_s19 + $0x80] sm:$0xff]  ;;  %v434_v21 = vld [vmem:[%s6693_s19 + $0x88] sm:$0xff] }
  0x1c   : > { %390 = vst.msk [vmem:[#allocation2 + $0xd8] sm:$0xff] %vm361_vm0, %v9676_v0  ;;  %391 = vst.msk [vmem:[#allocation2 + $0xe0] sm:$0xff] %vm361_vm0, %v9676_v0  ;;  %v435_v22 = vld [vmem:[%s6693_s19 + $0x90] sm:$0xff]  ;;  %v436_v23 = vld [vmem:[%s6693_s19 + $0x98] sm:$0xff] }
  0x1d   : > { %393 = vst.msk [vmem:[#allocation2 + $0xf0] sm:$0xff] %vm361_vm0, %v9676_v0  ;;  %394 = vst.msk [vmem:[#allocation2 + $0xf8] sm:$0xff] %vm361_vm0, %v9676_v0  ;;  %v437_v24 = vld [vmem:[%s6693_s19 + $0xa0] sm:$0xff]  ;;  %v438_v25 = vld [vmem:[%s6693_s19 + $0xa8] sm:$0xff] }
  0x1e   : > { %395 = vst.msk [vmem:[#allocation2 + $0x100] sm:$0x3] %vm364_vm1, %v9676_v0  ;;  %398 = vst.msk [vmem:[#allocation2 + $0x118] sm:$0x3] %vm364_vm1, %v9676_v0  ;;  %v439_v35 = vld [vmem:[%s6693_s19 + $0xb0] sm:$0xff]  ;;  %v440_v36 = vld [vmem:[%s6693_s19 + $0xb8] sm:$0xff] }
  0x1f   : > { %396 = vst.msk [vmem:[#allocation2 + $0x108] sm:$0xff] %vm361_vm0, %v9676_v0  ;;  %397 = vst.msk [vmem:[#allocation2 + $0x110] sm:$0xff] %vm361_vm0, %v9676_v0  ;;  %v441_v50 = vld [vmem:[%s6693_s19 + $0xc0] sm:$0xff]  ;;  %v442_v51 = vld [vmem:[%s6693_s19 + $0xc8] sm:$0xff] }
  0x20   : > { %399 = vst.msk [vmem:[#allocation2 + $0x120] sm:$0xff] %vm361_vm0, %v9676_v0  ;;  %400 = vst.msk [vmem:[#allocation2 + $0x128] sm:$0xff] %vm361_vm0, %v9676_v0  ;;  %v443_v52 = vld [vmem:[%s6693_s19 + $0xd0] sm:$0xff]  ;;  %v444_v53 = vld [vmem:[%s6693_s19 + $0xd8] sm:$0xff] }
  0x21   : > { %401 = vst.msk [vmem:[#allocation2 + $0x130] sm:$0x3] %vm364_vm1, %v9676_v0  ;;  %404 = vst.msk [vmem:[#allocation2 + $0x148] sm:$0x3] %vm364_vm1, %v9676_v0  ;;  %v445_v54 = vld [vmem:[%s6693_s19 + $0xe0] sm:$0xff]  ;;  %v446_v55 = vld [vmem:[%s6693_s19 + $0xe8] sm:$0xff] }
  0x22   : > { %402 = vst.msk [vmem:[#allocation2 + $0x138] sm:$0xff] %vm361_vm0, %v9676_v0  ;;  %403 = vst.msk [vmem:[#allocation2 + $0x140] sm:$0xff] %vm361_vm0, %v9676_v0 }
  0x23   : > { %405 = vst.msk [vmem:[#allocation2 + $0x150] sm:$0xff] %vm361_vm0, %v9676_v0  ;;  %406 = vst.msk [vmem:[#allocation2 + $0x158] sm:$0xff] %vm361_vm0, %v9676_v0 }
  0x24   : > { %407 = vst.msk [vmem:[#allocation2 + $0x160] sm:$0x3] %vm364_vm1, %v9676_v0  ;;  %410 = vst.msk [vmem:[#allocation2 + $0x178] sm:$0x3] %vm364_vm1, %v9676_v0 }
  0x25   : > { %408 = vst.msk [vmem:[#allocation2 + $0x168] sm:$0xff] %vm361_vm0, %v9676_v0  ;;  %409 = vst.msk [vmem:[#allocation2 + $0x170] sm:$0xff] %vm361_vm0, %v9676_v0 }
  0x26   : > { %411 = vst.msk [vmem:[#allocation2 + $0x180] sm:$0xff] %vm361_vm0, %v9676_v0  ;;  %412 = vst.msk [vmem:[#allocation2 + $0x188] sm:$0xff] %vm361_vm0, %v9676_v0 }
  0x27   : > { %413 = vst.msk [vmem:[#allocation2 + $0x190] sm:$0x3] %vm364_vm1, %v9676_v0  ;;  %416 = vst.msk [vmem:[#allocation2 + $0x1a8] sm:$0x3] %vm364_vm1, %v9676_v0  ;;  %vm4470_vm1 = vcmask 588800  }
  0x28   : > { %414 = vst.msk [vmem:[#allocation2 + $0x198] sm:$0xff] %vm361_vm0, %v9676_v0  ;;  %415 = vst.msk [vmem:[#allocation2 + $0x1a0] sm:$0xff] %vm361_vm0, %v9676_v0 }
  0x29   : > { %452 = vst.msk [vmem:[#allocation2 + $0x31] sm:$0xff] %vm361_vm0, %v419_v1  ;;  %453 = vst.msk [vmem:[#allocation2 + $0x39] sm:$0xff] %vm361_vm0, %v420_v2 }
  0x2a   : > { %450 = vst.msk [vmem:[#allocation2 + $0x19] sm:$0xff] %vm361_vm0, %v417_v3  ;;  %451 = vst.msk [vmem:[#allocation2 + $0x21] sm:$0xff] %vm361_vm0, %v418_v4 }
  0x2b   : > { %454 = vst.msk [vmem:[#allocation2 + $0x49] sm:$0xff] %vm361_vm0, %v421_v5  ;;  %455 = vst.msk [vmem:[#allocation2 + $0x51] sm:$0xff] %vm361_vm0, %v422_v6 }
  0x2c   : > { %456 = vst.msk [vmem:[#allocation2 + $0x61] sm:$0xff] %vm361_vm0, %v423_v9  ;;  %457 = vst.msk [vmem:[#allocation2 + $0x69] sm:$0xff] %vm361_vm0, %v424_v11 }
  0x2d   : > { %458 = vst.msk [vmem:[#allocation2 + $0x79] sm:$0xff] %vm361_vm0, %v425_v12  ;;  %459 = vst.msk [vmem:[#allocation2 + $0x81] sm:$0xff] %vm361_vm0, %v426_v13 }
  0x2e   : > { %460 = vst.msk [vmem:[#allocation2 + $0x91] sm:$0xff] %vm361_vm0, %v427_v14  ;;  %461 = vst.msk [vmem:[#allocation2 + $0x99] sm:$0xff] %vm361_vm0, %v428_v15  ;;  %v546_v15 = vld [vmem:[#allocation2 + $0x2] sm:$0xff] }
  0x2f   : > { %462 = vst.msk [vmem:[#allocation2 + $0xa9] sm:$0xff] %vm361_vm0, %v429_v16  ;;  %463 = vst.msk [vmem:[#allocation2 + $0xb1] sm:$0xff] %vm361_vm0, %v430_v17  ;;  %v547_v16 = vld [vmem:[#allocation2 + $0xa] sm:$0xff] }
  0x30   : > { %464 = vst.msk [vmem:[#allocation2 + $0xc1] sm:$0xff] %vm361_vm0, %v431_v18  ;;  %465 = vst.msk [vmem:[#allocation2 + $0xc9] sm:$0xff] %vm361_vm0, %v432_v19  ;;  %v518_v26 = vld [vmem:[#allocation2 + $0x31] sm:$0xff]  ;;  %v519_v27 = vld [vmem:[#allocation2 + $0x39] sm:$0xff]  ;;  %v5266_v18 = vpack.i.bf16 %v547_v16, %v546_v15 }
  0x31   : > { %466 = vst.msk [vmem:[#allocation2 + $0xd9] sm:$0xff] %vm361_vm0, %v433_v20  ;;  %467 = vst.msk [vmem:[#allocation2 + $0xe1] sm:$0xff] %vm361_vm0, %v434_v21  ;;  %v516_v28 = vld [vmem:[#allocation2 + $0x19] sm:$0xff]  ;;  %v6740_v29 = vpack.i.bf16 %v519_v27, %v518_v26  ;;  %v517_v30 = vld [vmem:[#allocation2 + $0x21] sm:$0xff] }
  0x32   : > { %468 = vst.msk [vmem:[#allocation2 + $0xf1] sm:$0xff] %vm361_vm0, %v435_v22  ;;  %469 = vst.msk [vmem:[#allocation2 + $0xf9] sm:$0xff] %vm361_vm0, %v436_v23  ;;  %v520_v31 = vld [vmem:[#allocation2 + $0x49] sm:$0xff]  ;;  %v521_v32 = vld [vmem:[#allocation2 + $0x51] sm:$0xff]  ;;  %v6742_v33 = vpack.i.bf16 %v517_v30, %v516_v28 }
  0x33   : > { %470 = vst.msk [vmem:[#allocation2 + $0x109] sm:$0xff] %vm361_vm0, %v437_v24  ;;  %471 = vst.msk [vmem:[#allocation2 + $0x111] sm:$0xff] %vm361_vm0, %v438_v25  ;;  %v522_v34 = vld [vmem:[#allocation2 + $0x61] sm:$0xff]  ;;  %5197 = vrot.lane.b32.xlu1 %v6740_v29, %s6492_s20  ;;  %v6748_v37 = vpack.i.bf16 %v521_v32, %v520_v31  ;;  %v523_v38 = vld [vmem:[#allocation2 + $0x69] sm:$0xff] }
  0x34   : > { %472 = vst.msk [vmem:[#allocation2 + $0x121] sm:$0xff] %vm361_vm0, %v439_v35  ;;  %473 = vst.msk [vmem:[#allocation2 + $0x129] sm:$0xff] %vm361_vm0, %v440_v36  ;;  %5192 = vrot.lane.b32.xlu0 %v6742_v33, %s6492_s20  ;;  %v6754_v39 = vpack.i.bf16 %v523_v38, %v522_v34  ;;  %v524_v40 = vld [vmem:[#allocation2 + $0x79] sm:$0xff]  ;;  %v525_v41 = vld [vmem:[#allocation2 + $0x81] sm:$0xff] }
  0x35   : > { %v526_v42 = vld [vmem:[#allocation2 + $0x91] sm:$0xff]  ;;  %v527_v43 = vld [vmem:[#allocation2 + $0x99] sm:$0xff]  ;;  %v6758_v45 = vpack.i.bf16 %v525_v41, %v524_v40  ;;  %474 = vst.msk [vmem:[#allocation2 + $0x139] sm:$0xff] %vm361_vm0, %v441_v50  ;;  %475 = vst.msk [vmem:[#allocation2 + $0x141] sm:$0xff] %vm361_vm0, %v442_v51 }
  0x36   : > { %v528_v44 = vld [vmem:[#allocation2 + $0xa9] sm:$0xff]  ;;  %v529_v46 = vld [vmem:[#allocation2 + $0xb1] sm:$0xff]  ;;  %v6762_v49 = vpack.i.bf16 %v527_v43, %v526_v42  ;;  %476 = vst.msk [vmem:[#allocation2 + $0x151] sm:$0xff] %vm361_vm0, %v443_v52  ;;  %477 = vst.msk [vmem:[#allocation2 + $0x159] sm:$0xff] %vm361_vm0, %v444_v53 }
  0x37   : > { %5202 = vrot.lane.b32.xlu1 %v6748_v37, %s6492_s20  ;;  %v530_v47 = vld [vmem:[#allocation2 + $0xc1] sm:$0xff]  ;;  %v531_v48 = vld [vmem:[#allocation2 + $0xc9] sm:$0xff]  ;;  %478 = vst.msk [vmem:[#allocation2 + $0x169] sm:$0xff] %vm361_vm0, %v445_v54  ;;  %479 = vst.msk [vmem:[#allocation2 + $0x171] sm:$0xff] %vm361_vm0, %v446_v55  ;;  %v6778_v56 = vpack.i.bf16 %v529_v46, %v528_v44 }
  0x38   : > { %5207 = vrot.lane.b32.xlu0 %v6754_v39, %s6492_s20  ;;  %v6782_v57 = vpack.i.bf16 %v531_v48, %v530_v47  ;;  %v532_v58 = vld [vmem:[#allocation2 + $0xd9] sm:$0xff]  ;;  %v533_v59 = vld [vmem:[#allocation2 + $0xe1] sm:$0xff]  ;;  %2418 = vst.msk [vmem:[#allocation3] sm:$0xff] %vm1827_vm2, %v9676_v0  ;;  %2419 = vst.msk [vmem:[#allocation3 + $0x8] sm:$0xff] %vm1827_vm2, %v9676_v0 }
  0x39   : > { %v534_v60 = vld [vmem:[#allocation2 + $0xf1] sm:$0xff]  ;;  %v535_v61 = vld [vmem:[#allocation2 + $0xf9] sm:$0xff]  ;;  %v6786_v62 = vpack.i.bf16 %v533_v59, %v532_v58  ;;  %2422 = vst.msk [vmem:[#allocation3 + $0x18] sm:$0xff] %vm1827_vm2, %v9676_v0  ;;  %2423 = vst.msk [vmem:[#allocation3 + $0x20] sm:$0xff] %vm1827_vm2, %v9676_v0 }
  0x3a   : > { %v6790_v63 = vpack.i.bf16 %v535_v61, %v534_v60  ;;  %v536_v1 = vld [vmem:[#allocation2 + $0x109] sm:$0xff]  ;;  %v537_v2 = vld [vmem:[#allocation2 + $0x111] sm:$0xff]  ;;  %2425 = vst.msk [vmem:[#allocation3 + $0x30] sm:$0xff] %vm1827_vm2, %v9676_v0  ;;  %2426 = vst.msk [vmem:[#allocation3 + $0x38] sm:$0xff] %vm1827_vm2, %v9676_v0 }
  0x3b   : > { %5212 = vrot.lane.b32.xlu1 %v6758_v45, %s6492_s20  ;;  %v538_v3 = vld [vmem:[#allocation2 + $0x121] sm:$0xff]  ;;  %v539_v4 = vld [vmem:[#allocation2 + $0x129] sm:$0xff]  ;;  %v6794_v5 = vpack.i.bf16 %v537_v2, %v536_v1  ;;  %2428 = vst.msk [vmem:[#allocation3 + $0x48] sm:$0xff] %vm1827_vm2, %v9676_v0  ;;  %2429 = vst.msk [vmem:[#allocation3 + $0x50] sm:$0xff] %vm1827_vm2, %v9676_v0 }
  0x3c   : > { %5217 = vrot.lane.b32.xlu0 %v6762_v49, %s6492_s20  ;;  %v6798_v6 = vpack.i.bf16 %v539_v4, %v538_v3  ;;  %v540_v7 = vld [vmem:[#allocation2 + $0x139] sm:$0xff]  ;;  %v541_v8 = vld [vmem:[#allocation2 + $0x141] sm:$0xff]  ;;  %2431 = vst.msk [vmem:[#allocation3 + $0x60] sm:$0xff] %vm1827_vm2, %v9676_v0  ;;  %2432 = vst.msk [vmem:[#allocation3 + $0x68] sm:$0xff] %vm1827_vm2, %v9676_v0 }
  0x3d   : > { %v542_v9 = vld [vmem:[#allocation2 + $0x151] sm:$0xff]  ;;  %v543_v10 = vld [vmem:[#allocation2 + $0x159] sm:$0xff]  ;;  %2434 = vst.msk [vmem:[#allocation3 + $0x78] sm:$0xff] %vm1827_vm2, %v9676_v0  ;;  %2435 = vst.msk [vmem:[#allocation3 + $0x80] sm:$0xff] %vm1827_vm2, %v9676_v0  ;;  %v6874_v11 = vpack.i.bf16 %v541_v8, %v540_v7 }
  0x3e   : > { %2437 = vst.msk [vmem:[#allocation3 + $0x90] sm:$0xff] %vm1827_vm2, %v9676_v0  ;;  %2438 = vst.msk [vmem:[#allocation3 + $0x98] sm:$0xff] %vm1827_vm2, %v9676_v0  ;;  %v6878_v12 = vpack.i.bf16 %v543_v10, %v542_v9  ;;  %v544_v13 = vld [vmem:[#allocation2 + $0x169] sm:$0xff]  ;;  %v545_v14 = vld [vmem:[#allocation2 + $0x171] sm:$0xff] }
  0x3f   : > { %5222 = vrot.lane.b32.xlu1 %v6778_v56, %s6492_s20  ;;  %2440 = vst.msk [vmem:[#allocation3 + $0xa8] sm:$0xff] %vm1827_vm2, %v9676_v0  ;;  %2441 = vst.msk [vmem:[#allocation3 + $0xb0] sm:$0xff] %vm1827_vm2, %v9676_v0  ;;  %v6882_v17 = vpack.i.bf16 %v545_v14, %v544_v13  ;;  %v548_v19 = vld [vmem:[#allocation2 + $0x1a] sm:$0xff]  ;;  %v549_v20 = vld [vmem:[#allocation2 + $0x22] sm:$0xff] }
  0x40   : > { %5227 = vrot.lane.b32.xlu0 %v6782_v57, %s6492_s20  ;;  %2443 = vst.msk [vmem:[#allocation3 + $0xc0] sm:$0xff] %vm1827_vm2, %v9676_v0  ;;  %2444 = vst.msk [vmem:[#allocation3 + $0xc8] sm:$0xff] %vm1827_vm2, %v9676_v0  ;;  %v550_v21 = vld [vmem:[#allocation2 + $0x32] sm:$0xff]  ;;  %v551_v22 = vld [vmem:[#allocation2 + $0x3a] sm:$0xff]  ;;  %v6888_v23 = vpack.i.bf16 %v549_v20, %v548_v19 }
  0x41   : > { %2446 = vst.msk [vmem:[#allocation3 + $0xd8] sm:$0xff] %vm1827_vm2, %v9676_v0  ;;  %2447 = vst.msk [vmem:[#allocation3 + $0xe0] sm:$0xff] %vm1827_vm2, %v9676_v0  ;;  %v6891_v24 = vpack.i.bf16 %v551_v22, %v550_v21  ;;  %v552_v25 = vld [vmem:[#allocation2 + $0x4a] sm:$0xff]  ;;  %v553_v26 = vld [vmem:[#allocation2 + $0x52] sm:$0xff] }
  0x42   : > { %2449 = vst.msk [vmem:[#allocation3 + $0xf0] sm:$0xff] %vm1827_vm2, %v9676_v0  ;;  %2450 = vst.msk [vmem:[#allocation3 + $0xf8] sm:$0xff] %vm1827_vm2, %v9676_v0  ;;  %v554_v27 = vld [vmem:[#allocation2 + $0x62] sm:$0xff]  ;;  %v555_v28 = vld [vmem:[#allocation2 + $0x6a] sm:$0xff]  ;;  %v6899_v32 = vpack.i.bf16 %v553_v26, %v552_v25 }
  0x43   : > { %5232 = vrot.lane.b32.xlu1 %v6786_v62, %s6492_s20  ;;  %2452 = vst.msk [vmem:[#allocation3 + $0x108] sm:$0xff] %vm1827_vm2, %v9676_v0  ;;  %2453 = vst.msk [vmem:[#allocation3 + $0x110] sm:$0xff] %vm1827_vm2, %v9676_v0  ;;  %v447_v30 = vld [vmem:[%s6693_s19 + $0xf0] sm:$0xff]  ;;  %v448_v31 = vld [vmem:[%s6693_s19 + $0xf8] sm:$0xff]  ;;  %v6903_v34 = vpack.i.bf16 %v555_v28, %v554_v27 }
  0x44   : > { %5237 = vrot.lane.b32.xlu0 %v6790_v63, %s6492_s20  ;;  %2455 = vst.msk [vmem:[#allocation3 + $0x120] sm:$0xff] %vm1827_vm2, %v9676_v0  ;;  %2456 = vst.msk [vmem:[#allocation3 + $0x128] sm:$0xff] %vm1827_vm2, %v9676_v0  ;;  %v556_v35 = vld [vmem:[#allocation2 + $0x7a] sm:$0xff]  ;;  %v557_v36 = vld [vmem:[#allocation2 + $0x82] sm:$0xff] }
  0x45   : > { %2458 = vst.msk [vmem:[#allocation3 + $0x138] sm:$0xff] %vm1827_vm2, %v9676_v0  ;;  %2459 = vst.msk [vmem:[#allocation3 + $0x140] sm:$0xff] %vm1827_vm2, %v9676_v0  ;;  %v558_v38 = vld [vmem:[#allocation2 + $0x92] sm:$0xff]  ;;  %v559_v40 = vld [vmem:[#allocation2 + $0x9a] sm:$0xff]  ;;  %v6907_v41 = vpack.i.bf16 %v557_v36, %v556_v35 }
  0x46   : > { %2461 = vst.msk [vmem:[#allocation3 + $0x150] sm:$0xff] %vm1827_vm2, %v9676_v0  ;;  %2462 = vst.msk [vmem:[#allocation3 + $0x158] sm:$0xff] %vm1827_vm2, %v9676_v0  ;;  %v6911_v42 = vpack.i.bf16 %v559_v40, %v558_v38  ;;  %v560_v43 = vld [vmem:[#allocation2 + $0xaa] sm:$0xff]  ;;  %v561_v44 = vld [vmem:[#allocation2 + $0xb2] sm:$0xff] }
  0x47   : > { %2464 = vst.msk [vmem:[#allocation3 + $0x168] sm:$0xff] %vm1827_vm2, %v9676_v0  ;;  %2465 = vst.msk [vmem:[#allocation3 + $0x170] sm:$0xff] %vm1827_vm2, %v9676_v0  ;;  %5242 = vrot.lane.b32.xlu1 %v6794_v5, %s6492_s20  ;;  %v562_v46 = vld [vmem:[#allocation2 + $0xc2] sm:$0xff]  ;;  %v563_v47 = vld [vmem:[#allocation2 + $0xca] sm:$0xff]  ;;  %v6915_v48 = vpack.i.bf16 %v561_v44, %v560_v43 }
  0x48   : > { %2467 = vst.msk [vmem:[#allocation3 + $0x180] sm:$0xff] %vm1827_vm2, %v9676_v0  ;;  %2468 = vst.msk [vmem:[#allocation3 + $0x188] sm:$0xff] %vm1827_vm2, %v9676_v0  ;;  %5247 = vrot.lane.b32.xlu0 %v6798_v6, %s6492_s20  ;;  %v6919_v50 = vpack.i.bf16 %v563_v47, %v562_v46  ;;  %v564_v51 = vld [vmem:[#allocation2 + $0xda] sm:$0xff]  ;;  %v565_v52 = vld [vmem:[#allocation2 + $0xe2] sm:$0xff] }
  0x49   : > { %2470 = vst.msk [vmem:[#allocation3 + $0x198] sm:$0xff] %vm1827_vm2, %v9676_v0  ;;  %2471 = vst.msk [vmem:[#allocation3 + $0x1a0] sm:$0xff] %vm1827_vm2, %v9676_v0  ;;  %v566_v53 = vld [vmem:[#allocation2 + $0xf2] sm:$0xff]  ;;  %v567_v54 = vld [vmem:[#allocation2 + $0xfa] sm:$0xff]  ;;  %v6923_v55 = vpack.i.bf16 %v565_v52, %v564_v51 }
  0x4a   : > { %480 = vst.msk [vmem:[#allocation2 + $0x181] sm:$0xff] %vm361_vm0, %v447_v30  ;;  %481 = vst.msk [vmem:[#allocation2 + $0x189] sm:$0xff] %vm361_vm0, %v448_v31  ;;  %v6927_v58 = vpack.i.bf16 %v567_v54, %v566_v53  ;;  %v568_v59 = vld [vmem:[#allocation2 + $0x10a] sm:$0xff]  ;;  %v569_v60 = vld [vmem:[#allocation2 + $0x112] sm:$0xff] }
  0x4b   : > { %5252 = vrot.lane.b32.xlu1 %v6874_v11, %s6492_s20  ;;  %v570_v61 = vld [vmem:[#allocation2 + $0x122] sm:$0xff]  ;;  %v571_v1 = vld [vmem:[#allocation2 + $0x12a] sm:$0xff]  ;;  %v6931_v2 = vpack.i.bf16 %v569_v60, %v568_v59  ;;  %v572_v4 = vld [vmem:[#allocation2 + $0x13a] sm:$0xff] }
  0x4c   : > { %5257 = vrot.lane.b32.xlu0 %v6878_v12, %s6492_s20  ;;  %v6935_v3 = vpack.i.bf16 %v571_v1, %v570_v61  ;;  %v573_v7 = vld [vmem:[#allocation2 + $0x142] sm:$0xff]  ;;  %v574_v8 = vld [vmem:[#allocation2 + $0x152] sm:$0xff]  ;;  %v575_v9 = vld [vmem:[#allocation2 + $0x15a] sm:$0xff] }
  0x4d   : > { %v6939_v10 = vpack.i.bf16 %v573_v7, %v572_v4  ;;  %v6943_v13 = vpack.i.bf16 %v575_v9, %v574_v8  ;;  %v576_v14 = vld [vmem:[#allocation2 + $0x16a] sm:$0xff]  ;;  %v577_v15 = vld [vmem:[#allocation2 + $0x172] sm:$0xff]  ;;  %v6976_v30 = vld [vmem:[#allocation2 + $0x60] sm:$0xff] }
  0x4e   : > { %v6945_v16 = vld [vmem:[#allocation2 + $0x18] sm:$0xff]  ;;  %v6951_v19 = vpack.i.bf16 %v577_v15, %v576_v14  ;;  %v6957_v21 = vld [vmem:[#allocation2 + $0x30] sm:$0xff]  ;;  %v6961_v25 = vld [vmem:[#allocation2 + $0x48] sm:$0xff] }
  0x4f   : > { %5262 = vrot.lane.b32.xlu1 %v6882_v17, %s6492_s20  ;;  %v6959_v22 = vld [vmem:[#allocation2 + $0x38] sm:$0xff]  ;;  %v6963_v26 = vld [vmem:[#allocation2 + $0x50] sm:$0xff]  ;;  %v6978_v31 = vld [vmem:[#allocation2 + $0x68] sm:$0xff] }
  0x50   : > { %5267 = vrot.lane.b32.xlu0 %v5266_v18, %s6493_s21  ;;  %v6947_v18 = vld [vmem:[#allocation2 + $0x20] sm:$0xff]  ;;  %v6969_v27 = vpack.i.bf16 %v6959_v22, %v6957_v21  ;;  %v6974_v28 = vpack.i.bf16 %v6963_v26, %v6961_v25  ;;  %v6980_v35 = vld [vmem:[#allocation2 + $0x78] sm:$0xff]  ;;  %v6988_v38 = vpack.i.bf16 %v6978_v31, %v6976_v30  ;;  %v6996_v43 = vld [vmem:[#allocation2 + $0x90] sm:$0xff] }
  0x51   : > { %v5346_v20 = vpack.i.bf16 %v6947_v18, %v6945_v16  ;;  %v6982_v36 = vld [vmem:[#allocation2 + $0x80] sm:$0xff]  ;;  %v6998_v44 = vld [vmem:[#allocation2 + $0x98] sm:$0xff]  ;;  %v7000_v46 = vld [vmem:[#allocation2 + $0xa8] sm:$0xff] }
  0x52   : > { %v6994_v40 = vpack.i.bf16 %v6982_v36, %v6980_v35  ;;  %9749 = vst [vmem:[#allocation4_spill] sm:$0xff] %v7000_v46  ;;  %v7002_v47 = vld [vmem:[#allocation2 + $0xb0] sm:$0xff]  ;;  %v7008_v51 = vpack.i.bf16 %v6998_v44, %v6996_v43  ;;  %v7016_v53 = vld [vmem:[#allocation2 + $0xc0] sm:$0xff]  ;;  %v7018_v54 = vld [vmem:[#allocation2 + $0xc8] sm:$0xff] }
  0x53   : > { %5272 = vrot.lane.b32.xlu1 %v6888_v23, %s6493_s21  ;;  %v7014_v52 = vpack.i.bf16 %v7002_v47, %v7000_v46  ;;  %9750 = vst [vmem:[#allocation5_spill] sm:$0xff] %v7016_v53  ;;  %9751 = vst [vmem:[#allocation6_spill] sm:$0xff] %v7018_v54  ;;  %v7020_v59 = vld [vmem:[#allocation2 + $0xd8] sm:$0xff]  ;;  %v7022_v60 = vld [vmem:[#allocation2 + $0xe0] sm:$0xff]  ;;  %v7028_v61 = vpack.i.bf16 %v7018_v54, %v7016_v53 }
  0x54   : > { %5277 = vrot.lane.b32.xlu0 %v6891_v24, %s6493_s21  ;;  %9752 = vst [vmem:[#allocation7_spill] sm:$0xff] %v7020_v59  ;;  %9753 = vst [vmem:[#allocation8_spill] sm:$0xff] %v7022_v60  ;;  %v7034_v1 = vpack.i.bf16 %v7022_v60, %v7020_v59  ;;  %v7036_v4 = vld [vmem:[#allocation2 + $0xf0] sm:$0xff]  ;;  %v7038_v7 = vld [vmem:[#allocation2 + $0xf8] sm:$0xff] }
  0x55   : > { %9754 = vst [vmem:[#allocation9_spill] sm:$0xff] %v7036_v4  ;;  %9755 = vst [vmem:[#allocation10_spill] sm:$0xff] %v7038_v7  ;;  %v7040_v8 = vld [vmem:[#allocation2 + $0x108] sm:$0xff]  ;;  %v7042_v9 = vld [vmem:[#allocation2 + $0x110] sm:$0xff]  ;;  %v7048_v14 = vpack.i.bf16 %v7038_v7, %v7036_v4 }
  0x56   : > { %9756 = vst [vmem:[#allocation11_spill] sm:$0xff] %v7040_v8  ;;  %9757 = vst [vmem:[#allocation12_spill] sm:$0xff] %v7042_v9  ;;  %v7054_v15 = vpack.i.bf16 %v7042_v9, %v7040_v8  ;;  %v7058_v0 = vld [vmem:[#allocation2 + $0x128] sm:$0xff]  ;;  %v7060_v59 = vld [vmem:[#allocation2 + $0x138] sm:$0xff] }
  0x57   : > { %5282 = vrot.lane.b32.xlu1 %v6899_v32, %s6493_s21  ;;  %9759 = vst [vmem:[#allocation14_spill] sm:$0xff] %v7058_v0  ;;  %9760 = vst [vmem:[#allocation15_spill] sm:$0xff] %v7060_v59  ;;  %v7062_v60 = vld [vmem:[#allocation2 + $0x140] sm:$0xff]  ;;  %v7076_v9 = vld [vmem:[#allocation2 + $0x150] sm:$0xff] }
  0x58   : > { %5287 = vrot.lane.b32.xlu0 %v6903_v34, %s6493_s21  ;;  %9761 = vst [vmem:[#allocation16_spill] sm:$0xff] %v7062_v60  ;;  %v7074_v8 = vpack.i.bf16 %v7062_v60, %v7060_v59  ;;  %v7078_v7 = vld [vmem:[#allocation2 + $0x158] sm:$0xff]  ;;  %v7080_v53 = vld [vmem:[#allocation2 + $0x168] sm:$0xff]  ;;  %v7082_v54 = vld [vmem:[#allocation2 + $0x170] sm:$0xff] }
  0x59   : > { %v7094_v59 = vpack.i.bf16 %v7082_v54, %v7080_v53  ;;  %v608_v60 = vld [vmem:[#allocation2 + $0x180] sm:$0xff] }
  0x5b   : > { %5292 = vrot.lane.b32.xlu1 %v6907_v41, %s6493_s21 }
  0x5c   : > { %5297 = vrot.lane.b32.xlu0 %v6911_v42, %s6493_s21 }
  0x5f   : > { %5302 = vrot.lane.b32.xlu1 %v6915_v48, %s6493_s21 }
  0x60   : > { %5307 = vrot.lane.b32.xlu0 %v6919_v50, %s6493_s21 }
  0x63   : > { %5312 = vrot.lane.b32.xlu1 %v6923_v55, %s6493_s21 }
  0x64   : > { %5317 = vrot.lane.b32.xlu0 %v6927_v58, %s6493_s21 }
  0x67   : > { %5322 = vrot.lane.b32.xlu1 %v6931_v2, %s6493_s21 }
  0x68   : > { %5327 = vrot.lane.b32.xlu0 %v6935_v3, %s6493_s21 }
  0x6b   : > { %5332 = vrot.lane.b32.xlu1 %v6939_v10, %s6493_s21 }
  0x6c   : > { %5337 = vrot.lane.b32.xlu0 %v6943_v13, %s6493_s21 }
  0x6f   : > { %5342 = vrot.lane.b32.xlu1 %v6951_v19, %s6493_s21 }
  0x70   : > { %5347 = vrot.lane.b32.xlu0 %v5346_v20, %s6494_s22  ;;  %v7056_v20 = vld [vmem:[#allocation2 + $0x120] sm:$0xff] }
  0x71   : > { %9758 = vst [vmem:[#allocation13_spill] sm:$0xff] %v7056_v20  ;;  %v7068_v4 = vpack.i.bf16 %v7058_v0, %v7056_v20  ;;  %v7088_v20 = vpack.i.bf16 %v7078_v7, %v7076_v9  ;;  %v609_v0 = vld [vmem:[#allocation2 + $0x188] sm:$0xff] }
  0x72   : > { %v7098_v46 = vpack.i.bf16 %v609_v0, %v608_v60 }
  0x73   : > { %5352 = vrot.lane.b32.xlu1 %v6969_v27, %s6494_s22 }
  0x74   : > { %5357 = vrot.lane.b32.xlu0 %v6974_v28, %s6494_s22 }
  0x77   : > { %5362 = vrot.lane.b32.xlu1 %v6988_v38, %s6494_s22 }
  0x78   : > { %5367 = vrot.lane.b32.xlu0 %v6994_v40, %s6494_s22 }
  0x7b   : > { %5372 = vrot.lane.b32.xlu1 %v7008_v51, %s6494_s22 }
  0x7c   : > { %5377 = vrot.lane.b32.xlu0 %v7014_v52, %s6494_s22 }
  0x7f   : > { %5382 = vrot.lane.b32.xlu1 %v7028_v61, %s6494_s22 }
  0x80   : > { %5387 = vrot.lane.b32.xlu0 %v7034_v1, %s6494_s22 }
  0x83   : > { %5392 = vrot.lane.b32.xlu1 %v7048_v14, %s6494_s22 }
  0x84   : > { %5397 = vrot.lane.b32.xlu0 %v7054_v15, %s6494_s22 }
  0x87   : > { %5402 = vrot.lane.b32.xlu1 %v7068_v4, %s6494_s22 }
  0x88   : > { %5407 = vrot.lane.b32.xlu0 %v7074_v8, %s6494_s22 }
  0x8b   : > { %5412 = vrot.lane.b32.xlu1 %v7088_v20, %s6494_s22  ;;  %v7122_v0 = vpop.permute.xlu0 %5187 }
  0x8c   : > { %5417 = vrot.lane.b32.xlu0 %v7094_v59, %s6494_s22 }
  0x8f   : > { %5422 = vrot.lane.b32.xlu1 %v7098_v46, %s6494_s22 }
  0x90   : > { %5427 = vrot.lane.b32.xlu0 %v6742_v33, %s6495_s23 }
  0x93   : > { %5432 = vrot.lane.b32.xlu1 %v6740_v29, %s6495_s23 }
  0x94   : > { %5437 = vrot.lane.b32.xlu0 %v6748_v37, %s6495_s23  ;;  %v640_v37 = vld [vmem:[#allocation2 + $0x181] sm:$0xff] }
  0x97   : > { %5442 = vrot.lane.b32.xlu1 %v6754_v39, %s6495_s23  ;;  %v641_v39 = vld [vmem:[#allocation2 + $0x189] sm:$0xff] }
  0x98   : > { %5447 = vrot.lane.b32.xlu0 %v6758_v45, %s6495_s23 }
  0x9b   : > { %5452 = vrot.lane.b32.xlu1 %v6762_v49, %s6495_s23 }
  0x9c   : > { %5457 = vrot.lane.b32.xlu0 %v6778_v56, %s6495_s23  ;;  %v5501_v56 = vpack.i.bf16 %v641_v39, %v640_v37 }
  0x9f   : > { %5462 = vrot.lane.b32.xlu1 %v6782_v57, %s6495_s23 }
  0xa0   : > { %5467 = vrot.lane.b32.xlu0 %v6786_v62, %s6495_s23 }
  0xa3   : > { %5472 = vrot.lane.b32.xlu1 %v6790_v63, %s6495_s23 }
  0xa4   : > { %5477 = vrot.lane.b32.xlu0 %v6794_v5, %s6495_s23 }
  0xa5   : > { %v7128_v29 = vpop.permute.xlu1 %5197 }
  0xa6   : > { %v7130_v33 = vpop.permute.xlu0 %5192 }
  0xa7   : > { %5482 = vrot.lane.b32.xlu1 %v6798_v6, %s6495_s23 }
  0xa8   : > { %5487 = vrot.lane.b32.xlu0 %v6874_v11, %s6495_s23 }
  0xa9   : > { %v7136_v45 = vpop.permute.xlu1 %5202 }
  0xaa   : > { %v7138_v49 = vpop.permute.xlu0 %5207 }
  0xab   : > { %5492 = vrot.lane.b32.xlu1 %v6878_v12, %s6495_s23 }
  0xac   : > { %5497 = vrot.lane.b32.xlu0 %v6882_v17, %s6495_s23 }
  0xad   : > { %v7144_v57 = vpop.permute.xlu1 %5212 }
  0xae   : > { %v7146_v62 = vpop.permute.xlu0 %5217 }
  0xaf   : > { %5502 = vrot.lane.b32.xlu1 %v5501_v56, %s6495_s23  ;;  %v706_v56 = vld [vmem:[#allocation2 + $0x1a0] sm:$0xff] }
  0xb0   : > { %5507 = vrot.lane.b32.xlu0 %v6888_v23, %s6496_s24 }
  0xb1   : > { %v7151_v63 = vpop.permute.xlu1 %5222 }
  0xb2   : > { %v7153_v5 = vpop.permute.xlu0 %5227 }
  0xb3   : > { %5512 = vrot.lane.b32.xlu1 %v6891_v24, %s6496_s24 }
  0xb4   : > { %5517 = vrot.lane.b32.xlu0 %v6899_v32, %s6496_s24 }
  0xb5   : > { %v7159_v6 = vpop.permute.xlu1 %5232 }
  0xb6   : > { %v7161_v11 = vpop.permute.xlu0 %5237 }
  0xb7   : > { %5522 = vrot.lane.b32.xlu1 %v6903_v34, %s6496_s24 }
  0xb8   : > { %5527 = vrot.lane.b32.xlu0 %v6907_v41, %s6496_s24 }
  0xb9   : > { %v7167_v12 = vpop.permute.xlu1 %5242 }
  0xba   : > { %v7169_v17 = vpop.permute.xlu0 %5247 }
  0xbb   : > { %5532 = vrot.lane.b32.xlu1 %v6911_v42, %s6496_s24 }
  0xbc   : > { %5537 = vrot.lane.b32.xlu0 %v6915_v48, %s6496_s24  ;;  %v672_v48 = vld [vmem:[#allocation2 + $0x182] sm:$0xff] }
  0xbd   : > { %v7175_v23 = vpop.permute.xlu1 %5252 }
  0xbe   : > { %v7177_v24 = vpop.permute.xlu0 %5257 }
  0xbf   : > { %5542 = vrot.lane.b32.xlu1 %v6919_v50, %s6496_s24  ;;  %v673_v50 = vld [vmem:[#allocation2 + $0x18a] sm:$0xff] }
  0xc0   : > { %5547 = vrot.lane.b32.xlu0 %v6923_v55, %s6496_s24 }
  0xc1   : > { %v7183_v32 = vpop.permute.xlu1 %5262 }
  0xc2   : > { %v7185_v34 = vpop.permute.xlu0 %5267 }
  0xc3   : > { %5552 = vrot.lane.b32.xlu1 %v6927_v58, %s6496_s24  ;;  %v7205_v58 = vpack.i.bf16 %v673_v50, %v672_v48  ;;  %v707_v48 = vld [vmem:[#allocation2 + $0x31] sm:$0xff]  ;;  %v708_v50 = vld [vmem:[#allocation2 + $0x39] sm:$0xff] }
  0xc4   : > { %5557 = vrot.lane.b32.xlu0 %v6931_v2, %s6496_s24 }
  0xc5   : > { %v7191_v41 = vpop.permute.xlu1 %5272 }
  0xc6   : > { %v7193_v42 = vpop.permute.xlu0 %5277 }
  0xc7   : > { %5562 = vrot.lane.b32.xlu1 %v6935_v3, %s6496_s24 }
  0xc8   : > { %5567 = vrot.lane.b32.xlu0 %v6939_v10, %s6496_s24 }
  0xc9   : > { %v7199_v55 = vpop.permute.xlu1 %5282 }
  0xca   : > { %v7201_v60 = vpop.permute.xlu0 %5287 }
  0xcb   : > { %5572 = vrot.lane.b32.xlu1 %v6943_v13, %s6496_s24 }
  0xcc   : > { %5577 = vrot.lane.b32.xlu0 %v6951_v19, %s6496_s24 }
  0xcd   : > { %v7209_v2 = vpop.permute.xlu1 %5292 }
  0xce   : > { %v7211_v3 = vpop.permute.xlu0 %5297 }
  0xcf   : > { %5582 = vrot.lane.b32.xlu1 %v7205_v58, %s6496_s24 }
  0xd0   : > { %5587 = vrot.lane.b32.xlu0 %v6969_v27, %s6497_s25 }
  0xd1   : > { %v7217_v10 = vpop.permute.xlu1 %5302 }
  0xd2   : > { %9762 = vst [vmem:[#allocation17_spill] sm:$0xff] %v7217_v10  ;;  %v7219_v37 = vpop.permute.xlu0 %5307 }
  0xd3   : > { %9763 = vst [vmem:[#allocation18_spill] sm:$0xff] %v7219_v37  ;;  %5592 = vrot.lane.b32.xlu1 %v6974_v28, %s6497_s25  ;;  %v738_v37 = vld [vmem:[#allocation2 + $0x1a1] sm:$0xff] }
  0xd4   : > { %5597 = vrot.lane.b32.xlu0 %v6988_v38, %s6497_s25 }
  0xd5   : > { %v7225_v13 = vpop.permute.xlu1 %5312 }
  0xd6   : > { %9764 = vst [vmem:[#allocation19_spill] sm:$0xff] %v7225_v13  ;;  %v7227_v19 = vpop.permute.xlu0 %5317  ;;  %v5209_v13 = vunpack.i.l.bf16 %v7138_v49 }
  0xd7   : > { %9765 = vst [vmem:[#allocation20_spill] sm:$0xff] %v7227_v19  ;;  %5602 = vrot.lane.b32.xlu1 %v6994_v40, %s6497_s25  ;;  %v5195_v19 = vunpack.i.h.bf16 %v7130_v33 }
  0xd8   : > { %5607 = vrot.lane.b32.xlu0 %v7008_v51, %s6497_s25 }
  0xd9   : > { %v7233_v27 = vpop.permute.xlu1 %5322 }
  0xda   : > { %9766 = vst [vmem:[#allocation21_spill] sm:$0xff] %v7233_v27  ;;  %v7235_v39 = vpop.permute.xlu0 %5327 }
  0xdb   : > { %9767 = vst [vmem:[#allocation22_spill] sm:$0xff] %v7235_v39  ;;  %5612 = vrot.lane.b32.xlu1 %v7014_v52, %s6497_s25  ;;  %v6466_v52 = vld [vmem:[%s9666_s1] sm:$0xff]   ;;  %v734_v39 = vld [vmem:[#allocation2 + $0x171] sm:$0xff] }
  0xdc   : > { %5617 = vrot.lane.b32.xlu0 %v7028_v61, %s6497_s25  ;;  %5045 = vmatprep.subr.bf16.mxu0 %v6466_v52 }
  0xdd   : > { %v7241_v28 = vpop.permute.xlu1 %5332  ;;  %5046 = vmatpush3.bf16.msra.mxu0 %v6466_v52 }
  0xde   : > { %9768 = vst [vmem:[#allocation23_spill] sm:$0xff] %v7241_v28  ;;  %v7243_v38 = vpop.permute.xlu0 %5337 }
  0xdf   : > { %9769 = vst [vmem:[#allocation24_spill] sm:$0xff] %v7243_v38  ;;  %5622 = vrot.lane.b32.xlu1 %v7034_v1, %s6497_s25 }
  0xe0   : > { %5627 = vrot.lane.b32.xlu0 %v7048_v14, %s6497_s25  ;;  %v6467_v14 = vld [vmem:[%s9666_s1 + $0x8] sm:$0xff]  }
  0xe1   : > { %v7249_v40 = vpop.permute.xlu1 %5342  ;;  %5047 = vmatprep.subr.bf16.mxu0 %v6467_v14 }
  0xe2   : > { %9770 = vst [vmem:[#allocation25_spill] sm:$0xff] %v7249_v40  ;;  %v7251_v51 = vpop.permute.xlu0 %5347  ;;  %5048 = vmatpush3.bf16.msra.mxu0 %v6467_v14  ;;  %v740_v40 = vld [vmem:[#allocation2 + $0x3a] sm:$0xff] }
  0xe3   : > { %9771 = vst [vmem:[#allocation26_spill] sm:$0xff] %v7251_v51  ;;  %5632 = vrot.lane.b32.xlu1 %v7054_v15, %s6497_s25  ;;  %v705_v15 = vld [vmem:[#allocation2 + $0x198] sm:$0xff] }
  0xe4   : > { %5637 = vrot.lane.b32.xlu0 %v7068_v4, %s6497_s25  ;;  %v739_v51 = vld [vmem:[#allocation2 + $0x32] sm:$0xff] }
  0xe5   : > { %v7260_v61 = vpop.permute.xlu1 %5352 }
  0xe6   : > { %9772 = vst [vmem:[#allocation27_spill] sm:$0xff] %v7260_v61  ;;  %v7262_v1 = vpop.permute.xlu0 %5357  ;;  %v709_v61 = vld [vmem:[#allocation2 + $0x49] sm:$0xff] }
  0xe7   : > { %9773 = vst [vmem:[#allocation28_spill] sm:$0xff] %v7262_v1  ;;  %5642 = vrot.lane.b32.xlu1 %v7074_v8, %s6497_s25  ;;  %v6468_v1 = vld [vmem:[%s9666_s1 + $0x10] ss:$0 sps:$4 sm:$0x33]   ;;  %v5661_v8 = vpack.i.bf16 %v706_v56, %v705_v15  ;;  %v742_v56 = vld [vmem:[#allocation2 + $0x52] sm:$0xff] }
  0xe8   : > { %5647 = vrot.lane.b32.xlu0 %v7088_v20, %s6497_s25  ;;  %v5666_v20 = vpack.i.bf16 %v708_v50, %v707_v48  ;;  %5161 = vmatprep.subr.msk.bf16.mxu0 %vm2143_vm3, %v6468_v1  ;;  %v2145_v14 = vsel %vm2143_vm3, %v6468_v1, 0  ;;  %v741_v15 = vld [vmem:[#allocation2 + $0x4a] sm:$0xff]  ;;  %v711_v50 = vld [vmem:[#allocation2 + $0x61] sm:$0xff] }
  0xe9   : > { %v7271_v4 = vpop.permute.xlu1 %5362  ;;  %5050 = vmatpush3.bf16.msra.mxu0 %v2145_v14  ;;  %v712_v1 = vld [vmem:[#allocation2 + $0x69] sm:$0xff]  ;;  %v5681_v14 = vpack.i.bf16 %v742_v56, %v741_v15 }
  0xea   : > { %9774 = vst [vmem:[#allocation29_spill] sm:$0xff] %v7271_v4  ;;  %v7273_v52 = vpop.permute.xlu0 %5367  ;;  %v710_v4 = vld [vmem:[#allocation2 + $0x51] sm:$0xff]  ;;  %v746_v15 = vld [vmem:[#allocation2 + $0x82] sm:$0xff] }
  0xeb   : > { %9775 = vst [vmem:[#allocation30_spill] sm:$0xff] %v7273_v52  ;;  %5652 = vrot.lane.b32.xlu1 %v7094_v59, %s6497_s25  ;;  %v5671_v59 = vpack.i.bf16 %v710_v4, %v709_v61  ;;  %v713_v61 = vld [vmem:[#allocation2 + $0x79] sm:$0xff]  ;;  %v714_v4 = vld [vmem:[#allocation2 + $0x81] sm:$0xff] }
  0xec   : > { %5657 = vrot.lane.b32.xlu0 %v7098_v46, %s6497_s25  ;;  %v5676_v46 = vpack.i.bf16 %v740_v40, %v739_v51  ;;  %v743_v40 = vld [vmem:[#allocation2 + $0x62] sm:$0xff]  ;;  %v744_v51 = vld [vmem:[#allocation2 + $0x6a] sm:$0xff] }
  0xed   : > { %v7284_v52 = vpop.permute.xlu1 %5372 }
  0xee   : > { %9776 = vst [vmem:[#allocation31_spill] sm:$0xff] %v7284_v52  ;;  %v7286_v38 = vpop.permute.xlu0 %5377  ;;  %v717_v52 = vld [vmem:[#allocation2 + $0xa9] sm:$0xff] }
  0xef   : > { %9777 = vst [vmem:[#allocation32_spill] sm:$0xff] %v7286_v38  ;;  %5662 = vrot.lane.b32.xlu1 %v5661_v8, %s6497_s25  ;;  %v5686_v8 = vpack.i.bf16 %v712_v1, %v711_v50  ;;  %v716_v50 = vld [vmem:[#allocation2 + $0x99] sm:$0xff] }
  0xf0   : > { %5667 = vrot.lane.b32.xlu0 %v5666_v20, %s6498_s12 }
  0xf1   : > { %v7290_v48 = vpop.permute.xlu1 %5382 }
  0xf2   : > { %9778 = vst [vmem:[#allocation33_spill] sm:$0xff] %v7290_v48  ;;  %v7292_v28 = vpop.permute.xlu0 %5387  ;;  %v5691_v48 = vpack.i.bf16 %v714_v4, %v713_v61  ;;  %v748_v4 = vld [vmem:[#allocation2 + $0x9a] sm:$0xff] }
  0xf3   : > { %9779 = vst [vmem:[#allocation34_spill] sm:$0xff] %v7292_v28  ;;  %5672 = vrot.lane.b32.xlu1 %v5671_v59, %s6498_s12  ;;  %v5696_v28 = vpack.i.bf16 %v744_v51, %v743_v40  ;;  %v745_v59 = vld [vmem:[#allocation2 + $0x7a] sm:$0xff] }
  0xf4   : > { %5677 = vrot.lane.b32.xlu0 %v5676_v46, %s6499_s15  ;;  %v715_v46 = vld [vmem:[#allocation2 + $0x91] sm:$0xff] }
  0xf5   : > { %v7296_v38 = vpop.permute.xlu1 %5392 }
  0xf6   : > { %9780 = vst [vmem:[#allocation35_spill] sm:$0xff] %v7296_v38  ;;  %v7298_v20 = vpop.permute.xlu0 %5397  ;;  %v5701_v38 = vpack.i.bf16 %v746_v15, %v745_v59  ;;  %v720_v15 = vld [vmem:[#allocation2 + $0xc9] sm:$0xff] }
  0xf7   : > { %9781 = vst [vmem:[#allocation36_spill] sm:$0xff] %v7298_v20  ;;  %5682 = vrot.lane.b32.xlu1 %v5681_v14, %s6499_s15  ;;  %v5706_v20 = vpack.i.bf16 %v716_v50, %v715_v46  ;;  %v718_v14 = vld [vmem:[#allocation2 + $0xb1] sm:$0xff] }
  0xf8   : > { %5687 = vrot.lane.b32.xlu0 %v5686_v8, %s6498_s12  ;;  %v747_v8 = vld [vmem:[#allocation2 + $0x92] sm:$0xff]  ;;  %v5711_v51 = vpack.i.bf16 %v718_v14, %v717_v52  ;;  %v752_v14 = vld [vmem:[#allocation2 + $0xca] sm:$0xff] }
  0xf9   : > { %v7302_v56 = vpop.permute.xlu1 %5402 }
  0xfa   : > { %9782 = vst [vmem:[#allocation37_spill] sm:$0xff] %v7302_v56  ;;  %v7304_v1 = vpop.permute.xlu0 %5407  ;;  %v749_v56 = vld [vmem:[#allocation2 + $0xaa] sm:$0xff] }
  0xfb   : > { %9783 = vst [vmem:[#allocation38_spill] sm:$0xff] %v7304_v1  ;;  %5692 = vrot.lane.b32.xlu1 %v5691_v48, %s6498_s12  ;;  %v5716_v1 = vpack.i.bf16 %v748_v4, %v747_v8  ;;  %v750_v48 = vld [vmem:[#allocation2 + $0xb2] sm:$0xff] }
  0xfc   : > { %5697 = vrot.lane.b32.xlu0 %v5696_v28, %s6499_s15  ;;  %v719_v28 = vld [vmem:[#allocation2 + $0xc1] sm:$0xff]  ;;  %v5721_v50 = vpack.i.bf16 %v750_v48, %v749_v56  ;;  %v724_v48 = vld [vmem:[#allocation2 + $0xf9] sm:$0xff] }
  0xfd   : > { %v7308_v61 = vpop.permute.xlu1 %5412 }
  0xfe   : > { %9784 = vst [vmem:[#allocation39_spill] sm:$0xff] %v7308_v61  ;;  %v7310_v40 = vpop.permute.xlu0 %5417  ;;  %v721_v61 = vld [vmem:[#allocation2 + $0xd9] sm:$0xff] }
  0xff   : > { %9785 = vst [vmem:[#allocation40_spill] sm:$0xff] %v7310_v40  ;;  %5702 = vrot.lane.b32.xlu1 %v5701_v38, %s6499_s15  ;;  %v5726_v40 = vpack.i.bf16 %v720_v15, %v719_v28  ;;  %v722_v38 = vld [vmem:[#allocation2 + $0xe1] sm:$0xff] }
 0x100   : > { %5707 = vrot.lane.b32.xlu0 %v5706_v20, %s6498_s12  ;;  %v751_v20 = vld [vmem:[#allocation2 + $0xc2] sm:$0xff]  ;;  %v5731_v4 = vpack.i.bf16 %v722_v38, %v721_v61  ;;  %v756_v38 = vld [vmem:[#allocation2 + $0xfa] sm:$0xff] }
 0x101   : > { %v7314_v59 = vpop.permute.xlu1 %5422 }
 0x102   : > { %9786 = vst [vmem:[#allocation41_spill] sm:$0xff] %v7314_v59  ;;  %v7316_v46 = vpop.permute.xlu0 %5427  ;;  %v753_v59 = vld [vmem:[#allocation2 + $0xda] sm:$0xff] }
 0x103   : > { %9787 = vst [vmem:[#allocation42_spill] sm:$0xff] %v7316_v46  ;;  %5712 = vrot.lane.b32.xlu1 %v5711_v51, %s6498_s12  ;;  %v5736_v46 = vpack.i.bf16 %v752_v14, %v751_v20  ;;  %v754_v51 = vld [vmem:[#allocation2 + $0xe2] sm:$0xff] }
 0x104   : > { %5717 = vrot.lane.b32.xlu0 %v5716_v1, %s6499_s15  ;;  %v723_v1 = vld [vmem:[#allocation2 + $0xf1] sm:$0xff]  ;;  %v5741_v15 = vpack.i.bf16 %v754_v51, %v753_v59  ;;  %v728_v51 = vld [vmem:[#allocation2 + $0x129] sm:$0xff] }
 0x105   : > { %v7320_v52 = vpop.permute.xlu1 %5432 }
 0x106   : > { %9788 = vst [vmem:[#allocation43_spill] sm:$0xff] %v7320_v52  ;;  %v7322_v8 = vpop.permute.xlu0 %5437  ;;  %v725_v52 = vld [vmem:[#allocation2 + $0x109] sm:$0xff] }
 0x107   : > { %9789 = vst [vmem:[#allocation44_spill] sm:$0xff] %v7322_v8  ;;  %5722 = vrot.lane.b32.xlu1 %v5721_v50, %s6499_s15  ;;  %v5746_v8 = vpack.i.bf16 %v724_v48, %v723_v1  ;;  %v726_v50 = vld [vmem:[#allocation2 + $0x111] sm:$0xff] }
 0x108   : > { %5727 = vrot.lane.b32.xlu0 %v5726_v40, %s6498_s12  ;;  %v755_v40 = vld [vmem:[#allocation2 + $0xf2] sm:$0xff]  ;;  %v5751_v14 = vpack.i.bf16 %v726_v50, %v725_v52  ;;  %v760_v50 = vld [vmem:[#allocation2 + $0x12a] sm:$0xff] }
 0x109   : > { %v7326_v56 = vpop.permute.xlu1 %5442 }
 0x10a   : > { %9790 = vst [vmem:[#allocation45_spill] sm:$0xff] %v7326_v56  ;;  %v7328_v28 = vpop.permute.xlu0 %5447  ;;  %v757_v56 = vld [vmem:[#allocation2 + $0x10a] sm:$0xff] }
 0x10b   : > { %9791 = vst [vmem:[#allocation46_spill] sm:$0xff] %v7328_v28  ;;  %5732 = vrot.lane.b32.xlu1 %v5731_v4, %s6498_s12  ;;  %v5756_v28 = vpack.i.bf16 %v756_v38, %v755_v40  ;;  %v758_v4 = vld [vmem:[#allocation2 + $0x112] sm:$0xff] }
 0x10c   : > { %5737 = vrot.lane.b32.xlu0 %v5736_v46, %s6499_s15  ;;  %v727_v46 = vld [vmem:[#allocation2 + $0x121] sm:$0xff]  ;;  %v5761_v48 = vpack.i.bf16 %v758_v4, %v757_v56  ;;  %v732_v4 = vld [vmem:[#allocation2 + $0x159] sm:$0xff] }
 0x10d   : > { %v7332_v61 = vpop.permute.xlu1 %5452 }
 0x10e   : > { %9792 = vst [vmem:[#allocation47_spill] sm:$0xff] %v7332_v61  ;;  %v7334_v20 = vpop.permute.xlu0 %5457  ;;  %v729_v61 = vld [vmem:[#allocation2 + $0x139] sm:$0xff] }
 0x10f   : > { %9793 = vst [vmem:[#allocation48_spill] sm:$0xff] %v7334_v20  ;;  %5742 = vrot.lane.b32.xlu1 %v5741_v15, %s6499_s15  ;;  %v5766_v20 = vpack.i.bf16 %v728_v51, %v727_v46  ;;  %v730_v15 = vld [vmem:[#allocation2 + $0x141] sm:$0xff] }
 0x110   : > { %5747 = vrot.lane.b32.xlu0 %v5746_v8, %s6498_s12  ;;  %v759_v8 = vld [vmem:[#allocation2 + $0x122] sm:$0xff]  ;;  %v5771_v38 = vpack.i.bf16 %v730_v15, %v729_v61  ;;  %v763_v15 = vld [vmem:[#allocation2 + $0x152] sm:$0xff] }
 0x111   : > { %v7338_v59 = vpop.permute.xlu1 %5462 }
 0x112   : > { %9794 = vst [vmem:[#allocation49_spill] sm:$0xff] %v7338_v59  ;;  %v7340_v1 = vpop.permute.xlu0 %5467  ;;  %v761_v59 = vld [vmem:[#allocation2 + $0x13a] sm:$0xff] }
 0x113   : > { %9795 = vst [vmem:[#allocation50_spill] sm:$0xff] %v7340_v1  ;;  %5752 = vrot.lane.b32.xlu1 %v5751_v14, %s6498_s12  ;;  %v5776_v1 = vpack.i.bf16 %v760_v50, %v759_v8  ;;  %v762_v14 = vld [vmem:[#allocation2 + $0x142] sm:$0xff]  ;;  %v764_v8 = vld [vmem:[#allocation2 + $0x15a] sm:$0xff]  ;;  %v5189_v50 = vunpack.i.l.bf16 %v7122_v0 }
 0x114   : > { %5757 = vrot.lane.b32.xlu0 %v5756_v28, %s6499_s15  ;;  %v731_v28 = vld [vmem:[#allocation2 + $0x151] sm:$0xff]  ;;  %v5781_v51 = vpack.i.bf16 %v762_v14, %v761_v59  ;;  %v5200_v59 = vunpack.i.h.bf16 %v7128_v29  ;;  %v5199_v14 = vunpack.i.l.bf16 %v7128_v29  ;;  %v5210_v29 = vunpack.i.h.bf16 %v7138_v49 }
 0x115   : > { %v7344_v52 = vpop.permute.xlu1 %5472  ;;  %v5786_v61 = vpack.i.bf16 %v732_v4, %v731_v28  ;;  %v766_v28 = vld [vmem:[#allocation2 + $0x172] sm:$0xff]  ;;  %v735_v4 = vld [vmem:[#allocation2 + $0x181] sm:$0xff] }
 0x116   : > { %9796 = vst [vmem:[#allocation51_spill] sm:$0xff] %v7344_v52  ;;  %v7346_v40 = vpop.permute.xlu0 %5477  ;;  %v733_v52 = vld [vmem:[#allocation2 + $0x169] sm:$0xff]  ;;  %v7389_v49 = vsel %vm361_vm0, %v6959_v22, %v5200_v59  ;;  %v5229_v59 = vunpack.i.l.bf16 %v7153_v5 }
 0x117   : > { %9797 = vst [vmem:[#allocation52_spill] sm:$0xff] %v7346_v40  ;;  %5762 = vrot.lane.b32.xlu1 %v5761_v48, %s6499_s15  ;;  %v5190_v40 = vunpack.i.h.bf16 %v7122_v0 }
 0x118   : > { %5767 = vrot.lane.b32.xlu0 %v5766_v20, %s6498_s12  ;;  %v483_v20 = vld [vmem:[#allocation2 + $0x8] sm:$0xff] }
 0x119   : > { %v7350_v56 = vpop.permute.xlu1 %5482  ;;  %v7368_v0 = vsel %vm361_vm0, %v483_v20, %v5190_v40  ;;  %v5215_v40 = vunpack.i.h.bf16 %v7144_v57 }
 0x11a   : > { %9798 = vst [vmem:[#allocation53_spill] sm:$0xff] %v7350_v56  ;;  %v7352_v46 = vpop.permute.xlu0 %5487  ;;  %v482_v56 = vld [vmem:[#allocation2] sm:$0xff] }
 0x11b   : > { %9799 = vst [vmem:[#allocation54_spill] sm:$0xff] %v7352_v46  ;;  %5772 = vrot.lane.b32.xlu1 %v5771_v38, %s6498_s12  ;;  %v5791_v46 = vpack.i.bf16 %v734_v39, %v733_v52  ;;  %v765_v38 = vld [vmem:[#allocation2 + $0x16a] sm:$0xff]  ;;  %v5796_v39 = vpack.i.bf16 %v764_v8, %v763_v15  ;;  %v5205_v52 = vunpack.i.h.bf16 %v7136_v45  ;;  %v7378_v10 = vsel %vm361_vm0, %v482_v56, %v5189_v50  ;;  %v769_v50 = vld [vmem:[#allocation2 + $0x19a] sm:$0xff] }
 0x11c   : > { %5777 = vrot.lane.b32.xlu0 %v5776_v1, %s6499_s15  ;;  %v5194_v1 = vunpack.i.l.bf16 %v7130_v33  ;;  %v7397_v56 = vsel %vm361_vm0, %v6947_v18, %v5195_v19  ;;  %v7414_v19 = vsel %vm361_vm0, %v6978_v31, %v5210_v29  ;;  %v5230_v31 = vunpack.i.h.bf16 %v7153_v5 }
 0x11d   : > { %v7357_v48 = vpop.permute.xlu1 %5492  ;;  %v5240_v5 = vunpack.i.h.bf16 %v7161_v11  ;;  %v5249_v29 = vunpack.i.l.bf16 %v7169_v17 }
 0x11e   : > { %9800 = vst [vmem:[#allocation55_spill] sm:$0xff] %v7357_v48  ;;  %v7360_v27 = vpop.permute.xlu0 %5497  ;;  %v736_v48 = vld [vmem:[#allocation2 + $0x189] sm:$0xff]  ;;  %v7393_v8 = vsel %vm361_vm0, %v6945_v16, %v5194_v1  ;;  %v7406_v16 = vsel %vm361_vm0, %v6963_v26, %v5205_v52  ;;  %v5225_v26 = vunpack.i.h.bf16 %v7151_v63 }
 0x11f   : > { %9801 = vst [vmem:[#allocation56_spill] sm:$0xff] %v7360_v27  ;;  %5782 = vrot.lane.b32.xlu1 %v5781_v51, %s6499_s15  ;;  %v5204_v27 = vunpack.i.l.bf16 %v7136_v45  ;;  %v737_v51 = vld [vmem:[#allocation2 + $0x199] sm:$0xff]  ;;  %v5806_v15 = vpack.i.bf16 %v736_v48, %v735_v4  ;;  %v7385_v45 = vsel %vm361_vm0, %v6957_v21, %v5199_v14  ;;  %v770_v48 = vld [vmem:[#allocation2 + $0x1a2] sm:$0xff]  ;;  %v5220_v21 = vunpack.i.h.bf16 %v7146_v62 }
 0x120   : > { %5787 = vrot.lane.b32.xlu0 %v5786_v61, %s6498_s12  ;;  %v5801_v61 = vpack.i.bf16 %v766_v28, %v765_v38  ;;  %v5214_v38 = vunpack.i.l.bf16 %v7144_v57  ;;  %v5219_v14 = vunpack.i.l.bf16 %v7146_v62  ;;  %v5811_v22 = vpack.i.bf16 %v738_v37, %v737_v51 }
 0x121   : > { %v7375_v33 = vpop.permute.xlu1 %5502  ;;  %v7410_v18 = vsel %vm361_vm0, %v6961_v25, %v5204_v27  ;;  %v7418_v57 = vsel %vm361_vm0, %v6976_v30, %v5209_v13  ;;  %v7424_v37 = vsel %vm361_vm0, %v6982_v36, %v5215_v40  ;;  %v5821_v27 = vpack.i.bf16 %v770_v48, %v769_v50  ;;  %v9804_v40 = vld [vmem:[#allocation6_spill] sm:$0xff]  ;;  %v9807_v48 = vld [vmem:[#allocation7_spill] sm:$0xff] }
 0x122   : > { %9802 = vst [vmem:[#allocation57_spill] sm:$0xff] %v7375_v33  ;;  %v7381_v20 = vpop.permute.xlu0 %5507  ;;  %v5235_v30 = vunpack.i.h.bf16 %v7159_v6  ;;  %v5234_v13 = vunpack.i.l.bf16 %v7159_v6  ;;  %v7437_v36 = vsel %vm361_vm0, %v6980_v35, %v5214_v38  ;;  %v7445_v1 = vsel %vm361_vm0, %v6996_v43, %v5219_v14  ;;  %v9803_v43 = vld [vmem:[#allocation4_spill] sm:$0xff] }
 0x123   : > { %5792 = vrot.lane.b32.xlu1 %v5791_v46, %s6498_s12  ;;  %v5224_v46 = vunpack.i.l.bf16 %v7151_v63  ;;  %v7441_v63 = vsel %vm361_vm0, %v6998_v44, %v5220_v21  ;;  %v5239_v6 = vunpack.i.l.bf16 %v7161_v11  ;;  %v5245_v28 = vunpack.i.h.bf16 %v7167_v12 }
 0x124   : > { %5797 = vrot.lane.b32.xlu0 %v5796_v39, %s6499_s15  ;;  %v5244_v4 = vunpack.i.l.bf16 %v7167_v12  ;;  %v5250_v35 = vunpack.i.h.bf16 %v7169_v17  ;;  %v7457_v44 = vsel %vm361_vm0, %v7002_v47, %v5225_v26  ;;  %v5255_v11 = vunpack.i.h.bf16 %v7175_v23  ;;  %v9806_v47 = vld [vmem:[#allocation8_spill] sm:$0xff]  ;;  %v9808_v17 = vld [vmem:[#allocation10_spill] sm:$0xff] }
 0x125   : > { %v7420_v62 = vpop.permute.xlu1 %5512  ;;  %v7461_v52 = vsel %vm361_vm0, %v9803_v43, %v5224_v46  ;;  %v7469_v12 = vsel %vm361_vm0, %v9804_v40, %v5230_v31  ;;  %v7477_v50 = vsel %vm361_vm0, %v9806_v47, %v5235_v30  ;;  %v7481_v38 = vsel %vm361_vm0, %v9807_v48, %v5234_v13  ;;  %v9809_v31 = vld [vmem:[#allocation9_spill] sm:$0xff]  ;;  %v9810_v30 = vld [vmem:[#allocation12_spill] sm:$0xff]  ;;  %v9811_v13 = vld [vmem:[#allocation11_spill] sm:$0xff] }
 0x126   : > { %v7428_v25 = vpop.permute.xlu0 %5517  ;;  %v7486_v21 = vsel %vm361_vm0, %v9808_v17, %v5240_v5  ;;  %v5254_v14 = vunpack.i.l.bf16 %v7175_v23  ;;  %v5260_v26 = vunpack.i.h.bf16 %v7177_v24  ;;  %v5259_v46 = vunpack.i.l.bf16 %v7177_v24  ;;  %v9812_v23 = vld [vmem:[#allocation14_spill] sm:$0xff]  ;;  %v9813_v40 = vld [vmem:[#allocation13_spill] sm:$0xff] }
 0x127   : > { %5802 = vrot.lane.b32.xlu1 %v5801_v61, %s6499_s15  ;;  %v9805_v61 = vld [vmem:[#allocation5_spill] sm:$0xff]  ;;  %v7503_v5 = vsel %vm361_vm0, %v9811_v13, %v5244_v4  ;;  %v7507_v43 = vsel %vm361_vm0, %v9812_v23, %v5250_v35  ;;  %v5264_v47 = vunpack.i.l.bf16 %v7183_v32  ;;  %v5270_v48 = vunpack.i.h.bf16 %v7185_v34 }
 0x128   : > { %5807 = vrot.lane.b32.xlu0 %v5806_v15, %s6498_s12  ;;  %v7473_v15 = vsel %vm361_vm0, %v9805_v61, %v5229_v59  ;;  %v7495_v59 = vsel %vm361_vm0, %v9809_v31, %v5239_v6  ;;  %v9814_v6 = vld [vmem:[#allocation16_spill] sm:$0xff]  ;;  %v5269_v35 = vunpack.i.l.bf16 %v7185_v34  ;;  %v5275_v17 = vunpack.i.h.bf16 %v7191_v41 }
 0x129   : > { %v7453_v39 = vpop.permute.xlu1 %5522  ;;  %v7517_v61 = vsel %vm361_vm0, %v9814_v6, %v5255_v11  ;;  %v5274_v31 = vunpack.i.l.bf16 %v7191_v41  ;;  %v5280_v34 = vunpack.i.h.bf16 %v7193_v42  ;;  %v5279_v13 = vunpack.i.l.bf16 %v7193_v42 }
 0x12a   : > { %v7465_v51 = vpop.permute.xlu0 %5527  ;;  %v5285_v41 = vunpack.i.h.bf16 %v7199_v55  ;;  %v5289_v23 = vunpack.i.l.bf16 %v7201_v60  ;;  %v5295_v42 = vunpack.i.h.bf16 %v7209_v2  ;;  %v5294_v6 = vunpack.i.l.bf16 %v7209_v2 }
 0x12b   : > { %5812 = vrot.lane.b32.xlu1 %v5811_v22, %s6498_s12  ;;  %v7499_v22 = vsel %vm361_vm0, %v9810_v30, %v5245_v28  ;;  %v5265_v28 = vunpack.i.h.bf16 %v7183_v32  ;;  %v7534_v30 = vsel %vm361_vm0, %v7078_v7, %v5260_v26  ;;  %v7538_v32 = vsel %vm361_vm0, %v7076_v9, %v5259_v46 }
 0x12c   : > { %5817 = vrot.lane.b32.xlu0 %v7205_v58, %s6499_s15  ;;  %v7513_v58 = vsel %vm361_vm0, %v9813_v40, %v5249_v29  ;;  %v9815_v29 = vld [vmem:[#allocation15_spill] sm:$0xff]  ;;  %v7553_v9 = vsel %vm361_vm0, %v7080_v53, %v5264_v47  ;;  %v5290_v26 = vunpack.i.h.bf16 %v7201_v60  ;;  %v7565_v40 = vsel %vm1827_vm2, %v7378_v10, %v5269_v35  ;;  %v9821_v35 = vld [vmem:[#allocation18_spill] sm:$0xff] }
 0x12d   : > { %v7509_v24 = vpop.permute.xlu1 %5532  ;;  %v7530_v11 = vsel %vm361_vm0, %v9815_v29, %v5254_v14  ;;  %v7549_v7 = vsel %vm361_vm0, %v7082_v54, %v5265_v28  ;;  %v7569_v54 = vsel %vm1827_vm2, %v7393_v8, %v5274_v31  ;;  %v7573_v53 = vsel %vm1827_vm2, %v7397_v56, %v5275_v17  ;;  %v9822_v31 = vld [vmem:[#allocation19_spill] sm:$0xff] }
 0x12e   : > { %v7521_v4 = vpop.permute.xlu0 %5537  ;;  %v7577_v60 = vsel %vm1827_vm2, %v7389_v49, %v5280_v34  ;;  %v5299_v28 = vunpack.i.l.bf16 %v7211_v3  ;;  %v7584_v10 = vsel %vm1827_vm2, %v7385_v45, %v5279_v13  ;;  %v7588_v8 = vsel %vm1827_vm2, %v7406_v16, %v5285_v41  ;;  %v9819_v16 = vld [vmem:[#allocation17_spill] sm:$0xff]  ;;  %v9823_v41 = vld [vmem:[#allocation20_spill] sm:$0xff] }
 0x12f   : > { %5822 = vrot.lane.b32.xlu1 %v5821_v27, %s6499_s15  ;;  %v5284_v27 = vunpack.i.l.bf16 %v7199_v55  ;;  %v7561_v55 = vsel %vm1827_vm2, %v7368_v0, %v5270_v48  ;;  %v5300_v0 = vunpack.i.h.bf16 %v7211_v3  ;;  %v7596_v49 = vsel %vm1827_vm2, %v7418_v57, %v5289_v23 }
 0x130   : > { %v7602_v3 = vsel %vm1827_vm2, %v7414_v19, %v5290_v26  ;;  %v7606_v45 = vsel %vm1827_vm2, %v7424_v37, %v5295_v42  ;;  %v5305_v47 = vunpack.i.h.bf16 %v9819_v16  ;;  %v5304_v48 = vunpack.i.l.bf16 %v9819_v16  ;;  %v9824_v26 = vld [vmem:[#allocation21_spill] sm:$0xff] }
 0x131   : > { %v7545_v14 = vpop.permute.xlu1 %5542  ;;  %v7592_v56 = vsel %vm1827_vm2, %v7410_v18, %v5284_v27  ;;  %v5310_v17 = vunpack.i.h.bf16 %v9821_v35  ;;  %v5309_v57 = vunpack.i.l.bf16 %v9821_v35  ;;  %v5315_v29 = vunpack.i.h.bf16 %v9822_v31  ;;  %v9825_v35 = vld [vmem:[#allocation22_spill] sm:$0xff] }
 0x132   : > { %9816 = vst [vmem:[#allocation4_spill] sm:$0xff] %v7545_v14  ;;  %v7557_v46 = vpop.permute.xlu0 %5547  ;;  %v5314_v34 = vunpack.i.l.bf16 %v9822_v31  ;;  %v7618_v19 = vsel %vm1827_vm2, %v7437_v36, %v5294_v6  ;;  %v7622_v37 = vsel %vm1827_vm2, %v7445_v1, %v5299_v28  ;;  %v7626_v13 = vsel %vm1827_vm2, %v7441_v63, %v5300_v0  ;;  %v9827_v28 = vld [vmem:[#allocation23_spill] sm:$0xff] }
 0x133   : > { %9817 = vst [vmem:[#allocation6_spill] sm:$0xff] %v7557_v46  ;;  %v5319_v27 = vunpack.i.l.bf16 %v9823_v41  ;;  %v5320_v23 = vunpack.i.h.bf16 %v9823_v41  ;;  %v5325_v42 = vunpack.i.h.bf16 %v9824_v26  ;;  %v5324_v16 = vunpack.i.l.bf16 %v9824_v26 }
 0x134   : > { %v5329_v36 = vunpack.i.l.bf16 %v9825_v35  ;;  %v7637_v1 = vsel %vm1827_vm2, %v7457_v44, %v5305_v47  ;;  %v7641_v63 = vsel %vm1827_vm2, %v7461_v52, %v5304_v48  ;;  %v5330_v0 = vunpack.i.h.bf16 %v9825_v35 }
 0x135   : > { %v7598_v2 = vpop.permute.xlu1 %5552  ;;  %v5335_v31 = vunpack.i.h.bf16 %v9827_v28  ;;  %v7649_v26 = vsel %vm1827_vm2, %v7473_v15, %v5309_v57  ;;  %v7657_v44 = vsel %vm1827_vm2, %v7477_v50, %v5315_v29  ;;  %v7661_v52 = vsel %vm1827_vm2, %v7481_v38, %v5314_v34  ;;  %v9829_v15 = vld [vmem:[#allocation24_spill] sm:$0xff] }
 0x136   : > { %9818 = vst [vmem:[#allocation5_spill] sm:$0xff] %v7598_v2  ;;  %v7610_v18 = vpop.permute.xlu0 %5557  ;;  %v7665_v47 = vsel %vm1827_vm2, %v7495_v59, %v5319_v27  ;;  %v5334_v48 = vunpack.i.l.bf16 %v9827_v28  ;;  %v5340_v57 = vunpack.i.h.bf16 %v9829_v15  ;;  %v5339_v35 = vunpack.i.l.bf16 %v9829_v15  ;;  %v9846_v2 = vld [vmem:[#allocation38_spill] sm:$0xff] }
 0x137   : > { %9820 = vst [vmem:[#allocation8_spill] sm:$0xff] %v7610_v18  ;;  %v7676_v50 = vsel %vm1827_vm2, %v7499_v22, %v5325_v42  ;;  %v7680_v38 = vsel %vm1827_vm2, %v7503_v5, %v5324_v16  ;;  %v7684_v59 = vsel %vm1827_vm2, %v7513_v58, %v5329_v36  ;;  %v7690_v29 = vsel %vm1827_vm2, %v7507_v43, %v5330_v0  ;;  %v9831_v22 = vld [vmem:[#allocation25_spill] sm:$0xff]  ;;  %v9834_v16 = vld [vmem:[#allocation27_spill] sm:$0xff] }
 0x138   : > { %v5345_v34 = vunpack.i.h.bf16 %v9831_v22  ;;  %v5344_v27 = vunpack.i.l.bf16 %v9831_v22  ;;  %v5355_v36 = vunpack.i.h.bf16 %v9834_v16  ;;  %v5354_v28 = vunpack.i.l.bf16 %v9834_v16 }
 0x139   : > { %v7633_v6 = vpop.permute.xlu1 %5562  ;;  %v7706_v43 = vsel %vm1827_vm2, %v7530_v11, %v5334_v48  ;;  %v7714_v0 = vsel %vm1827_vm2, %v7534_v30, %v5340_v57  ;;  %v9839_v57 = vld [vmem:[#allocation31_spill] sm:$0xff] }
 0x13a   : > { %9826 = vst [vmem:[#allocation7_spill] sm:$0xff] %v7633_v6  ;;  %v7645_v41 = vpop.permute.xlu0 %5567  ;;  %v7653_v6 = vsel %vm1827_vm2, %v7469_v12, %v5310_v17  ;;  %v7672_v12 = vsel %vm1827_vm2, %v7486_v21, %v5320_v23  ;;  %v7694_v21 = vsel %vm1827_vm2, %v7517_v61, %v5335_v31  ;;  %v9833_v23 = vld [vmem:[#allocation26_spill] sm:$0xff]  ;;  %v7710_v61 = vsel %vm1827_vm2, %v7538_v32, %v5339_v35  ;;  %v9835_v31 = vld [vmem:[#allocation28_spill] sm:$0xff] }
 0x13b   : > { %9828 = vst [vmem:[#allocation10_spill] sm:$0xff] %v7645_v41  ;;  %v5350_v42 = vunpack.i.h.bf16 %v9833_v23  ;;  %v5349_v58 = vunpack.i.l.bf16 %v9833_v23  ;;  %v5359_v15 = vunpack.i.l.bf16 %v9835_v31  ;;  %v5360_v22 = vunpack.i.h.bf16 %v9835_v31  ;;  %v9836_v23 = vld [vmem:[#allocation29_spill] sm:$0xff] }
 0x13c   : > { %v5364_v16 = vunpack.i.l.bf16 %v9836_v23  ;;  %v7725_v32 = vsel %vm1827_vm2, %v7549_v7, %v5345_v34  ;;  %v7729_v30 = vsel %vm1827_vm2, %v7553_v9, %v5344_v27  ;;  %v5374_v35 = vunpack.i.l.bf16 %v9839_v57 }
 0x13d   : > { %v7686_v17 = vpop.permute.xlu1 %5572  ;;  %v7745_v7 = vsel %vm1860_vm4, %v7569_v54, %v5354_v28  ;;  %v7749_v9 = vsel %vm1860_vm4, %v7573_v53, %v5355_v36  ;;  %v5375_v34 = vunpack.i.h.bf16 %v9839_v57 }
 0x13e   : > { %9830 = vst [vmem:[#allocation9_spill] sm:$0xff] %v7686_v17  ;;  %v7698_v5 = vpop.permute.xlu0 %5577  ;;  %v9837_v17 = vld [vmem:[#allocation30_spill] sm:$0xff]  ;;  %v7764_v54 = vsel %vm1860_vm4, %v7592_v56, %v5364_v16  ;;  %v9841_v56 = vld [vmem:[#allocation33_spill] sm:$0xff] }
 0x13f   : > { %9832 = vst [vmem:[#allocation12_spill] sm:$0xff] %v7698_v5  ;;  %v5365_v5 = vunpack.i.h.bf16 %v9836_v23  ;;  %v5369_v41 = vunpack.i.l.bf16 %v9837_v17  ;;  %v5370_v48 = vunpack.i.h.bf16 %v9837_v17  ;;  %v7737_v23 = vsel %vm1860_vm4, %v7565_v40, %v5349_v58  ;;  %v9840_v40 = vld [vmem:[#allocation32_spill] sm:$0xff] }
 0x140   : > { %v7753_v17 = vsel %vm1860_vm4, %v7584_v10, %v5359_v15  ;;  %v5380_v27 = vunpack.i.h.bf16 %v9840_v40  ;;  %v5379_v58 = vunpack.i.l.bf16 %v9840_v40  ;;  %v5385_v28 = vunpack.i.h.bf16 %v9841_v56 }
 0x141   : > { %v7721_v11 = vpop.permute.xlu1 %5582  ;;  %v7768_v53 = vsel %vm1860_vm4, %v7588_v8, %v5365_v5  ;;  %v7772_v10 = vsel %vm1860_vm4, %v7596_v49, %v5369_v41  ;;  %v7778_v36 = vsel %vm1860_vm4, %v7602_v3, %v5370_v48  ;;  %v5384_v15 = vunpack.i.l.bf16 %v9841_v56  ;;  %v9842_v5 = vld [vmem:[#allocation34_spill] sm:$0xff]  ;;  %v9843_v41 = vld [vmem:[#allocation35_spill] sm:$0xff] }
 0x142   : > { %9838 = vst [vmem:[#allocation11_spill] sm:$0xff] %v7721_v11  ;;  %v7733_v31 = vpop.permute.xlu0 %5587  ;;  %v7741_v11 = vsel %vm1860_vm4, %v7561_v55, %v5350_v42  ;;  %v7760_v55 = vsel %vm1860_vm4, %v7577_v60, %v5360_v22  ;;  %v7782_v60 = vsel %vm1860_vm4, %v7618_v19, %v5374_v35  ;;  %v5390_v22 = vunpack.i.h.bf16 %v9842_v5  ;;  %v9844_v35 = vld [vmem:[#allocation36_spill] sm:$0xff] }
 0x143   : > { %v5389_v49 = vunpack.i.l.bf16 %v9842_v5  ;;  %v5395_v16 = vunpack.i.h.bf16 %v9843_v41  ;;  %v5394_v57 = vunpack.i.l.bf16 %v9843_v41  ;;  %v7794_v3 = vsel %vm1860_vm4, %v7606_v45, %v5375_v34  ;;  %v9845_v5 = vld [vmem:[#allocation37_spill] sm:$0xff] }
 0x144   : > { %v7798_v19 = vsel %vm1860_vm4, %v7622_v37, %v5379_v58  ;;  %v7802_v48 = vsel %vm1860_vm4, %v7626_v13, %v5380_v27  ;;  %v5399_v40 = vunpack.i.l.bf16 %v9844_v35  ;;  %v5400_v56 = vunpack.i.h.bf16 %v9844_v35  ;;  %v9847_v58 = vld [vmem:[#allocation39_spill] sm:$0xff] }
 0x145   : > { %v7774_v42 = vpop.permute.xlu1 %5592  ;;  %v5405_v18 = vunpack.i.h.bf16 %v9845_v5  ;;  %v5404_v41 = vunpack.i.l.bf16 %v9845_v5  ;;  %v5409_v45 = vunpack.i.l.bf16 %v9846_v2  ;;  %v7813_v37 = vsel %vm1860_vm4, %v7641_v63, %v5384_v15 }
 0x146   : > { %v7786_v8 = vpop.permute.xlu0 %5597  ;;  %v7817_v13 = vsel %vm1860_vm4, %v7637_v1, %v5385_v28  ;;  %v5410_v27 = vunpack.i.h.bf16 %v9846_v2  ;;  %v5414_v35 = vunpack.i.l.bf16 %v9847_v58  ;;  %v7825_v5 = vsel %vm1860_vm4, %v7649_v26, %v5389_v49  ;;  %v9849_v26 = vld [vmem:[#allocation40_spill] sm:$0xff] }
 0x147   : > { %v7829_v14 = vsel %vm1860_vm4, %v7653_v6, %v5390_v22  ;;  %v7833_v63 = vsel %vm1860_vm4, %v7661_v52, %v5394_v57  ;;  %v7837_v1 = vsel %vm1860_vm4, %v7657_v44, %v5395_v16  ;;  %v7841_v2 = vsel %vm1860_vm4, %v7665_v47, %v5399_v40 }
 0x148   : > { %v5415_v28 = vunpack.i.h.bf16 %v9847_v58  ;;  %v5420_v15 = vunpack.i.h.bf16 %v9849_v26  ;;  %v5419_v49 = vunpack.i.l.bf16 %v9849_v26  ;;  %v7848_v6 = vsel %vm1860_vm4, %v7672_v12, %v5400_v56 }
 0x149   : > { %v7809_v34 = vpop.permute.xlu1 %5602  ;;  %v7852_v52 = vsel %vm1860_vm4, %v7680_v38, %v5404_v41  ;;  %v7856_v44 = vsel %vm1860_vm4, %v7676_v50, %v5405_v18  ;;  %v7860_v47 = vsel %vm1860_vm4, %v7684_v59, %v5409_v45  ;;  %v7866_v16 = vsel %vm1860_vm4, %v7690_v29, %v5410_v27  ;;  %v9851_v38 = vld [vmem:[#allocation41_spill] sm:$0xff]  ;;  %v9853_v50 = vld [vmem:[#allocation42_spill] sm:$0xff]  ;;  %v9854_v41 = vld [vmem:[#allocation43_spill] sm:$0xff] }
 0x14a   : > { %v7821_v46 = vpop.permute.xlu0 %5607  ;;  %v7870_v12 = vsel %vm1860_vm4, %v7706_v43, %v5414_v35  ;;  %v5425_v57 = vunpack.i.h.bf16 %v9851_v38  ;;  %v5424_v40 = vunpack.i.l.bf16 %v9851_v38  ;;  %v5430_v56 = vunpack.i.h.bf16 %v9853_v50  ;;  %v9855_v35 = vld [vmem:[#allocation44_spill] sm:$0xff] }
 0x14b   : > { %9848 = vst [vmem:[#allocation14_spill] sm:$0xff] %v7821_v46  ;;  %v5429_v59 = vunpack.i.l.bf16 %v9853_v50  ;;  %v5435_v45 = vunpack.i.h.bf16 %v9854_v41  ;;  %v5434_v58 = vunpack.i.l.bf16 %v9854_v41  ;;  %v7882_v29 = vsel %vm1860_vm4, %v7694_v21, %v5415_v28  ;;  %v9856_v50 = vld [vmem:[#allocation45_spill] sm:$0xff] }
 0x14c   : > { %v7886_v43 = vsel %vm1860_vm4, %v7710_v61, %v5419_v49  ;;  %v7890_v27 = vsel %vm1860_vm4, %v7714_v0, %v5420_v15  ;;  %v5439_v26 = vunpack.i.l.bf16 %v9855_v35  ;;  %v5440_v38 = vunpack.i.h.bf16 %v9855_v35  ;;  %v9861_v15 = vld [vmem:[#allocation47_spill] sm:$0xff] }
 0x14d   : > { %v7862_v22 = vpop.permute.xlu1 %5612  ;;  %v5444_v41 = vunpack.i.l.bf16 %v9856_v50  ;;  %v7901_v61 = vsel %vm1860_vm4, %v7729_v30, %v5424_v40  ;;  %v7905_v0 = vsel %vm1860_vm4, %v7725_v32, %v5425_v57  ;;  %v5454_v49 = vunpack.i.l.bf16 %v9861_v15 }
 0x14e   : > { %9850 = vst [vmem:[#allocation13_spill] sm:$0xff] %v7862_v22  ;;  %v7874_v18 = vpop.permute.xlu0 %5617  ;;  %v9857_v22 = vld [vmem:[#allocation46_spill] sm:$0xff]  ;;  %9859 = vst [vmem:[#allocation17_spill] sm:$0xff] %v7901_v61  ;;  %v7921_v30 = vsel %vm1893_vm5, %v7745_v7, %v5434_v58  ;;  %v7925_v32 = vsel %vm1893_vm5, %v7749_v9, %v5435_v45  ;;  %v5455_v57 = vunpack.i.h.bf16 %v9861_v15 }
 0x14f   : > { %9852 = vst [vmem:[#allocation16_spill] sm:$0xff] %v7874_v18  ;;  %v5445_v18 = vunpack.i.h.bf16 %v9856_v50  ;;  %v5449_v46 = vunpack.i.l.bf16 %v9857_v22  ;;  %9860 = vst [vmem:[#allocation18_spill] sm:$0xff] %v7905_v0  ;;  %v5450_v28 = vunpack.i.h.bf16 %v9857_v22  ;;  %v7913_v50 = vsel %vm1893_vm5, %v7737_v23, %v5429_v59  ;;  %v9862_v23 = vld [vmem:[#allocation48_spill] sm:$0xff]  ;;  %v9869_v61 = vld [vmem:[#allocation54_spill] sm:$0xff] }
 0x150   : > { %v7929_v22 = vsel %vm1893_vm5, %v7753_v17, %v5439_v26  ;;  %v5460_v40 = vunpack.i.h.bf16 %v9862_v23  ;;  %v5459_v59 = vunpack.i.l.bf16 %v9862_v23  ;;  %v7940_v7 = vsel %vm1893_vm5, %v7764_v54, %v5444_v41  ;;  %v9863_v54 = vld [vmem:[#allocation49_spill] sm:$0xff] }
 0x151   : > { %v7897_v21 = vpop.permute.xlu1 %5622  ;;  %v7944_v9 = vsel %vm1893_vm5, %v7768_v53, %v5445_v18  ;;  %v7948_v17 = vsel %vm1893_vm5, %v7772_v10, %v5449_v46  ;;  %v7954_v45 = vsel %vm1893_vm5, %v7778_v36, %v5450_v28  ;;  %v5465_v58 = vunpack.i.h.bf16 %v9863_v54  ;;  %v9865_v18 = vld [vmem:[#allocation50_spill] sm:$0xff]  ;;  %v9866_v10 = vld [vmem:[#allocation51_spill] sm:$0xff] }
 0x152   : > { %9858 = vst [vmem:[#allocation15_spill] sm:$0xff] %v7897_v21  ;;  %v7909_v35 = vpop.permute.xlu0 %5627  ;;  %v7917_v21 = vsel %vm1893_vm5, %v7741_v11, %v5430_v56  ;;  %v7936_v11 = vsel %vm1893_vm5, %v7760_v55, %v5440_v38  ;;  %v7958_v55 = vsel %vm1893_vm5, %v7782_v60, %v5454_v49  ;;  %v5464_v26 = vunpack.i.l.bf16 %v9863_v54  ;;  %v9867_v49 = vld [vmem:[#allocation52_spill] sm:$0xff] }
 0x153   : > { %v5470_v38 = vunpack.i.h.bf16 %v9865_v18  ;;  %v5469_v46 = vunpack.i.l.bf16 %v9865_v18  ;;  %v5475_v41 = vunpack.i.h.bf16 %v9866_v10  ;;  %v5474_v15 = vunpack.i.l.bf16 %v9866_v10  ;;  %v9868_v18 = vld [vmem:[#allocation53_spill] sm:$0xff] }
 0x154   : > { %v7970_v36 = vsel %vm1893_vm5, %v7794_v3, %v5455_v57  ;;  %v7974_v60 = vsel %vm1893_vm5, %v7798_v19, %v5459_v59  ;;  %v7978_v28 = vsel %vm1893_vm5, %v7802_v48, %v5460_v40  ;;  %v5479_v23 = vunpack.i.l.bf16 %v9867_v49  ;;  %v9871_v40 = vld [vmem:[#allocation55_spill] sm:$0xff] }
 0x155   : > { %v7950_v56 = vpop.permute.xlu1 %5632  ;;  %v5480_v54 = vunpack.i.h.bf16 %v9867_v49  ;;  %v5485_v0 = vunpack.i.h.bf16 %v9868_v18  ;;  %v5484_v10 = vunpack.i.l.bf16 %v9868_v18  ;;  %v7989_v19 = vsel %vm1893_vm5, %v7813_v37, %v5464_v26 }
 0x156   : > { %v7962_v53 = vpop.permute.xlu0 %5637  ;;  %v7993_v48 = vsel %vm1893_vm5, %v7817_v13, %v5465_v58  ;;  %v5490_v57 = vunpack.i.h.bf16 %v9869_v61  ;;  %v5494_v59 = vunpack.i.l.bf16 %v9871_v40  ;;  %v8001_v18 = vsel %vm1893_vm5, %v7825_v5, %v5469_v46  ;;  %v9872_v58 = vld [vmem:[#allocation56_spill] sm:$0xff] }
 0x157   : > { %9864 = vst [vmem:[#allocation19_spill] sm:$0xff] %v7962_v53  ;;  %v5489_v53 = vunpack.i.l.bf16 %v9869_v61  ;;  %v8009_v37 = vsel %vm1893_vm5, %v7833_v63, %v5474_v15  ;;  %v8013_v13 = vsel %vm1893_vm5, %v7837_v1, %v5475_v41  ;;  %v8017_v61 = vsel %vm1893_vm5, %v7841_v2, %v5479_v23 }
 0x158   : > { %v5495_v5 = vunpack.i.h.bf16 %v9871_v40  ;;  %v5500_v26 = vunpack.i.h.bf16 %v9872_v58  ;;  %v8028_v63 = vsel %vm1893_vm5, %v7852_v52, %v5484_v10  ;;  %v8032_v1 = vsel %vm1893_vm5, %v7856_v44, %v5485_v0 }
 0x159   : > { %v7985_v3 = vpop.permute.xlu1 %5642  ;;  %v8036_v2 = vsel %vm1893_vm5, %v7860_v47, %v5489_v53  ;;  %v8042_v41 = vsel %vm1893_vm5, %v7866_v16, %v5490_v57  ;;  %v5510_v52 = vunpack.i.h.bf16 %v7381_v20  ;;  %v5509_v44 = vunpack.i.l.bf16 %v7381_v20 }
 0x15a   : > { %9870 = vst [vmem:[#allocation20_spill] sm:$0xff] %v7985_v3  ;;  %v7997_v49 = vpop.permute.xlu0 %5647  ;;  %v8005_v3 = vsel %vm1893_vm5, %v7829_v14, %v5470_v38  ;;  %v5499_v14 = vunpack.i.l.bf16 %v9872_v58  ;;  %v8024_v38 = vsel %vm1893_vm5, %v7848_v6, %v5480_v54  ;;  %v8046_v6 = vsel %vm1893_vm5, %v7870_v12, %v5494_v59 }
 0x15b   : > { %v5515_v47 = vunpack.i.h.bf16 %v7420_v62  ;;  %v5514_v53 = vunpack.i.l.bf16 %v7420_v62  ;;  %v5520_v15 = vunpack.i.h.bf16 %v7428_v25  ;;  %v5519_v16 = vunpack.i.l.bf16 %v7428_v25 }
 0x15c   : > { %v8058_v23 = vsel %vm1893_vm5, %v7882_v29, %v5495_v5  ;;  %v8062_v12 = vsel %vm1893_vm5, %v7886_v43, %v5499_v14  ;;  %v8066_v20 = vsel %vm1893_vm5, %v7890_v27, %v5500_v26  ;;  %v5524_v54 = vunpack.i.l.bf16 %v7453_v39 }
 0x15d   : > { %v8038_v46 = vpop.permute.xlu1 %5652  ;;  %v5525_v25 = vunpack.i.h.bf16 %v7453_v39  ;;  %v5529_v57 = vunpack.i.l.bf16 %v7465_v51  ;;  %v1927_v43 = vsel %vm1926_vm6, %v7913_v50, %v5509_v44  ;;  %v1928_v27 = vsel %vm1926_vm6, %v7917_v21, %v5510_v52 }
 0x15e   : > { %v8050_v0 = vpop.permute.xlu0 %5657  ;;  %v5590_v40 = vunpack.i.h.bf16 %v7733_v31  ;;  %v5589_v59 = vunpack.i.l.bf16 %v7733_v31  ;;  %v1929_v58 = vsel %vm1926_vm6, %v7921_v30, %v5514_v53  ;;  %v1930_v39 = vsel %vm1926_vm6, %v7925_v32, %v5515_v47 }
 0x15f   : > { %v1931_v26 = vsel %vm1926_vm6, %v7929_v22, %v5519_v16  ;;  %v1932_v50 = vsel %vm1926_vm6, %v7936_v11, %v5520_v15  ;;  %v1933_v21 = vsel %vm1926_vm6, %v7940_v7, %v5524_v54  ;;  %v5530_v14 = vunpack.i.h.bf16 %v7465_v51 }
 0x160   : > { %v1934_v44 = vsel %vm1926_vm6, %v7944_v9, %v5525_v25  ;;  %v8096_v30 = vsel %vm1926_vm6, %v7948_v17, %v5529_v57  ;;  %v5535_v32 = vunpack.i.h.bf16 %v7509_v24  ;;  %v5594_v22 = vunpack.i.l.bf16 %v7774_v42 }
 0x161   : > { %v8073_v29 = vpop.permute.xlu1 %5662  ;;  %v5534_v11 = vunpack.i.l.bf16 %v7509_v24  ;;  %v5595_v7 = vunpack.i.h.bf16 %v7774_v42  ;;  %v1960_v51 = vsel %vm1959_vm7, %v1927_v43, %v5589_v59  ;;  %v1961_v15 = vsel %vm1959_vm7, %v1928_v27, %v5590_v40 }
 0x162   : > { %v5668_v5 = vpop.permute.xlu0 %5667  ;;  %v5539_v17 = vunpack.i.l.bf16 %v7521_v4  ;;  %v5600_v57 = vunpack.i.h.bf16 %v7786_v8  ;;  %v1962_v24 = vsel %vm1959_vm7, %v1929_v58, %v5594_v22  ;;  %v5599_v42 = vunpack.i.l.bf16 %v7786_v8 }
 0x163   : > { %v5670_v52 = vunpack.i.h.bf16 %v5668_v5  ;;  %v5669_v31 = vunpack.i.l.bf16 %v5668_v5  ;;  %v1963_v40 = vsel %vm1959_vm7, %v1930_v39, %v5595_v7 }
 0x164   : > { %v8128_v7 = vsel %vm1926_vm6, %v7974_v60, %v5539_v17 }
 0x165   : > { %v5673_v47 = vpop.permute.xlu1 %5672  ;;  %v1993_v5 = vsel %vm1992_vm8, %v1960_v51, %v5669_v31  ;;  %v1994_v62 = vsel %vm1992_vm8, %v1961_v15, %v5670_v52  ;;  %v1936_v31 = vsel %vm1926_vm6, %v7954_v45, %v5530_v14  ;;  %v5540_v52 = vunpack.i.h.bf16 %v7521_v4 }
 0x166   : > { %v5678_v53 = vpop.permute.xlu0 %5677  ;;  %v5675_v16 = vunpack.i.h.bf16 %v5673_v47  ;;  %v5674_v9 = vunpack.i.l.bf16 %v5673_v47  ;;  %v1938_v45 = vsel %vm1926_vm6, %v7970_v36, %v5535_v32  ;;  %v5604_v4 = vunpack.i.l.bf16 %v7809_v34  ;;  %v9873_v36 = vld [vmem:[#allocation4_spill] sm:$0xff] }
 0x167   : > { %v5680_v54 = vunpack.i.h.bf16 %v5678_v53  ;;  %v5679_v25 = vunpack.i.l.bf16 %v5678_v53  ;;  %v5544_v32 = vunpack.i.l.bf16 %v9873_v36 }
 0x168   : > { %v1995_v58 = vsel %vm1992_vm8, %v1962_v24, %v5674_v9  ;;  %v1996_v8 = vsel %vm1992_vm8, %v1963_v40, %v5675_v16  ;;  %v1964_v16 = vsel %vm1959_vm7, %v1931_v26, %v5599_v42  ;;  %v1965_v9 = vsel %vm1959_vm7, %v1932_v50, %v5600_v57  ;;  %v9874_v24 = vld [vmem:[#allocation14_spill] sm:$0xff] }
 0x169   : > { %v5683_v10 = vpop.permute.xlu1 %5682  ;;  %v2026_v43 = vsel %vm2025_vm9, %v1993_v5, %v5679_v25  ;;  %v2027_v27 = vsel %vm2025_vm9, %v1994_v62, %v5680_v54  ;;  %v1966_v26 = vsel %vm1959_vm7, %v1933_v21, %v5604_v4  ;;  %v5609_v50 = vunpack.i.l.bf16 %v9874_v24 }
 0x16a   : > { %v5685_v59 = vunpack.i.h.bf16 %v5683_v10  ;;  %v5684_v47 = vunpack.i.l.bf16 %v5683_v10  ;;  %v5688_v53 = vpop.permute.xlu0 %5687  ;;  %v2058_v33 = vpack.c.bf16 %v2027_v27, %v2026_v43  ;;  %v1937_v10 = vsel %vm1926_vm6, %v7958_v55, %v5534_v11 }
 0x16b   : > { %v5690_v62 = vunpack.i.h.bf16 %v5688_v53  ;;  %v5689_v15 = vunpack.i.l.bf16 %v5688_v53  ;;  %v5610_v43 = vunpack.i.h.bf16 %v9874_v24 }
 0x16c   : > { %v2028_v22 = vsel %vm2025_vm9, %v1995_v58, %v5684_v47  ;;  %v2029_v51 = vsel %vm2025_vm9, %v1996_v8, %v5685_v59  ;;  %5051 = vmatprep.mubr.msk.bf16.mxu0 %vm2094_vm10, %v2058_v33  ;;  %v5605_v33 = vunpack.i.h.bf16 %v7809_v34  ;;  %v1940_v58 = vsel %vm1926_vm6, %v7978_v28, %v5540_v52 }
 0x16d   : > { %v5693_v39 = vpop.permute.xlu1 %5692  ;;  %v2059_v14 = vpack.c.bf16 %v2029_v51, %v2028_v22  ;;  %v1997_v60 = vsel %vm1992_vm8, %v1964_v16, %v5689_v15  ;;  %v1998_v17 = vsel %vm1992_vm8, %v1965_v9, %v5690_v62  ;;  %v5545_v8 = vunpack.i.h.bf16 %v9873_v36  ;;  %v9876_v16 = vld [vmem:[#allocation13_spill] sm:$0xff] }
 0x16e   : > { %v5698_v54 = vpop.permute.xlu0 %5697  ;;  %v5695_v25 = vunpack.i.h.bf16 %v5693_v39  ;;  %v5694_v55 = vunpack.i.l.bf16 %v5693_v39  ;;  %v1967_v27 = vsel %vm1959_vm7, %v1934_v44, %v5605_v33  ;;  %v9875_v44 = vld [vmem:[#allocation6_spill] sm:$0xff]  ;;  %v5614_v28 = vunpack.i.l.bf16 %v9876_v16 }
 0x16f   : > { %v5700_v11 = vunpack.i.h.bf16 %v5698_v54  ;;  %v5699_v5 = vunpack.i.l.bf16 %v5698_v54  ;;  %5052 = vmatmul.mubr.msk.bf16.vlgmr.msra.gmra.mrb[0].mxu0 %vm2094_vm10, %v2059_v14  ;;  %v5550_v39 = vunpack.i.h.bf16 %v9875_v44  ;;  %v5549_v14 = vunpack.i.l.bf16 %v9875_v44 }
 0x170   : > { %v1999_v21 = vsel %vm1992_vm8, %v1966_v26, %v5694_v55  ;;  %v2000_v22 = vsel %vm1992_vm8, %v1967_v27, %v5695_v25  ;;  %v1941_v33 = vsel %vm1926_vm6, %v7989_v19, %v5544_v32  ;;  %v1968_v54 = vsel %vm1959_vm7, %v8096_v30, %v5609_v50  ;;  %v9877_v26 = vld [vmem:[#allocation16_spill] sm:$0xff] }
 0x171   : > { %v2030_v34 = vsel %vm2025_vm9, %v1997_v60, %v5699_v5  ;;  %v2031_v57 = vsel %vm2025_vm9, %v1998_v17, %v5700_v11  ;;  %v5703_v42 = vpop.permute.xlu1 %5702  ;;  %v1969_v25 = vsel %vm1959_vm7, %v1936_v31, %v5610_v43  ;;  %v5615_v55 = vunpack.i.h.bf16 %v9876_v16 }
 0x172   : > { %v5705_v40 = vunpack.i.h.bf16 %v5703_v42  ;;  %v5704_v59 = vunpack.i.l.bf16 %v5703_v42  ;;  %v5708_v47 = vpop.permute.xlu0 %5707  ;;  %v2060_v53 = vpack.c.bf16 %v2031_v57, %v2030_v34  ;;  %v1942_v17 = vsel %vm1926_vm6, %v7993_v48, %v5545_v8 }
 0x173   : > { %v5710_v15 = vunpack.i.h.bf16 %v5708_v47  ;;  %v5709_v4 = vunpack.i.l.bf16 %v5708_v47  ;;  %v5620_v34 = vunpack.i.h.bf16 %v9877_v26  ;;  %v1970_v31 = vsel %vm1959_vm7, %v1937_v10, %v5614_v28 }
 0x174   : > { %v2032_v51 = vsel %vm2025_vm9, %v1999_v21, %v5704_v59  ;;  %v2033_v62 = vsel %vm2025_vm9, %v2000_v22, %v5705_v40  ;;  %5055 = vmatprep.mubr.msk.bf16.mxu0 %vm2094_vm10, %v2060_v53  ;;  %v5619_v32 = vunpack.i.l.bf16 %v9877_v26  ;;  %v1971_v42 = vsel %vm1959_vm7, %v1938_v45, %v5615_v55 }
 0x175   : > { %v5713_v52 = vpop.permute.xlu1 %5712  ;;  %v2061_v9 = vpack.c.bf16 %v2033_v62, %v2032_v51  ;;  %v2001_v19 = vsel %vm1992_vm8, %v1968_v54, %v5709_v4  ;;  %v2002_v30 = vsel %vm1992_vm8, %v1969_v25, %v5710_v15  ;;  %v1943_v47 = vsel %vm1926_vm6, %v8001_v18, %v5549_v14  ;;  %v9878_v62 = vld [vmem:[#allocation5_spill] sm:$0xff]  ;;  %v9879_v18 = vld [vmem:[#allocation15_spill] sm:$0xff] }
 0x176   : > { %v5718_v11 = vpop.permute.xlu0 %5717  ;;  %v5715_v5 = vunpack.i.h.bf16 %v5713_v52  ;;  %v5714_v36 = vunpack.i.l.bf16 %v5713_v52  ;;  %v1944_v53 = vsel %vm1926_vm6, %v8005_v3, %v5550_v39  ;;  %v5555_v15 = vunpack.i.h.bf16 %v9878_v62  ;;  %v9880_v39 = vld [vmem:[#allocation8_spill] sm:$0xff] }
 0x177   : > { %v5720_v24 = vunpack.i.h.bf16 %v5718_v11  ;;  %v5719_v60 = vunpack.i.l.bf16 %v5718_v11  ;;  %5056 = vmatmul.mubr.msk.bf16.gmra.mrb[4].mxu0 %vm2094_vm10, %v2061_v9  ;;  %v5554_v4 = vunpack.i.l.bf16 %v9878_v62  ;;  %v5624_v44 = vunpack.i.l.bf16 %v9879_v18 }
 0x178   : > { %v2003_v10 = vsel %vm1992_vm8, %v1970_v31, %v5714_v36  ;;  %v2004_v8 = vsel %vm1992_vm8, %v1971_v42, %v5715_v5  ;;  %v5560_v16 = vunpack.i.h.bf16 %v9880_v39  ;;  %v1972_v28 = vsel %vm1959_vm7, %v8128_v7, %v5619_v32 }
 0x179   : > { %v2034_v43 = vsel %vm2025_vm9, %v2001_v19, %v5719_v60  ;;  %v2035_v50 = vsel %vm2025_vm9, %v2002_v30, %v5720_v24  ;;  %v5723_v57 = vpop.permute.xlu1 %5722  ;;  %v1973_v52 = vsel %vm1959_vm7, %v1940_v58, %v5620_v34  ;;  %v5625_v9 = vunpack.i.h.bf16 %v9879_v18 }
 0x17a   : > { %v5725_v27 = vunpack.i.h.bf16 %v5723_v57  ;;  %v5724_v40 = vunpack.i.l.bf16 %v5723_v57  ;;  %v5728_v48 = vpop.permute.xlu0 %5727  ;;  %v2062_v59 = vpack.c.bf16 %v2035_v50, %v2034_v43  ;;  %v5559_v36 = vunpack.i.l.bf16 %v9880_v39 }
 0x17b   : > { %v5730_v51 = vunpack.i.h.bf16 %v5728_v48  ;;  %v5729_v45 = vunpack.i.l.bf16 %v5728_v48  ;;  %v5630_v24 = vunpack.i.h.bf16 %v7909_v35  ;;  %v1974_v7 = vsel %vm1959_vm7, %v1941_v33, %v5624_v44 }
 0x17c   : > { %v2036_v21 = vsel %vm2025_vm9, %v2003_v10, %v5724_v40  ;;  %v2037_v22 = vsel %vm2025_vm9, %v2004_v8, %v5725_v27  ;;  %5059 = vmatprep.mubr.msk.bf16.mxu0 %vm2094_vm10, %v2062_v59  ;;  %v5629_v58 = vunpack.i.l.bf16 %v7909_v35  ;;  %v1975_v31 = vsel %vm1959_vm7, %v1942_v17, %v5625_v9  ;;  %v9881_v8 = vld [vmem:[#allocation7_spill] sm:$0xff] }
 0x17d   : > { %v5733_v14 = vpop.permute.xlu1 %5732  ;;  %v2063_v3 = vpack.c.bf16 %v2037_v22, %v2036_v21  ;;  %v2005_v60 = vsel %vm1992_vm8, %v1972_v28, %v5729_v45  ;;  %v2006_v26 = vsel %vm1992_vm8, %v1973_v52, %v5730_v51  ;;  %v1945_v42 = vsel %vm1926_vm6, %v8009_v37, %v5554_v4  ;;  %v9883_v52 = vld [vmem:[#allocation19_spill] sm:$0xff] }
 0x17e   : > { %v5738_v54 = vpop.permute.xlu0 %5737  ;;  %v5735_v25 = vunpack.i.h.bf16 %v5733_v14  ;;  %v5734_v55 = vunpack.i.l.bf16 %v5733_v14  ;;  %v1946_v27 = vsel %vm1926_vm6, %v8013_v13, %v5555_v15  ;;  %v1947_v10 = vsel %vm1926_vm6, %v8017_v61, %v5559_v36  ;;  %v9882_v61 = vld [vmem:[#allocation10_spill] sm:$0xff] }
 0x17f   : > { %v5740_v11 = vunpack.i.h.bf16 %v5738_v54  ;;  %v5739_v5 = vunpack.i.l.bf16 %v5738_v54  ;;  %5060 = vmatmul.mubr.msk.bf16.gmra.mrb[8].mxu0 %vm2094_vm10, %v2063_v3  ;;  %v5565_v37 = vunpack.i.h.bf16 %v9881_v8  ;;  %v5634_v21 = vunpack.i.l.bf16 %v7950_v56 }
 0x180   : > { %v2007_v33 = vsel %vm1992_vm8, %v1974_v7, %v5734_v55  ;;  %v2008_v35 = vsel %vm1992_vm8, %v1975_v31, %v5735_v25  ;;  %v5564_v51 = vunpack.i.l.bf16 %v9881_v8  ;;  %v1976_v45 = vsel %vm1959_vm7, %v1943_v47, %v5629_v58 }
 0x181   : > { %v2038_v34 = vsel %vm2025_vm9, %v2005_v60, %v5739_v5  ;;  %v2039_v19 = vsel %vm2025_vm9, %v2006_v26, %v5740_v11  ;;  %v5743_v30 = vpop.permute.xlu1 %5742  ;;  %v1977_v62 = vsel %vm1959_vm7, %v1944_v53, %v5630_v24  ;;  %v5635_v15 = vunpack.i.h.bf16 %v7950_v56 }
 0x182   : > { %v5745_v32 = vunpack.i.h.bf16 %v5743_v30  ;;  %v5744_v43 = vunpack.i.l.bf16 %v5743_v30  ;;  %v5748_v50 = vpop.permute.xlu0 %5747  ;;  %v2064_v57 = vpack.c.bf16 %v2039_v19, %v2038_v34  ;;  %v5569_v28 = vunpack.i.l.bf16 %v9882_v61 }
 0x183   : > { %v5750_v59 = vunpack.i.h.bf16 %v5748_v50  ;;  %v5749_v17 = vunpack.i.l.bf16 %v5748_v50  ;;  %v5640_v9 = vunpack.i.h.bf16 %v9883_v52  ;;  %v1978_v47 = vsel %vm1959_vm7, %v1945_v42, %v5634_v21 }
 0x184   : > { %v2040_v40 = vsel %vm2025_vm9, %v2007_v33, %v5744_v43  ;;  %v2041_v48 = vsel %vm2025_vm9, %v2008_v35, %v5745_v32  ;;  %5063 = vmatprep.mubr.msk.bf16.mxu0 %vm2094_vm10, %v2064_v57  ;;  %v5639_v53 = vunpack.i.l.bf16 %v9883_v52  ;;  %v1979_v5 = vsel %vm1959_vm7, %v1946_v27, %v5635_v15 }
 0x185   : > { %v5753_v13 = vpop.permute.xlu1 %5752  ;;  %v2065_v22 = vpack.c.bf16 %v2041_v48, %v2040_v40  ;;  %v2009_v54 = vsel %vm1992_vm8, %v1976_v45, %v5749_v17  ;;  %v2010_v25 = vsel %vm1992_vm8, %v1977_v62, %v5750_v59  ;;  %v1948_v7 = vsel %vm1926_vm6, %v8024_v38, %v5560_v16  ;;  %v9884_v16 = vld [vmem:[#allocation20_spill] sm:$0xff] }
 0x186   : > { %v5758_v4 = vpop.permute.xlu0 %5757  ;;  %v5755_v18 = vunpack.i.h.bf16 %v5753_v13  ;;  %v5754_v44 = vunpack.i.l.bf16 %v5753_v13  ;;  %v5570_v58 = vunpack.i.h.bf16 %v9882_v61  ;;  %v1949_v39 = vsel %vm1926_vm6, %v8028_v63, %v5564_v51 }
 0x187   : > { %v5760_v14 = vunpack.i.h.bf16 %v5758_v4  ;;  %v5759_v3 = vunpack.i.l.bf16 %v5758_v4  ;;  %5064 = vmatmul.mubr.msk.bf16.gmra.mrb[12].mxu0 %vm2094_vm10, %v2065_v22  ;;  %v1950_v38 = vsel %vm1926_vm6, %v8032_v1, %v5565_v37  ;;  %v5644_v50 = vunpack.i.l.bf16 %v9884_v16  ;;  %v9885_v1 = vld [vmem:[#allocation9_spill] sm:$0xff] }
 0x188   : > { %v2011_v34 = vsel %vm1992_vm8, %v1978_v47, %v5754_v44  ;;  %v2012_v19 = vsel %vm1992_vm8, %v1979_v5, %v5755_v18  ;;  %v1951_v27 = vsel %vm1926_vm6, %v8036_v2, %v5569_v28  ;;  %v1980_v33 = vsel %vm1959_vm7, %v1947_v10, %v5639_v53  ;;  %v9886_v47 = vld [vmem:[#allocation12_spill] sm:$0xff] }
 0x189   : > { %v2042_v56 = vsel %vm2025_vm9, %v2009_v54, %v5759_v3  ;;  %v2043_v55 = vsel %vm2025_vm9, %v2010_v25, %v5760_v14  ;;  %v5763_v11 = vpop.permute.xlu1 %5762  ;;  %v1981_v35 = vsel %vm1959_vm7, %v1948_v7, %v5640_v9  ;;  %v5645_v40 = vunpack.i.h.bf16 %v9884_v16 }
 0x18a   : > { %v5765_v36 = vunpack.i.h.bf16 %v5763_v11  ;;  %v5764_v24 = vunpack.i.l.bf16 %v5763_v11  ;;  %v5768_v60 = vpop.permute.xlu0 %5767  ;;  %v2066_v26 = vpack.c.bf16 %v2043_v55, %v2042_v56  ;;  %v5574_v37 = vunpack.i.l.bf16 %v9885_v1 }
 0x18b   : > { %v5770_v32 = vunpack.i.h.bf16 %v5768_v60  ;;  %v5769_v43 = vunpack.i.l.bf16 %v5768_v60  ;;  %v5650_v21 = vunpack.i.h.bf16 %v7997_v49  ;;  %v1982_v10 = vsel %vm1959_vm7, %v1949_v39, %v5644_v50 }
 0x18c   : > { %v2044_v30 = vsel %vm2025_vm9, %v2011_v34, %v5764_v24  ;;  %v2045_v31 = vsel %vm2025_vm9, %v2012_v19, %v5765_v36  ;;  %5067 = vmatprep.mubr.msk.bf16.mxu0 %vm2094_vm10, %v2066_v26  ;;  %v5649_v22 = vunpack.i.l.bf16 %v7997_v49  ;;  %v1983_v15 = vsel %vm1959_vm7, %v1950_v38, %v5645_v40 }
 0x18d   : > { %v5773_v57 = vpop.permute.xlu1 %5772  ;;  %v2067_v42 = vpack.c.bf16 %v2045_v31, %v2044_v30  ;;  %v2013_v13 = vsel %vm1992_vm8, %v1980_v33, %v5769_v43  ;;  %v2014_v2 = vsel %vm1992_vm8, %v1981_v35, %v5770_v32  ;;  %v1952_v3 = vsel %vm1926_vm6, %v8042_v41, %v5570_v58  ;;  %v9887_v35 = vld [vmem:[#allocation11_spill] sm:$0xff] }
 0x18e   : > { %v5778_v48 = vpop.permute.xlu0 %5777  ;;  %v5775_v59 = vunpack.i.h.bf16 %v5773_v57  ;;  %v5774_v17 = vunpack.i.l.bf16 %v5773_v57  ;;  %v5575_v61 = vunpack.i.h.bf16 %v9885_v1  ;;  %v5580_v53 = vunpack.i.h.bf16 %v9886_v47 }
 0x18f   : > { %v5780_v63 = vunpack.i.h.bf16 %v5778_v48  ;;  %v5779_v8 = vunpack.i.l.bf16 %v5778_v48  ;;  %5068 = vmatmul.mubr.msk.bf16.gmra.mrb[16].mxu0 %vm2094_vm10, %v2067_v42  ;;  %v5579_v56 = vunpack.i.l.bf16 %v9886_v47  ;;  %v5654_v41 = vunpack.i.l.bf16 %v8038_v46 }
 0x190   : > { %v2015_v28 = vsel %vm1992_vm8, %v1982_v10, %v5774_v17  ;;  %v2016_v49 = vsel %vm1992_vm8, %v1983_v15, %v5775_v59  ;;  %v1953_v5 = vsel %vm1926_vm6, %v8046_v6, %v5574_v37  ;;  %v1984_v36 = vsel %vm1959_vm7, %v1951_v27, %v5649_v22  ;;  %v9890_v22 = vld [vmem:[#allocation17_spill] sm:$0xff] }
 0x191   : > { %v2046_v51 = vsel %vm2025_vm9, %v2013_v13, %v5779_v8  ;;  %v2047_v45 = vsel %vm2025_vm9, %v2014_v2, %v5780_v63  ;;  %v5783_v62 = vpop.permute.xlu1 %5782  ;;  %v1985_v24 = vsel %vm1959_vm7, %v1952_v3, %v5650_v21  ;;  %v5655_v60 = vunpack.i.h.bf16 %v8038_v46  ;;  %v9888_v2 = vld [vmem:[#allocation57_spill] sm:$0xff] }
 0x192   : > { %v5785_v4 = vunpack.i.h.bf16 %v5783_v62  ;;  %v5784_v18 = vunpack.i.l.bf16 %v5783_v62  ;;  %v5788_v44 = vpop.permute.xlu0 %5787  ;;  %v2068_v14 = vpack.c.bf16 %v2047_v45, %v2046_v51  ;;  %v1954_v30 = vsel %vm1926_vm6, %v8058_v23, %v5575_v61  ;;  %v9892_v61 = vld [vmem:[#allocation18_spill] sm:$0xff] }
 0x193   : > { %v5790_v54 = vunpack.i.h.bf16 %v5788_v44  ;;  %v5789_v25 = vunpack.i.l.bf16 %v5788_v44  ;;  %v5660_v31 = vunpack.i.h.bf16 %v8050_v0  ;;  %v1986_v43 = vsel %vm1959_vm7, %v1953_v5, %v5654_v41 }
 0x194   : > { %v2048_v52 = vsel %vm2025_vm9, %v2015_v28, %v5784_v18  ;;  %v2049_v9 = vsel %vm2025_vm9, %v2016_v49, %v5785_v4  ;;  %5071 = vmatprep.mubr.msk.bf16.mxu0 %vm2094_vm10, %v2068_v14  ;;  %v5659_v46 = vunpack.i.l.bf16 %v8050_v0  ;;  %v1987_v50 = vsel %vm1959_vm7, %v1954_v30, %v5655_v60  ;;  %v2909_v30 = vld [vmem:[#allocation3 + $0x2] sm:$0xff] }
 0x195   : > { %v5793_v55 = vpop.permute.xlu1 %5792  ;;  %v2069_v11 = vpack.c.bf16 %v2049_v9, %v2048_v52  ;;  %v2017_v6 = vsel %vm1992_vm8, %v1984_v36, %v5789_v25  ;;  %v2018_v32 = vsel %vm1992_vm8, %v1985_v24, %v5790_v54  ;;  %v1955_v33 = vsel %vm1926_vm6, %v8062_v12, %v5579_v56 }
 0x196   : > { %v5798_v26 = vpop.permute.xlu0 %5797  ;;  %v5795_v7 = vunpack.i.h.bf16 %v5793_v55  ;;  %v5794_v58 = vunpack.i.l.bf16 %v5793_v55  ;;  %v5584_v40 = vunpack.i.l.bf16 %v9887_v35  ;;  %v1956_v1 = vsel %vm1926_vm6, %v8066_v20, %v5580_v53 }
 0x197   : > { %v5800_v34 = vunpack.i.h.bf16 %v5798_v26  ;;  %v5799_v19 = vunpack.i.l.bf16 %v5798_v26  ;;  %5072 = vmatmul.mubr.msk.bf16.gmra.mrb[20].mxu0 %vm2094_vm10, %v2069_v11  ;;  %v5585_v37 = vunpack.i.h.bf16 %v9887_v35  ;;  %v5664_v12 = vunpack.i.l.bf16 %v8073_v29 }
 0x198   : > { %v2019_v48 = vsel %vm1992_vm8, %v1986_v43, %v5794_v58  ;;  %v2020_v0 = vsel %vm1992_vm8, %v1987_v50, %v5795_v7  ;;  %v9889_v10 = vunpack.i.l.bf16 %v9888_v2  ;;  %v1988_v45 = vsel %vm1959_vm7, %v1955_v33, %v5659_v46  ;;  %v2877_v58 = vld [vmem:[#allocation3 + $0x1] sm:$0xff]  ;;  %v8366_v46 = vld [vmem:[%s9668_s3] ss:$0 sm:$0xff] }
 0x199   : > { %v2050_v39 = vsel %vm2025_vm9, %v2017_v6, %v5799_v19  ;;  %v2051_v38 = vsel %vm2025_vm9, %v2018_v32, %v5800_v34  ;;  %v5803_v16 = vpop.permute.xlu1 %5802  ;;  %v1989_v62 = vsel %vm1959_vm7, %v1956_v1, %v5660_v31  ;;  %v5665_v15 = vunpack.i.h.bf16 %v8073_v29  ;;  %v8361_v32 = vld [vmem:[%s9667_s2] ss:$0 sm:$0xff]  ;;  %v2519_v1 = vld [vmem:[%s6693_s19 + $0x68] sm:$0xff] }
 0x19a   : > { %v5805_v57 = vunpack.i.h.bf16 %v5803_v16  ;;  %v5804_v42 = vunpack.i.l.bf16 %v5803_v16  ;;  %v5808_v23 = vpop.permute.xlu0 %5807  ;;  %v2070_v27 = vpack.c.bf16 %v2051_v38, %v2050_v39  ;;  %v1924_v51 = vsel %vm1893_vm5, %v9890_v22, %v9889_v10 }
 0x19b   : > { %v5810_v63 = vunpack.i.h.bf16 %v5808_v23  ;;  %v5809_v8 = vunpack.i.l.bf16 %v5808_v23  ;;  %v9891_v3 = vunpack.i.h.bf16 %v9888_v2  ;;  %v1957_v49 = vsel %vm1926_vm6, %v1924_v51, %v5584_v40  ;;  %v2521_v2 = vld [vmem:[%s6693_s19 + $0x78] sm:$0xff] }
 0x19c   : > { %v2052_v59 = vsel %vm2025_vm9, %v2019_v48, %v5804_v42  ;;  %v2053_v17 = vsel %vm2025_vm9, %v2020_v0, %v5805_v57  ;;  %5075 = vmatprep.mubr.msk.bf16.mxu0 %vm2094_vm10, %v2070_v27  ;;  %v1990_v54 = vsel %vm1959_vm7, %v1957_v49, %v5664_v12  ;;  %v9893_v7 = vmov 0.0   ;;  %v2554_v27 = vld [vmem:[%s9672_s7] sm:$0x3] }
 0x19d   : > { %v5813_v21 = vpop.permute.xlu1 %5812  ;;  %v2071_v13 = vpack.c.bf16 %v2053_v17, %v2052_v59  ;;  %v1925_v28 = vsel %vm1893_vm5, %v9892_v61, %v9891_v3  ;;  %v2021_v52 = vsel %vm1992_vm8, %v1988_v45, %v5809_v8  ;;  %v2022_v9 = vsel %vm1992_vm8, %v1989_v62, %v5810_v63  ;;  %2427 = vst.msk [vmem:[#allocation3 + $0x40] sm:$0x3] %vm2420_vm11, %v9893_v7  ;;  %v2518_v8 = vld [vmem:[%s6693_s19 + $0x60] sm:$0xff] }
 0x19e   : > { %v5818_v4 = vpop.permute.xlu0 %5817  ;;  %v5815_v18 = vunpack.i.h.bf16 %v5813_v21  ;;  %v5814_v20 = vunpack.i.l.bf16 %v5813_v21  ;;  %v1958_v29 = vsel %vm1926_vm6, %v1925_v28, %v5585_v37  ;;  %2421 = vst.msk [vmem:[#allocation3 + $0x10] sm:$0x3] %vm2420_vm11, %v9893_v7  ;;  %2424 = vst.msk [vmem:[#allocation3 + $0x28] sm:$0x3] %vm2420_vm11, %v9893_v7  ;;  %5163 = vmatprep.subr.msk.bf16.mxu1 %vm2143_vm3, %v2554_v27  ;;  %5162 = vmatprep.subr.msk.bf16.mxu0 %vm2143_vm3, %v2554_v27  ;;  %v2604_v63 = vsel %vm2143_vm3, %v2554_v27, 0 }
 0x19f   : > { %v5820_v44 = vunpack.i.h.bf16 %v5818_v4  ;;  %v5819_v14 = vunpack.i.l.bf16 %v5818_v4  ;;  %5076 = vmatmul.mubr.msk.bf16.gmra.mrb[24].mxu0 %vm2094_vm10, %v2071_v13  ;;  %v1991_v56 = vsel %vm1959_vm7, %v1958_v29, %v5665_v15  ;;  %2430 = vst.msk [vmem:[#allocation3 + $0x58] sm:$0x3] %vm2420_vm11, %v9893_v7  ;;  %2433 = vst.msk [vmem:[#allocation3 + $0x70] sm:$0x3] %vm2420_vm11, %v9893_v7  ;;  %5160 = vmatpush3.bf16.msra.mxu1 %v2604_v63  ;;  %v2520_v13 = vld [vmem:[%s6693_s19 + $0x70] sm:$0xff] }
 0x1a0   : > { %v2023_v5 = vsel %vm1992_vm8, %v1990_v54, %v5814_v20  ;;  %v2024_v36 = vsel %vm1992_vm8, %v1991_v56, %v5815_v18  ;;  %2436 = vst.msk [vmem:[#allocation3 + $0x88] sm:$0x3] %vm2420_vm11, %v9893_v7  ;;  %2439 = vst.msk [vmem:[#allocation3 + $0xa0] sm:$0x3] %vm2420_vm11, %v9893_v7  ;;  %v2544_v21 = vpack.c.bf16 %v2519_v1, %v2518_v8  ;;  %5084 = vmatpush3.bf16.msra.mxu0 %v2604_v63 }
 0x1a1   : > { %v2054_v25 = vsel %vm2025_vm9, %v2021_v52, %v5819_v14  ;;  %v2055_v47 = vsel %vm2025_vm9, %v2022_v9, %v5820_v44  ;;  %v5823_v53 = vpop.permute.xlu1 %5822  ;;  %2442 = vst.msk [vmem:[#allocation3 + $0xb8] sm:$0x3] %vm2420_vm11, %v9893_v7  ;;  %2445 = vst.msk [vmem:[#allocation3 + $0xd0] sm:$0x3] %vm2420_vm11, %v9893_v7  ;;  %v2545_v51 = vpack.c.bf16 %v2521_v2, %v2520_v13 }
 0x1a2   : > { %v5825_v41 = vunpack.i.h.bf16 %v5823_v53  ;;  %v5824_v55 = vunpack.i.l.bf16 %v5823_v53  ;;  %v2072_v11 = vpack.c.bf16 %v2055_v47, %v2054_v25  ;;  %2448 = vst.msk [vmem:[#allocation3 + $0xe8] sm:$0x3] %vm2420_vm11, %v9893_v7  ;;  %2451 = vst.msk [vmem:[#allocation3 + $0x100] sm:$0x3] %vm2420_vm11, %v9893_v7  ;;  %5097 = vmatprep.mubr.msk.bf16.mxu1 %vm361_vm0, %v2544_v21 }
 0x1a3   : > { %2454 = vst.msk [vmem:[#allocation3 + $0x118] sm:$0x3] %vm2420_vm11, %v9893_v7  ;;  %2457 = vst.msk [vmem:[#allocation3 + $0x130] sm:$0x3] %vm2420_vm11, %v9893_v7  ;;  %5098 = vmatmul.mubr.msk.bf16.vlgmr.msra.gmra.mrb[0].mxu1 %vm361_vm0, %v2545_v51 }
 0x1a4   : > { %v2056_v24 = vsel %vm2025_vm9, %v2023_v5, %v5824_v55  ;;  %v2057_v60 = vsel %vm2025_vm9, %v2024_v36, %v5825_v41  ;;  %5079 = vmatprep.mubr.msk.bf16.mxu0 %vm2094_vm10, %v2072_v11  ;;  %2460 = vst.msk [vmem:[#allocation3 + $0x148] sm:$0x3] %vm2420_vm11, %v9893_v7  ;;  %2463 = vst.msk [vmem:[#allocation3 + $0x160] sm:$0x3] %vm2420_vm11, %v9893_v7  ;;  %v2522_v11 = vld [vmem:[%s6693_s19 + $0x80] sm:$0xff] }
 0x1a5   : > { %v2073_v26 = vpack.c.bf16 %v2057_v60, %v2056_v24  ;;  %2466 = vst.msk [vmem:[#allocation3 + $0x178] sm:$0x3] %vm2420_vm11, %v9893_v7  ;;  %2469 = vst.msk [vmem:[#allocation3 + $0x190] sm:$0x3] %vm2420_vm11, %v9893_v7  ;;  %v2878_v34 = vld [vmem:[#allocation3 + $0x9] sm:$0xff] }
 0x1a6   : > { %2472 = vst.msk [vmem:[#allocation3 + $0x1a8] sm:$0x3] %vm2420_vm11, %v9893_v7  ;;  %v5826_v19 = vpack.i.bf16 %v2878_v34, %v2877_v58  ;;  %v2910_v31 = vld [vmem:[#allocation3 + $0xa] sm:$0xff] }
 0x1a7   : > { %5080 = vmatmul.mubr.msk.bf16.gmra.mrb[28].mxu0 %vm2094_vm10, %v2073_v26  ;;  %v5831_v6 = vpack.i.bf16 %v2910_v31, %v2909_v30  ;;  %v2523_v26 = vld [vmem:[%s6693_s19 + $0x88] sm:$0xff]  ;;  %v2525_v30 = vld [vmem:[%s6693_s19 + $0x98] sm:$0xff] }
 0x1a8   : > { %5827 = vrot.lane.b32.xlu0 %v5826_v19, %s6493_s21  ;;  %v2524_v19 = vld [vmem:[%s6693_s19 + $0x90] sm:$0xff] }
 0x1ac   : > { %5832 = vrot.lane.b32.xlu0 %v5831_v6, %s6495_s23 }
 0x242   : > { %v5053_v43 = vpop.f32.mrb[0].mxu0 }
 0x243   : > { %v2317_v39 = vmul.f32 %v5053_v43, %v8361_v32  ;;  %v2181_v38 = vpop.f32.mrb[1].mxu0  ;;  %v2546_v43 = vpack.c.bf16 %v2523_v26, %v2522_v11  ;;  %v2531_v11 = vld [vmem:[%s6693_s19 + $0xc8] sm:$0xff] }
 0x244   : > { %v2315_v16 = vmul.f32 %v8361_v32, %v2181_v38  ;;  %v5054_v50 = vpop.f32.mrb[2].mxu0 }
 0x245   : > { %v2356_v57 = vadd.f32 %v8366_v46, %v2317_v39  ;;  %v2318_v42 = vmul.f32 %v5054_v50, %v8361_v32  ;;  %v2184_v23 = vpop.f32.mrb[3].mxu0  ;;  %v2547_v50 = vpack.c.bf16 %v2525_v30, %v2524_v19  ;;  %5101 = vmatprep.mubr.msk.bf16.mxu1 %vm361_vm0, %v2546_v43 }
 0x246   : > { %v2354_v33 = vadd.f32 %v8366_v46, %v2315_v16  ;;  %v2316_v35 = vmul.f32 %v8361_v32, %v2184_v23 }
 0x247   : > { %v2388_v40 = vmax.f32 %v2356_v57, 0.0  ;;  %v2357_v48 = vadd.f32 %v8366_v46, %v2318_v42  ;;  %5102 = vmatmul.mubr.msk.bf16.gmra.mrb[4].mxu1 %vm361_vm0, %v2547_v50 }
 0x248   : > { %v2386_v0 = vmax.f32 %v2354_v33, 0.0  ;;  %v2355_v59 = vadd.f32 %v8366_v46, %v2316_v35 }
 0x249   : > { %2476 = vst.msk [vmem:[#allocation3 + $0x31] sm:$0xff] %vm1827_vm2, %v2388_v40  ;;  %v2389_v17 = vmax.f32 %v2357_v48, 0.0 }
 0x24a   : > { %2474 = vst.msk [vmem:[#allocation3 + $0x19] sm:$0xff] %vm1827_vm2, %v2386_v0  ;;  %v2387_v37 = vmax.f32 %v2355_v59, 0.0  ;;  %v5057_v12 = vpop.f32.mrb[4].mxu0 }
 0x24b   : > { %2477 = vst.msk [vmem:[#allocation3 + $0x39] sm:$0xff] %vm1827_vm2, %v2389_v17  ;;  %v2321_v10 = vmul.f32 %v5057_v12, %v8361_v32  ;;  %v2197_v22 = vpop.f32.mrb[5].mxu0  ;;  %v2526_v17 = vld [vmem:[%s6693_s19 + $0xa0] sm:$0xff]  ;;  %v2528_v12 = vld [vmem:[%s6693_s19 + $0xb0] sm:$0xff] }
 0x24c   : > { %2475 = vst.msk [vmem:[#allocation3 + $0x21] sm:$0xff] %vm1827_vm2, %v2387_v37  ;;  %v2319_v45 = vmul.f32 %v8361_v32, %v2197_v22  ;;  %v5058_v62 = vpop.f32.mrb[6].mxu0  ;;  %v2527_v37 = vld [vmem:[%s6693_s19 + $0xa8] sm:$0xff]  ;;  %v2529_v22 = vld [vmem:[%s6693_s19 + $0xb8] sm:$0xff] }
 0x24d   : > { %v2360_v15 = vadd.f32 %v8366_v46, %v2321_v10  ;;  %v2322_v4 = vmul.f32 %v5058_v62, %v8361_v32  ;;  %v2200_v18 = vpop.f32.mrb[7].mxu0  ;;  %v2548_v10 = vpack.c.bf16 %v2527_v37, %v2526_v17 }
 0x24e   : > { %v2358_v20 = vadd.f32 %v8366_v46, %v2319_v45  ;;  %v2320_v44 = vmul.f32 %v8361_v32, %v2200_v18 }
 0x24f   : > { %v2392_v14 = vmax.f32 %v2360_v15, 0.0  ;;  %v2361_v3 = vadd.f32 %v8366_v46, %v2322_v4  ;;  %v2549_v15 = vpack.c.bf16 %v2529_v22, %v2528_v12  ;;  %5105 = vmatprep.mubr.msk.bf16.mxu1 %vm361_vm0, %v2548_v10  ;;  %v6470_v10 = vld [vmem:[%s9669_s4 + $0x8] sm:$0xff]  }
 0x250   : > { %v2390_v61 = vmax.f32 %v2358_v20, 0.0  ;;  %v2359_v28 = vadd.f32 %v8366_v46, %v2320_v44  ;;  %v2943_v52 = vld [vmem:[#allocation3 + $0x30] sm:$0xff] }
 0x251   : > { %2480 = vst.msk [vmem:[#allocation3 + $0x61] sm:$0xff] %vm1827_vm2, %v2392_v14  ;;  %v2393_v49 = vmax.f32 %v2361_v3, 0.0  ;;  %v2881_v25 = vld [vmem:[#allocation3 + $0x31] sm:$0xff]  ;;  %v2879_v2 = vld [vmem:[#allocation3 + $0x19] sm:$0xff]  ;;  %5106 = vmatmul.mubr.msk.bf16.gmra.mrb[8].mxu1 %vm361_vm0, %v2549_v15 }
 0x252   : > { %2478 = vst.msk [vmem:[#allocation3 + $0x49] sm:$0xff] %vm1827_vm2, %v2390_v61  ;;  %v2391_v9 = vmax.f32 %v2359_v28, 0.0  ;;  %v5061_v29 = vpop.f32.mrb[8].mxu0  ;;  %v2944_v54 = vld [vmem:[#allocation3 + $0x38] sm:$0xff] }
 0x253   : > { %v2882_v47 = vld [vmem:[#allocation3 + $0x39] sm:$0xff]  ;;  %2481 = vst.msk [vmem:[#allocation3 + $0x69] sm:$0xff] %vm1827_vm2, %v2393_v49  ;;  %v2325_v53 = vmul.f32 %v5061_v29, %v8361_v32  ;;  %v2213_v56 = vpop.f32.mrb[9].mxu0  ;;  %v5846_v41 = vpack.i.bf16 %v2944_v54, %v2943_v52  ;;  %v2880_v59 = vld [vmem:[#allocation3 + $0x21] sm:$0xff] }
 0x254   : > { %v8404_v55 = vpack.i.bf16 %v2882_v47, %v2881_v25  ;;  %2479 = vst.msk [vmem:[#allocation3 + $0x51] sm:$0xff] %vm1827_vm2, %v2391_v9  ;;  %v2323_v5 = vmul.f32 %v8361_v32, %v2213_v56  ;;  %v5062_v36 = vpop.f32.mrb[10].mxu0  ;;  %v2913_v24 = vld [vmem:[#allocation3 + $0x32] sm:$0xff]  ;;  %v2914_v60 = vld [vmem:[#allocation3 + $0x3a] sm:$0xff]  ;;  %v8447_v62 = vpack.i.bf16 %v2880_v59, %v2879_v2  ;;  %v2912_v44 = vld [vmem:[#allocation3 + $0x22] sm:$0xff] }
 0x255   : > { %v2364_v7 = vadd.f32 %v8366_v46, %v2325_v53  ;;  %v2326_v58 = vmul.f32 %v5062_v36, %v8361_v32  ;;  %5847 = vrot.lane.b32.xlu1 %v5846_v41, %s6497_s25  ;;  %v2216_v34 = vpop.f32.mrb[11].mxu0  ;;  %v8420_v16 = vpack.i.bf16 %v2914_v60, %v2913_v24  ;;  %v2911_v20 = vld [vmem:[#allocation3 + $0x1a] sm:$0xff]  ;;  %v2530_v47 = vld [vmem:[%s6693_s19 + $0xc0] sm:$0xff]  ;;  %v2537_v2 = vld [vmem:[%s6693_s19 + $0xf8] sm:$0xff] }
 0x256   : > { %5837 = vrot.lane.b32.xlu0 %v8404_v55, %s6493_s21  ;;  %v2362_v31 = vadd.f32 %v8366_v46, %v2323_v5  ;;  %v2324_v6 = vmul.f32 %v8361_v32, %v2216_v34  ;;  %v8460_v52 = vpack.i.bf16 %v2912_v44, %v2911_v20  ;;  %v8462_v9 = vld [vmem:[#allocation3 + $0x20] sm:$0xff] }
 0x257   : > { %v2396_v39 = vmax.f32 %v2364_v7, 0.0  ;;  %v2365_v38 = vadd.f32 %v8366_v46, %v2326_v58  ;;  %v2532_v5 = vld [vmem:[%s6693_s19 + $0xd0] sm:$0xff]  ;;  %v2550_v7 = vpack.c.bf16 %v2531_v11, %v2530_v47  ;;  %v2533_v58 = vld [vmem:[%s6693_s19 + $0xd8] sm:$0xff] }
 0x258   : > { %v2394_v57 = vmax.f32 %v2362_v31, 0.0  ;;  %v2363_v42 = vadd.f32 %v8366_v46, %v2324_v6  ;;  %v2947_v26 = vld [vmem:[#allocation3 + $0x60] sm:$0xff]  ;;  %v2551_v31 = vpack.c.bf16 %v2533_v58, %v2532_v5 }
 0x259   : > { %2484 = vst.msk [vmem:[#allocation3 + $0x91] sm:$0xff] %vm1827_vm2, %v2396_v39  ;;  %v2397_v23 = vmax.f32 %v2365_v38, 0.0  ;;  %5852 = vrot.lane.b32.xlu1 %v8404_v55, %s6499_s15  ;;  %5109 = vmatprep.mubr.msk.bf16.mxu1 %vm361_vm0, %v2550_v7  ;;  %v6471_v47 = vld [vmem:[%s9669_s4 + $0x10] sm:$0xff]  }
 0x25a   : > { %5842 = vrot.lane.b32.xlu0 %v8420_v16, %s6495_s23  ;;  %2482 = vst.msk [vmem:[#allocation3 + $0x79] sm:$0xff] %vm1827_vm2, %v2394_v57  ;;  %v2395_v27 = vmax.f32 %v2363_v42, 0.0  ;;  %v5065_v33 = vpop.f32.mrb[12].mxu0  ;;  %v2948_v25 = vld [vmem:[#allocation3 + $0x68] sm:$0xff]  ;;  %5110 = vmatmul.mubr.msk.bf16.gmra.mrb[12].mxu1 %vm361_vm0, %v2551_v31 }
 0x25b   : > { %2485 = vst.msk [vmem:[#allocation3 + $0x99] sm:$0xff] %vm1827_vm2, %v2397_v23  ;;  %v2329_v35 = vmul.f32 %v5065_v33, %v8361_v32  ;;  %v2229_v40 = vpop.f32.mrb[13].mxu0  ;;  %v8483_v30 = vpack.i.bf16 %v2948_v25, %v2947_v26  ;;  %v2980_v39 = vld [vmem:[#allocation3 + $0x69] sm:$0xff]  ;;  %v2979_v57 = vld [vmem:[#allocation3 + $0x61] sm:$0xff]  ;;  %v2916_v25 = vld [vmem:[#allocation3 + $0x52] sm:$0xff] }
 0x25c   : > { %2483 = vst.msk [vmem:[#allocation3 + $0x81] sm:$0xff] %vm1827_vm2, %v2395_v27  ;;  %v2327_v48 = vmul.f32 %v8361_v32, %v2229_v40  ;;  %v5066_v0 = vpop.f32.mrb[14].mxu0  ;;  %v8495_v27 = vpack.i.bf16 %v2980_v39, %v2979_v57  ;;  %v3011_v40 = vld [vmem:[#allocation3 + $0x62] sm:$0xff] }
 0x25d   : > { %v2368_v63 = vadd.f32 %v8366_v46, %v2329_v35  ;;  %v2330_v8 = vmul.f32 %v5066_v0, %v8361_v32  ;;  %5857 = vrot.lane.b32.xlu1 %v8420_v16, %s6500_s27  ;;  %v2232_v1 = vpop.f32.mrb[15].mxu0  ;;  %v6469_v0 = vld [vmem:[%s9669_s4] sm:$0xff]  }
 0x25e   : > { %5862 = vrot.lane.b32.xlu0 %v5846_v41, %s6501_s28  ;;  %v2366_v21 = vadd.f32 %v8366_v46, %v2327_v48  ;;  %v2328_v13 = vmul.f32 %v8361_v32, %v2232_v1  ;;  %v3012_v48 = vld [vmem:[#allocation3 + $0x6a] sm:$0xff]  ;;  %v2535_v1 = vld [vmem:[%s6693_s19 + $0xe8] sm:$0xff]  ;;  %5117 = vmatprep.subr.bf16.mxu1 %v6469_v0 }
 0x25f   : > { %v2400_v51 = vmax.f32 %v2368_v63, 0.0  ;;  %v2369_v45 = vadd.f32 %v8366_v46, %v2330_v8  ;;  %v2534_v8 = vld [vmem:[%s6693_s19 + $0xe0] sm:$0xff]  ;;  %5118 = vmatpush3.bf16.msra.mxu1 %v6469_v0 }
 0x260   : > { %v2398_v4 = vmax.f32 %v2366_v21, 0.0  ;;  %v2367_v18 = vadd.f32 %v8366_v46, %v2328_v13  ;;  %v2552_v21 = vpack.c.bf16 %v2535_v1, %v2534_v8  ;;  %v2536_v13 = vld [vmem:[%s6693_s19 + $0xf0] sm:$0xff]  ;;  %5119 = vmatprep.subr.bf16.mxu1 %v6470_v10 }
 0x261   : > { %2488 = vst.msk [vmem:[#allocation3 + $0xc1] sm:$0xff] %vm1827_vm2, %v2400_v51  ;;  %v2401_v14 = vmax.f32 %v2369_v45, 0.0  ;;  %5877 = vrot.lane.b32.xlu1 %v8447_v62, %s6493_s21  ;;  %v8518_v45 = vpack.i.bf16 %v3012_v48, %v3011_v40 }
 0x262   : > { %5867 = vrot.lane.b32.xlu0 %v8404_v55, %s6502_s29  ;;  %2486 = vst.msk [vmem:[#allocation3 + $0xa9] sm:$0xff] %vm1827_vm2, %v2398_v4  ;;  %v2399_v3 = vmax.f32 %v2367_v18, 0.0  ;;  %v5069_v61 = vpop.f32.mrb[16].mxu0  ;;  %v8473_v55 = vld [vmem:[#allocation3 + $0x18] sm:$0xff]  ;;  %5113 = vmatprep.mubr.msk.bf16.mxu1 %vm361_vm0, %v2552_v21 }
 0x263   : > { %2489 = vst.msk [vmem:[#allocation3 + $0xc9] sm:$0xff] %vm1827_vm2, %v2401_v14  ;;  %v2333_v28 = vmul.f32 %v5069_v61, %v8361_v32  ;;  %v2245_v49 = vpop.f32.mrb[17].mxu0  ;;  %v5886_v60 = vpack.i.bf16 %v8462_v9, %v8473_v55  ;;  %v2884_v18 = vld [vmem:[#allocation3 + $0x51] sm:$0xff]  ;;  %5120 = vmatpush3.bf16.msra.mxu1 %v6470_v10 }
 0x264   : > { %2487 = vst.msk [vmem:[#allocation3 + $0xb1] sm:$0xff] %vm1827_vm2, %v2399_v3  ;;  %v2331_v29 = vmul.f32 %v8361_v32, %v2245_v49  ;;  %v5070_v54 = vpop.f32.mrb[18].mxu0  ;;  %v2883_v3 = vld [vmem:[#allocation3 + $0x49] sm:$0xff]  ;;  %5121 = vmatprep.subr.bf16.mxu1 %v6471_v47  ;;  %v2952_v10 = vld [vmem:[#allocation3 + $0x98] sm:$0xff] }
 0x265   : > { %v2372_v53 = vadd.f32 %v8366_v46, %v2333_v28  ;;  %v2334_v56 = vmul.f32 %v5070_v54, %v8361_v32  ;;  %5882 = vrot.lane.b32.xlu1 %v8460_v52, %s6495_s23  ;;  %v2248_v41 = vpop.f32.mrb[19].mxu0  ;;  %v8531_v49 = vpack.i.bf16 %v2884_v18, %v2883_v3  ;;  %v2915_v54 = vld [vmem:[#allocation3 + $0x4a] sm:$0xff]  ;;  %v2888_v18 = vld [vmem:[#allocation3 + $0x81] sm:$0xff] }
 0x266   : > { %5872 = vrot.lane.b32.xlu0 %v8420_v16, %s6503_s30  ;;  %v2370_v36 = vadd.f32 %v8366_v46, %v2331_v29  ;;  %v2332_v24 = vmul.f32 %v8361_v32, %v2248_v41  ;;  %v8550_v26 = vpack.i.bf16 %v2916_v25, %v2915_v54  ;;  %v2920_v3 = vld [vmem:[#allocation3 + $0x82] sm:$0xff]  ;;  %v2511_v54 = vld [vmem:[%s6693_s19 + $0x28] sm:$0xff] }
 0x267   : > { %v2404_v34 = vmax.f32 %v2372_v53, 0.0  ;;  %v2373_v19 = vadd.f32 %v8366_v46, %v2334_v56  ;;  %5122 = vmatpush3.bf16.msra.mxu1 %v6471_v47  ;;  %v2512_v47 = vld [vmem:[%s6693_s19 + $0x30] sm:$0xff] }
 0x268   : > { %v2402_v6 = vmax.f32 %v2370_v36, 0.0  ;;  %v2371_v43 = vadd.f32 %v8366_v46, %v2332_v24  ;;  %v6472_v36 = vld [vmem:[%s9669_s4 + $0x18] sm:$0xff]  }
 0x269   : > { %2492 = vst.msk [vmem:[#allocation3 + $0xf1] sm:$0xff] %vm1827_vm2, %v2404_v34  ;;  %v2405_v38 = vmax.f32 %v2373_v19, 0.0  ;;  %5912 = vrot.lane.b32.xlu1 %v8483_v30, %s6497_s25  ;;  %v8553_v34 = vld [vmem:[#allocation3 + $0x50] sm:$0xff]  ;;  %5123 = vmatprep.subr.bf16.mxu1 %v6472_v36 }
 0x26a   : > { %5887 = vrot.lane.b32.xlu0 %v5886_v60, %s6497_s25  ;;  %2490 = vst.msk [vmem:[#allocation3 + $0xd9] sm:$0xff] %vm1827_vm2, %v2402_v6  ;;  %v2403_v16 = vmax.f32 %v2371_v43, 0.0  ;;  %v5073_v50 = vpop.f32.mrb[20].mxu0  ;;  %v8561_v43 = vld [vmem:[#allocation3 + $0x48] sm:$0xff] }
 0x26b   : > { %2493 = vst.msk [vmem:[#allocation3 + $0xf9] sm:$0xff] %vm1827_vm2, %v2405_v38  ;;  %v2337_v42 = vmul.f32 %v5073_v50, %v8361_v32  ;;  %v2261_v23 = vpop.f32.mrb[21].mxu0  ;;  %5124 = vmatpush3.bf16.msra.mxu1 %v6472_v36  ;;  %v2988_v36 = vld [vmem:[#allocation3 + $0xc9] sm:$0xff] }
 0x26c   : > { %2491 = vst.msk [vmem:[#allocation3 + $0xe1] sm:$0xff] %vm1827_vm2, %v2403_v16  ;;  %v2335_v33 = vmul.f32 %v8361_v32, %v2261_v23  ;;  %v5074_v35 = vpop.f32.mrb[22].mxu0  ;;  %v5956_v16 = vpack.i.bf16 %v8553_v34, %v8561_v43  ;;  %v2506_v23 = vld [vmem:[%s6693_s19] sm:$0xff] }
 0x26d   : > { %v2376_v59 = vadd.f32 %v8366_v46, %v2337_v42  ;;  %v2338_v17 = vmul.f32 %v5074_v35, %v8361_v32  ;;  %5917 = vrot.lane.b32.xlu1 %v8495_v27, %s6499_s15  ;;  %v2264_v63 = vpop.f32.mrb[23].mxu0  ;;  %v6473_v42 = vld [vmem:[%s9669_s4 + $0x20] ss:$0 sps:$4 sm:$0xff]  }
 0x26e   : > { %5892 = vrot.lane.b32.xlu0 %v8447_v62, %s6499_s15  ;;  %v2374_v37 = vadd.f32 %v8366_v46, %v2335_v33  ;;  %v2336_v12 = vmul.f32 %v8361_v32, %v2264_v63  ;;  %v2553_v62 = vpack.c.bf16 %v2537_v2, %v2536_v13  ;;  %v2507_v33 = vld [vmem:[%s6693_s19 + $0x8] sm:$0xff]  ;;  %5164 = vmatprep.subr.msk.bf16.mxu1 %vm4519_vm12, %v6473_v42  ;;  %v4521_v1 = vsel %vm4519_vm12, %v6473_v42, 0 }
 0x26f   : > { %v2408_v22 = vmax.f32 %v2376_v59, 0.0  ;;  %v2377_v51 = vadd.f32 %v8366_v46, %v2338_v17  ;;  %v2538_v0 = vpack.c.bf16 %v2507_v33, %v2506_v23  ;;  %v2508_v59 = vld [vmem:[%s6693_s19 + $0x10] sm:$0xff]  ;;  %v2509_v17 = vld [vmem:[%s6693_s19 + $0x18] sm:$0xff]  ;;  %5126 = vmatpush3.bf16.msra.mxu1 %v4521_v1  ;;  %v8641_v23 = vpop.permute.xlu0 %5827  ;;  %v2514_v33 = vld [vmem:[%s6693_s19 + $0x40] sm:$0xff] }
 0x270   : > { %v2406_v15 = vmax.f32 %v2374_v37, 0.0  ;;  %v2375_v4 = vadd.f32 %v8366_v46, %v2336_v12  ;;  %5114 = vmatmul.mubr.msk.bf16.gmra.mrb[16].mxu1 %vm361_vm0, %v2553_v62  ;;  %v2539_v37 = vpack.c.bf16 %v2509_v17, %v2508_v59 }
 0x271   : > { %2496 = vst.msk [vmem:[#allocation3 + $0x121] sm:$0xff] %vm1827_vm2, %v2408_v22  ;;  %v2409_v20 = vmax.f32 %v2377_v51, 0.0  ;;  %5922 = vrot.lane.b32.xlu1 %v8518_v45, %s6500_s27  ;;  %5085 = vmatprep.mubr.msk.bf16.mxu0 %vm361_vm0, %v2538_v0  ;;  %v2983_v51 = vld [vmem:[#allocation3 + $0x91] sm:$0xff]  ;;  %v2517_v0 = vld [vmem:[%s6693_s19 + $0x58] sm:$0xff] }
 0x272   : > { %5897 = vrot.lane.b32.xlu0 %v8460_v52, %s6500_s27  ;;  %2494 = vst.msk [vmem:[#allocation3 + $0x109] sm:$0xff] %vm1827_vm2, %v2406_v15  ;;  %v2407_v44 = vmax.f32 %v2375_v4, 0.0  ;;  %v5077_v14 = vpop.f32.mrb[24].mxu0  ;;  %5086 = vmatmul.mubr.msk.bf16.vlgmr.msra.gmra.mrb[32].mxu0 %vm361_vm0, %v2539_v37  ;;  %v3015_v15 = vld [vmem:[#allocation3 + $0x92] sm:$0xff]  ;;  %v3016_v4 = vld [vmem:[#allocation3 + $0x9a] sm:$0xff] }
 0x273   : > { %2497 = vst.msk [vmem:[#allocation3 + $0x129] sm:$0xff] %vm1827_vm2, %v2409_v20  ;;  %v2341_v61 = vmul.f32 %v5077_v14, %v8361_v32  ;;  %v2277_v28 = vpop.f32.mrb[25].mxu0  ;;  %v2887_v20 = vld [vmem:[#allocation3 + $0x79] sm:$0xff]  ;;  %v8652_v17 = vpop.permute.xlu0 %5832 }
 0x274   : > { %2495 = vst.msk [vmem:[#allocation3 + $0x111] sm:$0xff] %vm1827_vm2, %v2407_v44  ;;  %v2339_v52 = vmul.f32 %v8361_v32, %v2277_v28  ;;  %v5078_v29 = vpop.f32.mrb[26].mxu0  ;;  %v6021_v44 = vpack.i.bf16 %v2888_v18, %v2887_v20  ;;  %v2919_v14 = vld [vmem:[#allocation3 + $0x7a] sm:$0xff] }
 0x275   : > { %v2380_v53 = vadd.f32 %v8366_v46, %v2341_v61  ;;  %v2342_v56 = vmul.f32 %v5078_v29, %v8361_v32  ;;  %5942 = vrot.lane.b32.xlu1 %v8531_v49, %s6493_s21  ;;  %v2280_v41 = vpop.f32.mrb[27].mxu0  ;;  %v6026_v61 = vpack.i.bf16 %v2920_v3, %v2919_v14  ;;  %v8611_v28 = vld [vmem:[#allocation3 + $0x80] sm:$0xff]  ;;  %v2510_v29 = vld [vmem:[%s6693_s19 + $0x20] sm:$0xff] }
 0x276   : > { %5902 = vrot.lane.b32.xlu0 %v8495_v27, %s6493_s21  ;;  %v2378_v11 = vadd.f32 %v8366_v46, %v2339_v52  ;;  %v2340_v5 = vmul.f32 %v8361_v32, %v2280_v41  ;;  %v2540_v25 = vpack.c.bf16 %v2511_v54, %v2510_v29  ;;  %v2956_v41 = vld [vmem:[#allocation3 + $0xc8] sm:$0xff]  ;;  %v2929_v3 = vld [vmem:[#allocation3 + $0xf2] sm:$0xff] }
 0x277   : > { %v2412_v24 = vmax.f32 %v2380_v53, 0.0  ;;  %v2381_v60 = vadd.f32 %v8366_v46, %v2342_v56  ;;  %v2513_v53 = vld [vmem:[%s6693_s19 + $0x38] sm:$0xff] }
 0x278   : > { %v2410_v7 = vmax.f32 %v2378_v11, 0.0  ;;  %v2379_v58 = vadd.f32 %v8366_v46, %v2340_v5  ;;  %v2541_v56 = vpack.c.bf16 %v2513_v53, %v2512_v47  ;;  %5089 = vmatprep.mubr.msk.bf16.mxu0 %vm361_vm0, %v2540_v25  ;;  %v2955_v11 = vld [vmem:[#allocation3 + $0xc0] sm:$0xff]  ;;  %v5830_v47 = vunpack.i.h.bf16 %v8641_v23 }
 0x279   : > { %2500 = vst.msk [vmem:[#allocation3 + $0x151] sm:$0xff] %vm1827_vm2, %v2412_v24  ;;  %v2413_v19 = vmax.f32 %v2381_v60, 0.0  ;;  %5947 = vrot.lane.b32.xlu1 %v8550_v26, %s6495_s23  ;;  %v6071_v5 = vpack.i.bf16 %v2956_v41, %v2955_v11  ;;  %v2987_v24 = vld [vmem:[#allocation3 + $0xc1] sm:$0xff]  ;;  %v5829_v53 = vunpack.i.l.bf16 %v8641_v23 }
 0x27a   : > { %5907 = vrot.lane.b32.xlu0 %v8518_v45, %s6495_s23  ;;  %2498 = vst.msk [vmem:[#allocation3 + $0x139] sm:$0xff] %vm1827_vm2, %v2410_v7  ;;  %v2411_v31 = vmax.f32 %v2379_v58, 0.0  ;;  %v5081_v6 = vpop.f32.mrb[28].mxu0  ;;  %5090 = vmatmul.mubr.msk.bf16.gmra.mrb[36].mxu0 %vm361_vm0, %v2541_v56  ;;  %v6076_v60 = vpack.i.bf16 %v2988_v36, %v2987_v24  ;;  %v3020_v7 = vld [vmem:[#allocation3 + $0xca] sm:$0xff]  ;;  %v2845_v25 = vld [vmem:[#allocation3] sm:$0xff]  ;;  %v5835_v24 = vunpack.i.h.bf16 %v8652_v17 }
 0x27b   : > { %2501 = vst.msk [vmem:[#allocation3 + $0x159] sm:$0xff] %vm1827_vm2, %v2413_v19  ;;  %v2345_v39 = vmul.f32 %v5081_v6, %v8361_v32  ;;  %v2293_v38 = vpop.f32.mrb[29].mxu0  ;;  %v2892_v19 = vld [vmem:[#allocation3 + $0xb1] sm:$0xff]  ;;  %v2846_v11 = vld [vmem:[#allocation3 + $0x8] sm:$0xff] }
 0x27c   : > { %2499 = vst.msk [vmem:[#allocation3 + $0x141] sm:$0xff] %vm1827_vm2, %v2411_v31  ;;  %v2343_v50 = vmul.f32 %v8361_v32, %v2293_v38  ;;  %v5082_v57 = vpop.f32.mrb[30].mxu0  ;;  %v2891_v31 = vld [vmem:[#allocation3 + $0xa9] sm:$0xff]  ;;  %v2924_v38 = vld [vmem:[#allocation3 + $0xb2] sm:$0xff] }
 0x27d   : > { %v2384_v35 = vadd.f32 %v8366_v46, %v2345_v39  ;;  %v2346_v40 = vmul.f32 %v5082_v57, %v8361_v32  ;;  %5957 = vrot.lane.b32.xlu1 %v5956_v16, %s6501_s28  ;;  %v2296_v48 = vpop.f32.mrb[31].mxu0  ;;  %v6101_v6 = vpack.i.bf16 %v2892_v19, %v2891_v31  ;;  %v2923_v39 = vld [vmem:[#allocation3 + $0xaa] sm:$0xff]  ;;  %v4158_v19 = vsel %vm1827_vm2, %v2845_v25, %v5829_v53 }
 0x27e   : > { %5927 = vrot.lane.b32.xlu0 %v8483_v30, %s6501_s28  ;;  %v2382_v63 = vadd.f32 %v8366_v46, %v2343_v50  ;;  %v2344_v8 = vmul.f32 %v8361_v32, %v2296_v48  ;;  %v3049_v50 = vld [vmem:[#allocation3 + $0xb0] sm:$0xff]  ;;  %v3048_v57 = vld [vmem:[#allocation3 + $0xa8] sm:$0xff]  ;;  %v2516_v48 = vld [vmem:[%s6693_s19 + $0x50] sm:$0xff] }
 0x27f   : > { %v2416_v12 = vmax.f32 %v2384_v35, 0.0  ;;  %v2385_v21 = vadd.f32 %v8366_v46, %v2346_v40  ;;  %v6116_v42 = vpack.i.bf16 %v3049_v50, %v3048_v57  ;;  %v2515_v35 = vld [vmem:[%s6693_s19 + $0x48] sm:$0xff]  ;;  %v2543_v59 = vpack.c.bf16 %v2517_v0, %v2516_v48  ;;  %v2931_v23 = vld [vmem:[#allocation3 + $0x10a] sm:$0xff] }
 0x280   : > { %v2414_v30 = vmax.f32 %v2382_v63, 0.0  ;;  %v2383_v13 = vadd.f32 %v8366_v46, %v2344_v8  ;;  %v2951_v46 = vld [vmem:[#allocation3 + $0x90] sm:$0xff]  ;;  %v2542_v40 = vpack.c.bf16 %v2515_v35, %v2514_v33  ;;  %v2960_v63 = vld [vmem:[#allocation3 + $0xf8] sm:$0xff] }
 0x281   : > { %2504 = vst.msk [vmem:[#allocation3 + $0x181] sm:$0xff] %vm1827_vm2, %v2416_v12  ;;  %v2417_v2 = vmax.f32 %v2385_v21, 0.0  ;;  %5962 = vrot.lane.b32.xlu1 %v8531_v49, %s6502_s29  ;;  %v5991_v22 = vpack.i.bf16 %v2952_v10, %v2951_v46  ;;  %v2959_v8 = vld [vmem:[#allocation3 + $0xf0] sm:$0xff]  ;;  %v2896_v21 = vld [vmem:[#allocation3 + $0xe1] sm:$0xff] }
 0x282   : > { %5932 = vrot.lane.b32.xlu0 %v8495_v27, %s6502_s29  ;;  %2502 = vst.msk [vmem:[#allocation3 + $0x169] sm:$0xff] %vm1827_vm2, %v2414_v30  ;;  %v2415_v32 = vmax.f32 %v2383_v13, 0.0  ;;  %v2984_v27 = vld [vmem:[#allocation3 + $0x99] sm:$0xff]  ;;  %5093 = vmatprep.mubr.msk.bf16.mxu0 %vm361_vm0, %v2542_v40  ;;  %v8661_v12 = vpack.i.bf16 %v2960_v63, %v2959_v8  ;;  %v2928_v46 = vld [vmem:[#allocation3 + $0xe2] sm:$0xff]  ;;  %v2900_v36 = vld [vmem:[#allocation3 + $0x111] sm:$0xff] }
 0x283   : > { %2505 = vst.msk [vmem:[#allocation3 + $0x189] sm:$0xff] %vm1827_vm2, %v2417_v2  ;;  %v5996_v62 = vpack.i.bf16 %v2984_v27, %v2983_v51  ;;  %5094 = vmatmul.mubr.msk.bf16.gmra.mrb[40].mxu0 %vm361_vm0, %v2543_v59  ;;  %v2895_v30 = vld [vmem:[#allocation3 + $0xd9] sm:$0xff]  ;;  %vm4385_vm0 = vcmask 523264  }
 0x284   : > { %2503 = vst.msk [vmem:[#allocation3 + $0x171] sm:$0xff] %vm1827_vm2, %v2415_v32  ;;  %v8670_v32 = vpack.i.bf16 %v2896_v21, %v2895_v30  ;;  %v2927_v10 = vld [vmem:[#allocation3 + $0xda] sm:$0xff]  ;;  %v2932_v33 = vld [vmem:[#allocation3 + $0x112] sm:$0xff] }
 0x285   : > { %5967 = vrot.lane.b32.xlu1 %v8550_v26, %s6503_s30  ;;  %v8679_v51 = vpack.i.bf16 %v2928_v46, %v2927_v10  ;;  %v8730_v8 = vpack.i.bf16 %v2932_v33, %v2931_v23  ;;  %v2906_v21 = vld [vmem:[#allocation3 + $0x159] sm:$0xff]  ;;  %v2904_v33 = vld [vmem:[#allocation3 + $0x141] sm:$0xff] }
 0x286   : > { %5937 = vrot.lane.b32.xlu0 %v8518_v45, %s6503_s30  ;;  %v6001_v45 = vpack.i.bf16 %v3016_v4, %v3015_v15  ;;  %v3053_v15 = vld [vmem:[#allocation3 + $0xe0] sm:$0xff]  ;;  %v2897_v4 = vld [vmem:[#allocation3 + $0xf1] sm:$0xff] }
 0x289   : > { %5992 = vrot.lane.b32.xlu1 %v5991_v22, %s6497_s25 }
 0x28a   : > { %5952 = vrot.lane.b32.xlu0 %v5956_v16, %s6497_s25  ;;  %v6106_v16 = vpack.i.bf16 %v2924_v38, %v2923_v39 }
 0x28d   : > { %5997 = vrot.lane.b32.xlu1 %v5996_v62, %s6499_s15 }
 0x28e   : > { %5972 = vrot.lane.b32.xlu0 %v8531_v49, %s6499_s15  ;;  %v8615_v49 = vld [vmem:[#allocation3 + $0x78] sm:$0xff] }
 0x28f   : > { %v6036_v52 = vpack.i.bf16 %v8611_v28, %v8615_v49 }
 0x291   : > { %6002 = vrot.lane.b32.xlu1 %v6001_v45, %s6500_s27 }
 0x292   : > { %5977 = vrot.lane.b32.xlu0 %v8550_v26, %s6500_s27  ;;  %v3019_v26 = vld [vmem:[#allocation3 + $0xc2] sm:$0xff] }
 0x293   : > { %v6081_v58 = vpack.i.bf16 %v3020_v7, %v3019_v26  ;;  %v2901_v26 = vld [vmem:[#allocation3 + $0x121] sm:$0xff]  ;;  %v2899_v7 = vld [vmem:[#allocation3 + $0x109] sm:$0xff] }
 0x294   : > { %v8718_v38 = vpack.i.bf16 %v2900_v36, %v2899_v7  ;;  %v2938_v7 = vld [vmem:[#allocation3 + $0x15a] sm:$0xff] }
 0x295   : > { %6022 = vrot.lane.b32.xlu1 %v6021_v44, %s6493_s21 }
 0x296   : > { %5982 = vrot.lane.b32.xlu0 %v5996_v62, %s6493_s21 }
 0x299   : > { %6027 = vrot.lane.b32.xlu1 %v6026_v61, %s6495_s23 }
 0x29a   : > { %5987 = vrot.lane.b32.xlu0 %v6001_v45, %s6495_s23 }
 0x29d   : > { %6037 = vrot.lane.b32.xlu1 %v6036_v52, %s6501_s28 }
 0x29e   : > { %6007 = vrot.lane.b32.xlu0 %v5991_v22, %s6501_s28 }
 0x2a1   : > { %6042 = vrot.lane.b32.xlu1 %v6021_v44, %s6502_s29 }
 0x2a2   : > { %6012 = vrot.lane.b32.xlu0 %v5996_v62, %s6502_s29  ;;  %v2898_v62 = vld [vmem:[#allocation3 + $0xf9] sm:$0xff] }
 0x2a5   : > { %6047 = vrot.lane.b32.xlu1 %v6026_v61, %s6503_s30 }
 0x2a6   : > { %6017 = vrot.lane.b32.xlu0 %v6001_v45, %s6503_s30  ;;  %v3052_v45 = vld [vmem:[#allocation3 + $0xd8] sm:$0xff] }
 0x2a7   : > { %v6171_v14 = vpack.i.bf16 %v3053_v15, %v3052_v45 }
 0x2a9   : > { %6072 = vrot.lane.b32.xlu1 %v6071_v5, %s6497_s25 }
 0x2aa   : > { %6032 = vrot.lane.b32.xlu0 %v6036_v52, %s6497_s25 }
 0x2ad   : > { %6077 = vrot.lane.b32.xlu1 %v6076_v60, %s6499_s15 }
 0x2ae   : > { %6052 = vrot.lane.b32.xlu0 %v6021_v44, %s6499_s15  ;;  %v8688_v44 = vpack.i.bf16 %v2898_v62, %v2897_v4 }
 0x2b1   : > { %6082 = vrot.lane.b32.xlu1 %v6081_v58, %s6500_s27 }
 0x2b2   : > { %6057 = vrot.lane.b32.xlu0 %v6026_v61, %s6500_s27  ;;  %v2930_v61 = vld [vmem:[#allocation3 + $0xfa] sm:$0xff] }
 0x2b3   : > { %v8697_v54 = vpack.i.bf16 %v2930_v61, %v2929_v3  ;;  %v2905_v3 = vld [vmem:[#allocation3 + $0x151] sm:$0xff] }
 0x2b5   : > { %6102 = vrot.lane.b32.xlu1 %v6101_v6, %s6493_s21 }
 0x2b6   : > { %6062 = vrot.lane.b32.xlu0 %v6076_v60, %s6493_s21 }
 0x2b9   : > { %6107 = vrot.lane.b32.xlu1 %v6106_v16, %s6495_s23 }
 0x2ba   : > { %6067 = vrot.lane.b32.xlu0 %v6081_v58, %s6495_s23 }
 0x2bd   : > { %6117 = vrot.lane.b32.xlu1 %v6116_v42, %s6501_s28 }
 0x2be   : > { %6087 = vrot.lane.b32.xlu0 %v6071_v5, %s6501_s28  ;;  %v2902_v5 = vld [vmem:[#allocation3 + $0x129] sm:$0xff] }
 0x2bf   : > { %v8716_v39 = vpack.i.bf16 %v2902_v5, %v2901_v26  ;;  %v2937_v26 = vld [vmem:[#allocation3 + $0x152] sm:$0xff] }
 0x2c0   : > { %v8772_v23 = vpack.i.bf16 %v2938_v7, %v2937_v26 }
 0x2c1   : > { %6122 = vrot.lane.b32.xlu1 %v6101_v6, %s6502_s29 }
 0x2c2   : > { %6092 = vrot.lane.b32.xlu0 %v6076_v60, %s6502_s29  ;;  %v5834_v60 = vunpack.i.l.bf16 %v8652_v17 }
 0x2c4   : > { %v4190_v48 = vsel %vm1893_vm5, %v4158_v19, %v5834_v60 }
 0x2c5   : > { %6127 = vrot.lane.b32.xlu1 %v6106_v16, %s6503_s30 }
 0x2c6   : > { %6097 = vrot.lane.b32.xlu0 %v6081_v58, %s6503_s30  ;;  %v4159_v58 = vsel %vm1827_vm2, %v2846_v11, %v5830_v47  ;;  %v8744_v47 = vpack.i.bf16 %v2906_v21, %v2905_v3 }
 0x2c7   : > { %v8657_v1 = vpop.permute.xlu1 %5847  ;;  %v4191_v0 = vsel %vm1893_vm5, %v4159_v58, %v5835_v24 }
 0x2c8   : > { %v8659_v37 = vpop.permute.xlu0 %5837  ;;  %v5850_v21 = vunpack.i.h.bf16 %v8657_v1 }
 0x2c9   : > { %6152 = vrot.lane.b32.xlu1 %v8661_v12, %s6497_s25 }
 0x2ca   : > { %6112 = vrot.lane.b32.xlu0 %v6116_v42, %s6497_s25  ;;  %v2934_v42 = vld [vmem:[#allocation3 + $0x12a] sm:$0xff] }
 0x2cb   : > { %v8666_v13 = vpop.permute.xlu1 %5852 }
 0x2cc   : > { %v8668_v2 = vpop.permute.xlu0 %5842 }
 0x2cd   : > { %6157 = vrot.lane.b32.xlu1 %v8670_v32, %s6493_s21 }
 0x2ce   : > { %6132 = vrot.lane.b32.xlu0 %v6101_v6, %s6499_s15 }
 0x2cf   : > { %v8675_v22 = vpop.permute.xlu1 %5857 }
 0x2d0   : > { %v8677_v27 = vpop.permute.xlu0 %5862 }
 0x2d1   : > { %6162 = vrot.lane.b32.xlu1 %v8679_v51, %s6495_s23  ;;  %v5865_v15 = vunpack.i.h.bf16 %v8677_v27  ;;  %v5864_v4 = vunpack.i.l.bf16 %v8677_v27 }
 0x2d2   : > { %6137 = vrot.lane.b32.xlu0 %v6106_v16, %s6500_s27  ;;  %v2933_v16 = vld [vmem:[#allocation3 + $0x122] sm:$0xff] }
 0x2d3   : > { %v8686_v20 = vpop.permute.xlu1 %5877  ;;  %v8728_v63 = vpack.i.bf16 %v2934_v42, %v2933_v16 }
 0x2d4   : > { %v8684_v18 = vpop.permute.xlu0 %5867  ;;  %v5880_v24 = vunpack.i.h.bf16 %v8686_v20  ;;  %v5879_v60 = vunpack.i.l.bf16 %v8686_v20 }
 0x2d5   : > { %6172 = vrot.lane.b32.xlu1 %v6171_v14, %s6501_s28  ;;  %v5870_v27 = vunpack.i.h.bf16 %v8684_v18  ;;  %v5869_v53 = vunpack.i.l.bf16 %v8684_v18 }
 0x2d6   : > { %6142 = vrot.lane.b32.xlu0 %v8688_v44, %s6493_s21 }
 0x2d7   : > { %v8695_v29 = vpop.permute.xlu1 %5882 }
 0x2d8   : > { %v8693_v52 = vpop.permute.xlu0 %5872  ;;  %v5885_v16 = vunpack.i.h.bf16 %v8695_v29  ;;  %v5884_v20 = vunpack.i.l.bf16 %v8695_v29 }
 0x2d9   : > { %6177 = vrot.lane.b32.xlu1 %v8670_v32, %s6502_s29  ;;  %v5875_v58 = vunpack.i.h.bf16 %v8693_v52  ;;  %v5874_v19 = vunpack.i.l.bf16 %v8693_v52 }
 0x2da   : > { %6147 = vrot.lane.b32.xlu0 %v8697_v54, %s6495_s23 }
 0x2db   : > { %v8705_v41 = vpop.permute.xlu1 %5912 }
 0x2dc   : > { %v5888_v56 = vpop.permute.xlu0 %5887 }
 0x2dd   : > { %6182 = vrot.lane.b32.xlu1 %v8679_v51, %s6503_s30  ;;  %v5890_v50 = vunpack.i.h.bf16 %v5888_v56  ;;  %v5889_v57 = vunpack.i.l.bf16 %v5888_v56 }
 0x2de   : > { %6167 = vrot.lane.b32.xlu0 %v6171_v14, %s6497_s25 }
 0x2df   : > { %v8714_v6 = vpop.permute.xlu1 %5917  ;;  %v4223_v30 = vsel %vm1959_vm7, %v4191_v0, %v5890_v50  ;;  %v4222_v10 = vsel %vm1959_vm7, %v4190_v48, %v5889_v57 }
 0x2e0   : > { %v5893_v31 = vpop.permute.xlu0 %5892 }
 0x2e1   : > { %v5895_v35 = vunpack.i.h.bf16 %v5893_v31  ;;  %v5894_v40 = vunpack.i.l.bf16 %v5893_v31  ;;  %6197 = vrot.lane.b32.xlu1 %v8718_v38, %s6493_s21 }
 0x2e2   : > { %6187 = vrot.lane.b32.xlu0 %v8716_v39, %s6493_s21 }
 0x2e3   : > { %v8726_v17 = vpop.permute.xlu1 %5922  ;;  %v4254_v45 = vsel %vm2025_vm9, %v4222_v10, %v5894_v40  ;;  %v4255_v14 = vsel %vm2025_vm9, %v4223_v30, %v5895_v35  ;;  %v4160_v35 = vsel %vm1827_vm2, %v8473_v55, %v5879_v60  ;;  %v4161_v40 = vsel %vm1827_vm2, %v8462_v9, %v5880_v24 }
 0x2e4   : > { %v5898_v59 = vpop.permute.xlu0 %5897  ;;  %v4192_v29 = vsel %vm1893_vm5, %v4160_v35, %v5884_v20  ;;  %v4193_v0 = vsel %vm1893_vm5, %v4161_v40, %v5885_v16  ;;  %v5849_v30 = vunpack.i.l.bf16 %v8657_v1  ;;  %v5855_v1 = vunpack.i.h.bf16 %v8666_v13  ;;  %v2940_v35 = vld [vmem:[#allocation3 + $0x172] sm:$0xff] }
 0x2e5   : > { %v5900_v46 = vunpack.i.h.bf16 %v5898_v59  ;;  %v5899_v62 = vunpack.i.l.bf16 %v5898_v59  ;;  %6202 = vrot.lane.b32.xlu1 %v8730_v8, %s6495_s23  ;;  %v2903_v59 = vld [vmem:[#allocation3 + $0x139] sm:$0xff]  ;;  %v5859_v24 = vunpack.i.l.bf16 %v8675_v22 }
 0x2e6   : > { %6192 = vrot.lane.b32.xlu0 %v8728_v63, %s6495_s23  ;;  %v8789_v10 = vpack.i.bf16 %v2904_v33, %v2903_v59  ;;  %v2939_v33 = vld [vmem:[#allocation3 + $0x16a] sm:$0xff] }
 0x2e7   : > { %v4287_v61 = vsel %vm4286_vm13, %v4254_v45, %v5899_v62  ;;  %v4288_v25 = vsel %vm4286_vm13, %v4255_v14, %v5900_v46  ;;  %v8752_v36 = vpop.permute.xlu1 %5942  ;;  %v2935_v46 = vld [vmem:[#allocation3 + $0x13a] sm:$0xff]  ;;  %v2936_v62 = vld [vmem:[#allocation3 + $0x142] sm:$0xff]  ;;  %v5854_v45 = vunpack.i.l.bf16 %v8666_v13 }
 0x2e8   : > { %v4320_v56 = vsel %vm4319_vm14, %v4287_v61, %v5864_v4  ;;  %v4321_v11 = vsel %vm4319_vm14, %v4288_v25, %v5865_v15  ;;  %v8750_v5 = vpop.permute.xlu0 %5902  ;;  %v4224_v15 = vsel %vm1959_vm7, %v4192_v29, %v5849_v30  ;;  %v4225_v4 = vsel %vm1959_vm7, %v4193_v0, %v5850_v21  ;;  %v2907_v13 = vld [vmem:[#allocation3 + $0x169] sm:$0xff] }
 0x2e9   : > { %6222 = vrot.lane.b32.xlu1 %v8688_v44, %s6499_s15  ;;  %v4353_v18 = vsel %vm4352_vm15, %v4320_v56, %v5869_v53  ;;  %v4354_v31 = vsel %vm4352_vm15, %v4321_v11, %v5870_v27  ;;  %v8801_v61 = vpack.i.bf16 %v2936_v62, %v2935_v46  ;;  %v4256_v25 = vsel %vm2025_vm9, %v4224_v15, %v5854_v45  ;;  %v2908_v11 = vld [vmem:[#allocation3 + $0x171] sm:$0xff] }
 0x2ea   : > { %6207 = vrot.lane.b32.xlu0 %v8744_v47, %s6493_s21  ;;  %v4386_v52 = vsel %vm4385_vm0, %v4353_v18, %v5874_v19  ;;  %v4387_v42 = vsel %vm4385_vm0, %v4354_v31, %v5875_v58  ;;  %v4257_v27 = vsel %vm2025_vm9, %v4225_v4, %v5855_v1  ;;  %v4289_v7 = vsel %vm4286_vm13, %v4256_v25, %v5859_v24  ;;  %v3056_v1 = vld [vmem:[#allocation3 + $0x108] sm:$0xff] }
 0x2eb   : > { %v8768_v57 = vpop.permute.xlu1 %5947  ;;  %v4418_v48 = vpack.c.bf16 %v4387_v42, %v4386_v52  ;;  %v8815_v31 = vpack.i.bf16 %v2908_v11, %v2907_v13  ;;  %v8829_v21 = vpack.i.bf16 %v2940_v35, %v2939_v33  ;;  %v5840_v30 = vunpack.i.h.bf16 %v8659_v37 }
 0x2ec   : > { %v8766_v50 = vpop.permute.xlu0 %5907  ;;  %v5845_v46 = vunpack.i.h.bf16 %v8668_v2  ;;  %v5844_v62 = vunpack.i.l.bf16 %v8668_v2 }
 0x2ed   : > { %6232 = vrot.lane.b32.xlu1 %v8697_v54, %s6500_s27  ;;  %5127 = vmatprep.mubr.msk.bf16.mxu1 %vm4470_vm1, %v4418_v48 }
 0x2ee   : > { %6212 = vrot.lane.b32.xlu0 %v8772_v23, %s6495_s23 }
 0x2ef   : > { %v5958_v9 = vpop.permute.xlu1 %5957 }
 0x2f0   : > { %v8787_v55 = vpop.permute.xlu0 %5927  ;;  %v5960_v53 = vunpack.i.h.bf16 %v5958_v9  ;;  %v5959_v56 = vunpack.i.l.bf16 %v5958_v9  ;;  %v5839_v9 = vunpack.i.l.bf16 %v8659_v37  ;;  %v6474_v37 = vld [vmem:[#allocation3 + $0x30] sm:$0xff] }
 0x2f1   : > { %6242 = vrot.lane.b32.xlu1 %v8789_v10, %s6493_s21 }
 0x2f2   : > { %6217 = vrot.lane.b32.xlu0 %v8670_v32, %s6499_s15  ;;  %v5860_v32 = vunpack.i.h.bf16 %v8675_v22  ;;  %v4322_v16 = vsel %vm4319_vm14, %v4289_v7, %v5959_v56  ;;  %v6475_v56 = vld [vmem:[#allocation3 + $0x38] sm:$0xff] }
 0x2f3   : > { %v5963_v3 = vpop.permute.xlu1 %5962  ;;  %v4163_v11 = vsel %vm1827_vm2, %v6475_v56, %v5840_v30 }
 0x2f4   : > { %v8799_v14 = vpop.permute.xlu0 %5932  ;;  %v5965_v60 = vunpack.i.h.bf16 %v5963_v3  ;;  %v5964_v26 = vunpack.i.l.bf16 %v5963_v3  ;;  %v4290_v58 = vsel %vm4286_vm13, %v4257_v27, %v5860_v32  ;;  %v4195_v32 = vsel %vm1893_vm5, %v4163_v11, %v5845_v46 }
 0x2f5   : > { %6247 = vrot.lane.b32.xlu1 %v8801_v61, %s6495_s23  ;;  %v4323_v22 = vsel %vm4319_vm14, %v4290_v58, %v5960_v53  ;;  %v4162_v53 = vsel %vm1827_vm2, %v6474_v37, %v5839_v9  ;;  %v5930_v58 = vunpack.i.h.bf16 %v8787_v55  ;;  %v8878_v9 = vld [vmem:[#allocation3 + $0x128] sm:$0xff]  ;;  %v5950_v46 = vunpack.i.h.bf16 %v8768_v57 }
 0x2f6   : > { %6227 = vrot.lane.b32.xlu0 %v8679_v51, %s6500_s27  ;;  %v4355_v51 = vsel %vm4352_vm15, %v4322_v16, %v5964_v26  ;;  %v4356_v42 = vsel %vm4352_vm15, %v4323_v22, %v5965_v60  ;;  %v4194_v2 = vsel %vm1893_vm5, %v4162_v53, %v5844_v62  ;;  %v5949_v62 = vunpack.i.l.bf16 %v8768_v57 }
 0x2f7   : > { %v5968_v18 = vpop.permute.xlu1 %5967  ;;  %v5915_v37 = vunpack.i.h.bf16 %v8705_v41  ;;  %v5914_v53 = vunpack.i.l.bf16 %v8705_v41 }
 0x2f8   : > { %v8813_v19 = vpop.permute.xlu0 %5937  ;;  %v5970_v20 = vunpack.i.h.bf16 %v5968_v18  ;;  %v5969_v52 = vunpack.i.l.bf16 %v5968_v18  ;;  %v5929_v18 = vunpack.i.l.bf16 %v8787_v55 }
 0x2f9   : > { %6252 = vrot.lane.b32.xlu1 %v8815_v31, %s6493_s21 }
 0x2fa   : > { %6237 = vrot.lane.b32.xlu0 %v8661_v12, %s6501_s28  ;;  %v4388_v40 = vsel %vm4385_vm0, %v4355_v51, %v5969_v52  ;;  %v4389_v48 = vsel %vm4385_vm0, %v4356_v42, %v5970_v20  ;;  %v3057_v12 = vld [vmem:[#allocation3 + $0x110] sm:$0xff]  ;;  %v5935_v51 = vunpack.i.h.bf16 %v8799_v14  ;;  %v5934_v42 = vunpack.i.l.bf16 %v8799_v14 }
 0x2fb   : > { %v4419_v29 = vpack.c.bf16 %v4389_v48, %v4388_v40  ;;  %v8827_v59 = vpop.permute.xlu1 %5992  ;;  %v6261_v25 = vpack.i.bf16 %v3057_v12, %v3056_v1  ;;  %v5945_v48 = vunpack.i.h.bf16 %v8752_v36  ;;  %v5939_v12 = vunpack.i.l.bf16 %v8813_v19  ;;  %v8890_v1 = vld [vmem:[#allocation3 + $0x120] sm:$0xff] }
 0x2fc   : > { %v5953_v0 = vpop.permute.xlu0 %5952 }
 0x2fd   : > { %5128 = vmatmul.mubr.msk.bf16.vlgmr.msra.gmra.mrb[20].mxu1 %vm4470_vm1, %v4419_v29  ;;  %6257 = vrot.lane.b32.xlu1 %v8829_v21, %s6495_s23  ;;  %v5955_v45 = vunpack.i.h.bf16 %v5953_v0  ;;  %v5954_v3 = vunpack.i.l.bf16 %v5953_v0  ;;  %v5944_v29 = vunpack.i.l.bf16 %v8752_v36  ;;  %v5940_v0 = vunpack.i.h.bf16 %v8813_v19 }
 0x2fe   : > { %6267 = vrot.lane.b32.xlu0 %v8688_v44, %s6502_s29  ;;  %v4165_v57 = vsel %vm1827_vm2, %v8553_v34, %v5945_v48 }
 0x2ff   : > { %v8840_v4 = vpop.permute.xlu1 %5997  ;;  %v4227_v26 = vsel %vm1959_vm7, %v4195_v32, %v5955_v45  ;;  %v4226_v13 = vsel %vm1959_vm7, %v4194_v2, %v5954_v3  ;;  %v6291_v45 = vpack.i.bf16 %v8878_v9, %v8890_v1  ;;  %v4164_v3 = vsel %vm1827_vm2, %v8561_v43, %v5944_v29 }
 0x300   : > { %v5973_v15 = vpop.permute.xlu0 %5972  ;;  %v5919_v2 = vunpack.i.l.bf16 %v8714_v6 }
 0x301   : > { %v5975_v44 = vunpack.i.h.bf16 %v5973_v15  ;;  %v5974_v27 = vunpack.i.l.bf16 %v5973_v15  ;;  %6262 = vrot.lane.b32.xlu1 %v6261_v25, %s6501_s28 }
 0x302   : > { %6277 = vrot.lane.b32.xlu0 %v8697_v54, %s6503_s30 }
 0x303   : > { %v8849_v60 = vpop.permute.xlu1 %6002  ;;  %v4258_v22 = vsel %vm2025_vm9, %v4226_v13, %v5974_v27  ;;  %v4259_v16 = vsel %vm2025_vm9, %v4227_v26, %v5975_v44  ;;  %v4196_v44 = vsel %vm1893_vm5, %v4164_v3, %v5949_v62  ;;  %v4197_v27 = vsel %vm1893_vm5, %v4165_v57, %v5950_v46 }
 0x304   : > { %v5978_v24 = vpop.permute.xlu0 %5977  ;;  %v4228_v34 = vsel %vm1959_vm7, %v4196_v44, %v5914_v53  ;;  %v4229_v11 = vsel %vm1959_vm7, %v4197_v27, %v5915_v37  ;;  %v8953_v27 = vld [vmem:[#allocation3 + $0x158] sm:$0xff] }
 0x305   : > { %v5980_v54 = vunpack.i.h.bf16 %v5978_v24  ;;  %v5979_v7 = vunpack.i.l.bf16 %v5978_v24  ;;  %6272 = vrot.lane.b32.xlu1 %v8718_v38, %s6502_s29  ;;  %v4260_v24 = vsel %vm2025_vm9, %v4228_v34, %v5919_v2  ;;  %v6477_v34 = vld [vmem:[#allocation3 + $0x68] sm:$0xff] }
 0x306   : > { %6287 = vrot.lane.b32.xlu0 %v6261_v25, %s6497_s25 }
 0x307   : > { %v4291_v20 = vsel %vm4286_vm13, %v4258_v22, %v5979_v7  ;;  %v4292_v52 = vsel %vm4286_vm13, %v4259_v16, %v5980_v54  ;;  %v8868_v40 = vpop.permute.xlu1 %6022  ;;  %v3061_v7 = vld [vmem:[#allocation3 + $0x140] sm:$0xff] }
 0x308   : > { %v4324_v33 = vsel %vm4319_vm14, %v4291_v20, %v5929_v18  ;;  %v4325_v55 = vsel %vm4319_vm14, %v4292_v52, %v5930_v58  ;;  %v8866_v35 = vpop.permute.xlu0 %5982  ;;  %v5925_v58 = vunpack.i.h.bf16 %v8726_v17  ;;  %v5924_v18 = vunpack.i.l.bf16 %v8726_v17 }
 0x309   : > { %v4357_v14 = vsel %vm4352_vm15, %v4324_v33, %v5934_v42  ;;  %v4358_v30 = vsel %vm4352_vm15, %v4325_v55, %v5935_v51  ;;  %6282 = vrot.lane.b32.xlu1 %v8730_v8, %s6503_s30 }
 0x30a   : > { %6297 = vrot.lane.b32.xlu0 %v8718_v38, %s6499_s15  ;;  %v4390_v19 = vsel %vm4385_vm0, %v4357_v14, %v5939_v12  ;;  %v4391_v38 = vsel %vm4385_vm0, %v4358_v30, %v5940_v0  ;;  %v4293_v20 = vsel %vm4286_vm13, %v4260_v24, %v5924_v18 }
 0x30b   : > { %v8886_v15 = vpop.permute.xlu1 %6027  ;;  %v4420_v25 = vpack.c.bf16 %v4391_v38, %v4390_v19  ;;  %v5905_v19 = vunpack.i.h.bf16 %v8750_v5  ;;  %v5904_v38 = vunpack.i.l.bf16 %v8750_v5  ;;  %v6476_v5 = vld [vmem:[#allocation3 + $0x60] sm:$0xff] }
 0x30c   : > { %v8884_v36 = vpop.permute.xlu0 %5987 }
 0x30d   : > { %6292 = vrot.lane.b32.xlu1 %v6291_v45, %s6497_s25  ;;  %5131 = vmatprep.mubr.msk.bf16.mxu1 %vm4470_vm1, %v4420_v25 }
 0x30e   : > { %6307 = vrot.lane.b32.xlu0 %v8730_v8, %s6500_s27  ;;  %v5920_v8 = vunpack.i.h.bf16 %v8714_v6  ;;  %v8925_v6 = vld [vmem:[#allocation3 + $0x138] sm:$0xff] }
 0x30f   : > { %v6038_v56 = vpop.permute.xlu1 %6037  ;;  %v6321_v33 = vpack.i.bf16 %v3061_v7, %v8925_v6 }
 0x310   : > { %v8906_v43 = vpop.permute.xlu0 %6007  ;;  %v4261_v26 = vsel %vm2025_vm9, %v4229_v11, %v5920_v8  ;;  %v6040_v13 = vunpack.i.h.bf16 %v6038_v56  ;;  %v6039_v54 = vunpack.i.l.bf16 %v6038_v56  ;;  %v4166_v56 = vsel %vm1827_vm2, %v6476_v5, %v5904_v38 }
 0x311   : > { %6302 = vrot.lane.b32.xlu1 %v8716_v39, %s6499_s15  ;;  %v4294_v52 = vsel %vm4286_vm13, %v4261_v26, %v5925_v58  ;;  %v4167_v11 = vsel %vm1827_vm2, %v6477_v34, %v5905_v19  ;;  %v6010_v58 = vunpack.i.h.bf16 %v8906_v43  ;;  %v6009_v18 = vunpack.i.l.bf16 %v8906_v43  ;;  %v9009_v34 = vld [vmem:[#allocation3 + $0x170] sm:$0xff] }
 0x312   : > { %6317 = vrot.lane.b32.xlu0 %v6291_v45, %s6501_s28  ;;  %v4327_v17 = vsel %vm4319_vm14, %v4294_v52, %v6040_v13  ;;  %v4326_v55 = vsel %vm4319_vm14, %v4293_v20, %v6039_v54  ;;  %v5909_v45 = vunpack.i.l.bf16 %v8766_v50  ;;  %v6029_v19 = vunpack.i.l.bf16 %v8886_v15 }
 0x313   : > { %v6043_v41 = vpop.permute.xlu1 %6042 }
 0x314   : > { %v8915_v32 = vpop.permute.xlu0 %6012  ;;  %v6045_v22 = vunpack.i.h.bf16 %v6043_v41  ;;  %v6044_v16 = vunpack.i.l.bf16 %v6043_v41  ;;  %v4198_v8 = vsel %vm1893_vm5, %v4166_v56, %v5909_v45 }
 0x315   : > { %6312 = vrot.lane.b32.xlu1 %v8728_v63, %s6500_s27 }
 0x316   : > { %6327 = vrot.lane.b32.xlu0 %v8716_v39, %s6502_s29  ;;  %v4359_v29 = vsel %vm4352_vm15, %v4326_v55, %v6044_v16  ;;  %v4360_v0 = vsel %vm4352_vm15, %v4327_v17, %v6045_v22 }
 0x317   : > { %v6048_v42 = vpop.permute.xlu1 %6047 }
 0x318   : > { %v8929_v51 = vpop.permute.xlu0 %6017  ;;  %v6050_v48 = vunpack.i.h.bf16 %v6048_v42  ;;  %v6049_v39 = vunpack.i.l.bf16 %v6048_v42  ;;  %v6015_v42 = vunpack.i.h.bf16 %v8915_v32 }
 0x319   : > { %6322 = vrot.lane.b32.xlu1 %v6321_v33, %s6501_s28 }
 0x31a   : > { %6337 = vrot.lane.b32.xlu0 %v8728_v63, %s6503_s30  ;;  %v4392_v12 = vsel %vm4385_vm0, %v4359_v29, %v6049_v39  ;;  %v4393_v14 = vsel %vm4385_vm0, %v4360_v0, %v6050_v48  ;;  %v5910_v63 = vunpack.i.h.bf16 %v8766_v50  ;;  %v8961_v50 = vld [vmem:[#allocation3 + $0x150] sm:$0xff]  ;;  %v6025_v39 = vunpack.i.h.bf16 %v8868_v40 }
 0x31b   : > { %v4421_v30 = vpack.c.bf16 %v4393_v14, %v4392_v12  ;;  %v8941_v62 = vpop.permute.xlu1 %6072  ;;  %v6020_v29 = vunpack.i.h.bf16 %v8929_v51  ;;  %v6019_v0 = vunpack.i.l.bf16 %v8929_v51 }
 0x31c   : > { %v6033_v46 = vpop.permute.xlu0 %6032  ;;  %v4199_v2 = vsel %vm1893_vm5, %v4167_v11, %v5910_v63 }
 0x31d   : > { %5132 = vmatmul.mubr.msk.bf16.gmra.mrb[24].mxu1 %vm4470_vm1, %v4421_v30  ;;  %6332 = vrot.lane.b32.xlu1 %v8789_v10, %s6502_s29  ;;  %v6035_v25 = vunpack.i.h.bf16 %v6033_v46  ;;  %v6034_v44 = vunpack.i.l.bf16 %v6033_v46  ;;  %v6030_v46 = vunpack.i.h.bf16 %v8886_v15  ;;  %v4169_v15 = vsel %vm1827_vm2, %v8611_v28, %v6025_v39 }
 0x31e   : > { %6347 = vrot.lane.b32.xlu0 %v6321_v33, %s6497_s25  ;;  %v6014_v33 = vunpack.i.l.bf16 %v8915_v32  ;;  %v5995_v28 = vunpack.i.h.bf16 %v8827_v59 }
 0x31f   : > { %v8951_v57 = vpop.permute.xlu1 %6077  ;;  %v4231_v26 = vsel %vm1959_vm7, %v4199_v2, %v6035_v25  ;;  %v4230_v13 = vsel %vm1959_vm7, %v4198_v8, %v6034_v44  ;;  %v2862_v25 = vld [vmem:[#allocation3 + $0xc8] sm:$0xff] }
 0x320   : > { %v6053_v3 = vpop.permute.xlu0 %6052 }
 0x321   : > { %v6055_v37 = vunpack.i.h.bf16 %v6053_v3  ;;  %v6054_v53 = vunpack.i.l.bf16 %v6053_v3  ;;  %6342 = vrot.lane.b32.xlu1 %v8801_v61, %s6503_s30  ;;  %v2861_v3 = vld [vmem:[#allocation3 + $0xc0] sm:$0xff] }
 0x322   : > { %6357 = vrot.lane.b32.xlu0 %v8789_v10, %s6499_s15  ;;  %v6351_v10 = vpack.i.bf16 %v8953_v27, %v8961_v50 }
 0x323   : > { %v8965_v24 = vpop.permute.xlu1 %6082  ;;  %v4262_v22 = vsel %vm2025_vm9, %v4230_v13, %v6054_v53  ;;  %v4263_v16 = vsel %vm2025_vm9, %v4231_v26, %v6055_v37  ;;  %v9026_v26 = vld [vmem:[#allocation3 + $0x168] sm:$0xff] }
 0x324   : > { %v6058_v41 = vpop.permute.xlu0 %6057  ;;  %v6381_v13 = vpack.i.bf16 %v9009_v34, %v9026_v26 }
 0x325   : > { %v6060_v54 = vunpack.i.h.bf16 %v6058_v41  ;;  %v6059_v7 = vunpack.i.l.bf16 %v6058_v41  ;;  %6352 = vrot.lane.b32.xlu1 %v6351_v10, %s6497_s25  ;;  %v5994_v41 = vunpack.i.l.bf16 %v8827_v59  ;;  %v5999_v59 = vunpack.i.l.bf16 %v8840_v4 }
 0x326   : > { %6367 = vrot.lane.b32.xlu0 %v8801_v61, %s6500_s27  ;;  %v6024_v61 = vunpack.i.l.bf16 %v8868_v40 }
 0x327   : > { %v4295_v20 = vsel %vm4286_vm13, %v4262_v22, %v6059_v7  ;;  %v4296_v52 = vsel %vm4286_vm13, %v4263_v16, %v6060_v54  ;;  %v8984_v48 = vpop.permute.xlu1 %6102 }
 0x328   : > { %v4328_v17 = vsel %vm4319_vm14, %v4295_v20, %v6009_v18  ;;  %v4329_v43 = vsel %vm4319_vm14, %v4296_v52, %v6010_v58  ;;  %v6063_v55 = vpop.permute.xlu0 %6062  ;;  %v4168_v45 = vsel %vm1827_vm2, %v8615_v49, %v6024_v61  ;;  %v4201_v49 = vsel %vm1893_vm5, %v4169_v15, %v6030_v46 }
 0x329   : > { %v6065_v12 = vunpack.i.h.bf16 %v6063_v55  ;;  %v6064_v14 = vunpack.i.l.bf16 %v6063_v55  ;;  %v4361_v32 = vsel %vm4352_vm15, %v4328_v17, %v6014_v33  ;;  %v4362_v30 = vsel %vm4352_vm15, %v4329_v43, %v6015_v42  ;;  %6362 = vrot.lane.b32.xlu1 %v8744_v47, %s6499_s15 }
 0x32a   : > { %6377 = vrot.lane.b32.xlu0 %v6351_v10, %s6501_s28  ;;  %v4394_v51 = vsel %vm4385_vm0, %v4361_v32, %v6019_v0  ;;  %v4395_v63 = vsel %vm4385_vm0, %v4362_v30, %v6020_v29  ;;  %v4200_v11 = vsel %vm1893_vm5, %v4168_v45, %v6029_v19  ;;  %v4233_v7 = vsel %vm1959_vm7, %v4201_v49, %v5995_v28  ;;  %v2972_v30 = vld [vmem:[#allocation3 + $0x188] sm:$0xff]  ;;  %v2971_v45 = vld [vmem:[#allocation3 + $0x180] sm:$0xff] }
 0x32b   : > { %v8997_v38 = vpop.permute.xlu1 %6107  ;;  %v4174_v53 = vsel %vm1827_vm2, %v2861_v3, %v6064_v14  ;;  %v4175_v5 = vsel %vm1827_vm2, %v2862_v25, %v6065_v12  ;;  %v4422_v56 = vpack.c.bf16 %v4395_v63, %v4394_v51  ;;  %v4232_v54 = vsel %vm1959_vm7, %v4200_v11, %v5994_v41  ;;  %v3035_v25 = vld [vmem:[#allocation3 + $0x182] sm:$0xff] }
 0x32c   : > { %v6068_v40 = vpop.permute.xlu0 %6067  ;;  %v6000_v58 = vunpack.i.h.bf16 %v8840_v4  ;;  %v4264_v16 = vsel %vm2025_vm9, %v4232_v54, %v5999_v59  ;;  %v6005_v33 = vunpack.i.h.bf16 %v8849_v60  ;;  %v6004_v17 = vunpack.i.l.bf16 %v8849_v60  ;;  %v9072_v11 = vld [vmem:[#allocation3 + $0x1a0] sm:$0xff]  ;;  %v2859_v59 = vld [vmem:[#allocation3 + $0xa8] sm:$0xff] }
 0x32d   : > { %v6070_v44 = vunpack.i.h.bf16 %v6068_v40  ;;  %v6069_v37 = vunpack.i.l.bf16 %v6068_v40  ;;  %6372 = vrot.lane.b32.xlu1 %v8772_v23, %s6500_s27  ;;  %5135 = vmatprep.mubr.msk.bf16.mxu1 %vm4470_vm1, %v4422_v56  ;;  %v6411_v3 = vpack.i.bf16 %v2972_v30, %v2971_v45  ;;  %v6105_v15 = vunpack.i.h.bf16 %v8984_v48  ;;  %v9070_v56 = vld [vmem:[#allocation3 + $0x198] sm:$0xff] }
 0x32e   : > { %6387 = vrot.lane.b32.xlu0 %v8744_v47, %s6502_s29  ;;  %v4265_v20 = vsel %vm2025_vm9, %v4233_v7, %v6000_v58  ;;  %v4297_v4 = vsel %vm4286_vm13, %v4264_v16, %v6004_v17  ;;  %v5990_v49 = vunpack.i.h.bf16 %v8884_v36  ;;  %v6110_v28 = vunpack.i.h.bf16 %v8997_v38  ;;  %v9080_v58 = vpop.f32.mrb[0].mxu1  ;;  %v6479_v17 = vld [vmem:[#allocation3 + $0x98] sm:$0xff] }
 0x32f   : > { %v9014_v8 = vsel %vm1893_vm5, %v4174_v53, %v6069_v37  ;;  %v9017_v2 = vsel %vm1893_vm5, %v4175_v5, %v6070_v44  ;;  %v6118_v10 = vpop.permute.xlu1 %6117  ;;  %v4298_v55 = vsel %vm4286_vm13, %v4265_v20, %v6005_v33  ;;  %v5985_v44 = vunpack.i.h.bf16 %v8866_v35  ;;  %v3036_v5 = vld [vmem:[#allocation3 + $0x18a] sm:$0xff] }
 0x330   : > { %v9024_v47 = vpop.permute.xlu0 %6087  ;;  %v6120_v52 = vunpack.i.h.bf16 %v6118_v10  ;;  %v6119_v42 = vunpack.i.l.bf16 %v6118_v10  ;;  %v5984_v37 = vunpack.i.l.bf16 %v8866_v35  ;;  %v6104_v53 = vunpack.i.l.bf16 %v8984_v48 }
 0x331   : > { %6382 = vrot.lane.b32.xlu1 %v6381_v13, %s6501_s28  ;;  %v6109_v41 = vunpack.i.l.bf16 %v8997_v38  ;;  %v9085_v38 = vpop.f32.mrb[1].mxu1  ;;  %v6089_v45 = vunpack.i.l.bf16 %v9024_v47 }
 0x332   : > { %6397 = vrot.lane.b32.xlu0 %v8772_v23, %s6503_s30  ;;  %v4331_v29 = vsel %vm4319_vm14, %v4298_v55, %v6120_v52  ;;  %v4330_v0 = vsel %vm4319_vm14, %v4297_v4, %v6119_v42  ;;  %v6441_v52 = vpack.i.bf16 %v9072_v11, %v9070_v56  ;;  %v6478_v42 = vld [vmem:[#allocation3 + $0x90] sm:$0xff]  ;;  %v9092_v55 = vpop.f32.mrb[2].mxu1 }
 0x333   : > { %v6123_v22 = vpop.permute.xlu1 %6122  ;;  %v4170_v33 = vsel %vm1827_vm2, %v6478_v42, %v5984_v37  ;;  %v6074_v37 = vunpack.i.l.bf16 %v8941_v62 }
 0x334   : > { %v9037_v18 = vpop.permute.xlu0 %6092  ;;  %v6125_v23 = vunpack.i.h.bf16 %v6123_v22  ;;  %v6124_v43 = vunpack.i.l.bf16 %v6123_v22  ;;  %v2860_v22 = vld [vmem:[#allocation3 + $0xb0] sm:$0xff] }
 0x335   : > { %6392 = vrot.lane.b32.xlu1 %v8815_v31, %s6502_s29  ;;  %v4173_v4 = vsel %vm1827_vm2, %v2860_v22, %v6105_v15  ;;  %v6094_v56 = vunpack.i.l.bf16 %v9037_v18 }
 0x336   : > { %6407 = vrot.lane.b32.xlu0 %v6381_v13, %s6497_s25  ;;  %v4363_v14 = vsel %vm4352_vm15, %v4330_v0, %v6124_v43  ;;  %v4364_v32 = vsel %vm4352_vm15, %v4331_v29, %v6125_v23  ;;  %v3003_v13 = vld [vmem:[#allocation3 + $0x181] sm:$0xff]  ;;  %v4171_v23 = vsel %vm1827_vm2, %v6479_v17, %v5985_v44  ;;  %v4172_v43 = vsel %vm1827_vm2, %v2859_v59, %v6104_v53 }
 0x337   : > { %v6128_v61 = vpop.permute.xlu1 %6127  ;;  %v4203_v29 = vsel %vm1893_vm5, %v4171_v23, %v5990_v49  ;;  %v4204_v0 = vsel %vm1893_vm5, %v4172_v43, %v6109_v41  ;;  %v6075_v44 = vunpack.i.h.bf16 %v8941_v62  ;;  %v3100_v62 = vld [vmem:[#allocation3 + $0x199] sm:$0xff]  ;;  %v3101_v41 = vld [vmem:[#allocation3 + $0x1a1] sm:$0xff]  ;;  %v6085_v17 = vunpack.i.h.bf16 %v8965_v24 }
 0x338   : > { %v9048_v39 = vpop.permute.xlu0 %6097  ;;  %v6130_v12 = vunpack.i.h.bf16 %v6128_v61  ;;  %v6129_v60 = vunpack.i.l.bf16 %v6128_v61  ;;  %v6451_v42 = vpack.i.bf16 %v3101_v41, %v3100_v62 }
 0x339   : > { %6402 = vrot.lane.b32.xlu1 %v8829_v21, %s6503_s30 }
 0x33a   : > { %6417 = vrot.lane.b32.xlu0 %v8815_v31, %s6499_s15  ;;  %v4396_v46 = vsel %vm4385_vm0, %v4363_v14, %v6129_v60  ;;  %v4397_v19 = vsel %vm4385_vm0, %v4364_v32, %v6130_v12  ;;  %v3004_v31 = vld [vmem:[#allocation3 + $0x189] sm:$0xff]  ;;  %v4205_v12 = vsel %vm1893_vm5, %v4173_v4, %v6110_v28  ;;  %v3132_v4 = vld [vmem:[#allocation3 + $0x19a] sm:$0xff] }
 0x33b   : > { %v4423_v40 = vpack.c.bf16 %v4397_v19, %v4396_v46  ;;  %v9060_v63 = vpop.permute.xlu1 %6152  ;;  %v6421_v7 = vpack.i.bf16 %v3004_v31, %v3003_v13  ;;  %v4237_v13 = vsel %vm1959_vm7, %v4205_v12, %v6075_v44 }
 0x33c   : > { %v6113_v51 = vpop.permute.xlu0 %6112 }
 0x33d   : > { %5136 = vmatmul.mubr.msk.bf16.gmra.mrb[28].mxu1 %vm4470_vm1, %v4423_v40  ;;  %6412 = vrot.lane.b32.xlu1 %v6411_v3, %s6497_s25  ;;  %v6115_v48 = vunpack.i.h.bf16 %v6113_v51  ;;  %v6114_v54 = vunpack.i.l.bf16 %v6113_v51  ;;  %v9102_v40 = vpop.f32.mrb[3].mxu1  ;;  %v6090_v51 = vunpack.i.h.bf16 %v9024_v47  ;;  %v6095_v47 = vunpack.i.h.bf16 %v9037_v18 }
 0x33e   : > { %6427 = vrot.lane.b32.xlu0 %v8829_v21, %s6500_s27  ;;  %v5989_v21 = vunpack.i.l.bf16 %v8884_v36  ;;  %v6431_v36 = vpack.i.bf16 %v3036_v5, %v3035_v25  ;;  %v9109_v25 = vpop.f32.mrb[4].mxu1 }
 0x33f   : > { %v9078_v10 = vpop.permute.xlu1 %6157  ;;  %v4235_v32 = vsel %vm1959_vm7, %v4203_v29, %v6115_v48  ;;  %v9116_v5 = vpop.f32.mrb[5].mxu1 }
 0x340   : > { %v6133_v35 = vpop.permute.xlu0 %6132  ;;  %v4202_v61 = vsel %vm1893_vm5, %v4170_v33, %v5989_v21  ;;  %v9126_v48 = vpop.f32.mrb[6].mxu1 }
 0x341   : > { %v6135_v16 = vunpack.i.h.bf16 %v6133_v35  ;;  %v6134_v20 = vunpack.i.l.bf16 %v6133_v35  ;;  %6422 = vrot.lane.b32.xlu1 %v6421_v7, %s6499_s15  ;;  %v4234_v30 = vsel %vm1959_vm7, %v4202_v61, %v6114_v54  ;;  %v4236_v35 = vsel %vm1959_vm7, %v4204_v0, %v6074_v37  ;;  %v9133_v22 = vpop.f32.mrb[7].mxu1  ;;  %v3133_v61 = vld [vmem:[#allocation3 + $0x1a2] sm:$0xff] }
 0x342   : > { %6437 = vrot.lane.b32.xlu0 %v6411_v3, %s6501_s28  ;;  %v6100_v54 = vunpack.i.h.bf16 %v9048_v39  ;;  %v9138_v33 = vpop.f32.mrb[8].mxu1 }
 0x343   : > { %v9098_v14 = vpop.permute.xlu1 %6162  ;;  %v4266_v3 = vsel %vm2025_vm9, %v4234_v30, %v6134_v20  ;;  %v4267_v31 = vsel %vm2025_vm9, %v4235_v32, %v6135_v16  ;;  %v6080_v16 = vunpack.i.h.bf16 %v8951_v57  ;;  %v6079_v20 = vunpack.i.l.bf16 %v8951_v57  ;;  %v9147_v12 = vpop.f32.mrb[9].mxu1 }
 0x344   : > { %v6138_v60 = vpop.permute.xlu0 %6137 }
 0x345   : > { %v6140_v46 = vunpack.i.h.bf16 %v6138_v60  ;;  %v6139_v19 = vunpack.i.l.bf16 %v6138_v60  ;;  %6432 = vrot.lane.b32.xlu1 %v6431_v36, %s6500_s27  ;;  %v4268_v29 = vsel %vm2025_vm9, %v4236_v35, %v6079_v20  ;;  %v4269_v57 = vsel %vm2025_vm9, %v4237_v13, %v6080_v16 }
 0x346   : > { %6447 = vrot.lane.b32.xlu0 %v6421_v7, %s6502_s29  ;;  %v6099_v7 = vunpack.i.l.bf16 %v9048_v39  ;;  %v6084_v60 = vunpack.i.l.bf16 %v8965_v24 }
 0x347   : > { %v4299_v15 = vsel %vm4286_vm13, %v4266_v3, %v6139_v19  ;;  %v4300_v53 = vsel %vm4286_vm13, %v4267_v31, %v6140_v46  ;;  %v6173_v28 = vpop.permute.xlu1 %6172  ;;  %v9150_v19 = vpop.f32.mrb[10].mxu1  ;;  %v4302_v31 = vsel %vm4286_vm13, %v4269_v57, %v6085_v17 }
 0x348   : > { %v4332_v11 = vsel %vm4319_vm14, %v4299_v15, %v6089_v45  ;;  %v4333_v49 = vsel %vm4319_vm14, %v4300_v53, %v6090_v51  ;;  %v9122_v21 = vpop.permute.xlu0 %6142  ;;  %v6175_v0 = vunpack.i.h.bf16 %v6173_v28  ;;  %v6461_v51 = vpack.i.bf16 %v3133_v61, %v3132_v4  ;;  %v9153_v45 = vpop.f32.mrb[11].mxu1 }
 0x349   : > { %v4365_v18 = vsel %vm4352_vm15, %v4332_v11, %v6094_v56  ;;  %v4366_v59 = vsel %vm4352_vm15, %v4333_v49, %v6095_v47  ;;  %6442 = vrot.lane.b32.xlu1 %v6441_v52, %s6501_s28  ;;  %v6174_v52 = vunpack.i.l.bf16 %v6173_v28  ;;  %v4301_v3 = vsel %vm4286_vm13, %v4268_v29, %v6084_v60  ;;  %v9162_v56 = vpop.f32.mrb[12].mxu1 }
 0x34a   : > { %6457 = vrot.lane.b32.xlu0 %v6431_v36, %s6503_s30  ;;  %v4398_v23 = vsel %vm4385_vm0, %v4365_v18, %v6099_v7  ;;  %v4399_v43 = vsel %vm4385_vm0, %v4366_v59, %v6100_v54  ;;  %v4335_v24 = vsel %vm4319_vm14, %v4302_v31, %v6175_v0  ;;  %v9166_v28 = vpop.f32.mrb[13].mxu1  ;;  %v9177_v59 = vpop.f32.mrb[32].mxu0 }
 0x34b   : > { %v6178_v36 = vpop.permute.xlu1 %6177  ;;  %v4424_v46 = vpack.c.bf16 %v4399_v43, %v4398_v23  ;;  %v4334_v15 = vsel %vm4319_vm14, %v4301_v3, %v6174_v52  ;;  %v9171_v35 = vpop.f32.mrb[14].mxu1 }
 0x34c   : > { %v9141_v39 = vpop.permute.xlu0 %6147  ;;  %v6180_v32 = vunpack.i.h.bf16 %v6178_v36  ;;  %v6179_v30 = vunpack.i.l.bf16 %v6178_v36  ;;  %v9175_v18 = vpop.f32.mrb[15].mxu1 }
 0x34d   : > { %6452 = vrot.lane.b32.xlu1 %v6451_v42, %s6502_s29  ;;  %5139 = vmatprep.mubr.msk.bf16.mxu1 %vm4470_vm1, %v4424_v46  ;;  %v9180_v42 = vpop.f32.mrb[16].mxu1  ;;  %v9182_v17 = vpop.f32.mrb[33].mxu0 }
 0x34e   : > { %v4367_v11 = vsel %vm4352_vm15, %v4334_v15, %v6179_v30  ;;  %v4368_v49 = vsel %vm4352_vm15, %v4335_v24, %v6180_v32  ;;  %9894 = vst [vmem:[#allocation21_spill] sm:$0xff] %v9180_v42  ;;  %v9184_v36 = vpop.f32.mrb[17].mxu1  ;;  %v9186_v23 = vpop.f32.mrb[34].mxu0 }
 0x34f   : > { %v6183_v37 = vpop.permute.xlu1 %6182  ;;  %9895 = vst [vmem:[#allocation22_spill] sm:$0xff] %v9184_v36  ;;  %v9190_v57 = vpop.f32.mrb[18].mxu1 }
 0x350   : > { %v9158_v44 = vpop.permute.xlu0 %6167  ;;  %v6185_v53 = vunpack.i.h.bf16 %v6183_v37  ;;  %v6184_v47 = vunpack.i.l.bf16 %v6183_v37  ;;  %9896 = vst [vmem:[#allocation23_spill] sm:$0xff] %v9190_v57  ;;  %v9192_v0 = vpop.f32.mrb[35].mxu0 }
 0x351   : > { %6462 = vrot.lane.b32.xlu1 %v6461_v51, %s6503_s30  ;;  %v9198_v32 = vpop.f32.mrb[19].mxu1 }
 0x352   : > { %v4400_v62 = vsel %vm4385_vm0, %v4367_v11, %v6184_v47  ;;  %v4401_v41 = vsel %vm4385_vm0, %v4368_v49, %v6185_v53  ;;  %9897 = vst [vmem:[#allocation24_spill] sm:$0xff] %v9198_v32 }
 0x353   : > { %v4425_v13 = vpack.c.bf16 %v4401_v41, %v4400_v62  ;;  %v9173_v7 = vpop.permute.xlu1 %6197 }
 0x354   : > { %v6188_v54 = vpop.permute.xlu0 %6187 }
 0x355   : > { %v6190_v16 = vunpack.i.h.bf16 %v6188_v54  ;;  %v6189_v20 = vunpack.i.l.bf16 %v6188_v54  ;;  %5140 = vmatmul.mubr.msk.bf16.gmra.mrb[32].mxu1 %vm4470_vm1, %v4425_v13 }
 0x357   : > { %v9188_v4 = vpop.permute.xlu1 %6202  ;;  %v4182_v52 = vsel %vm1827_vm2, %v8890_v1, %v6189_v20  ;;  %v4183_v60 = vsel %vm1827_vm2, %v8878_v9, %v6190_v16 }
 0x358   : > { %v6193_v43 = vpop.permute.xlu0 %6192 }
 0x359   : > { %v6195_v61 = vunpack.i.h.bf16 %v6193_v43  ;;  %v6194_v29 = vunpack.i.l.bf16 %v6193_v43  ;;  %v6170_v43 = vunpack.i.h.bf16 %v9158_v44 }
 0x35b   : > { %v9201_v30 = vsel %vm1893_vm5, %v4182_v52, %v6194_v29  ;;  %v9204_v46 = vsel %vm1893_vm5, %v4183_v60, %v6195_v61  ;;  %v9206_v51 = vpop.permute.xlu1 %6222  ;;  %v6159_v61 = vunpack.i.l.bf16 %v9078_v10 }
 0x35c   : > { %v6208_v3 = vpop.permute.xlu0 %6207 }
 0x35d   : > { %v6210_v31 = vunpack.i.h.bf16 %v6208_v3  ;;  %v6209_v37 = vunpack.i.l.bf16 %v6208_v3 }
 0x35f   : > { %v9208_v24 = vpop.permute.xlu1 %6232  ;;  %v4186_v9 = vsel %vm1827_vm2, %v8961_v50, %v6209_v37  ;;  %v4187_v47 = vsel %vm1827_vm2, %v8953_v27, %v6210_v31  ;;  %v6169_v50 = vunpack.i.l.bf16 %v9158_v44  ;;  %v6160_v27 = vunpack.i.h.bf16 %v9078_v10 }
 0x360   : > { %v6213_v15 = vpop.permute.xlu0 %6212  ;;  %v6165_v31 = vunpack.i.h.bf16 %v9098_v14  ;;  %v6164_v37 = vunpack.i.l.bf16 %v9098_v14 }
 0x361   : > { %v6215_v1 = vunpack.i.h.bf16 %v6213_v15  ;;  %v6214_v53 = vunpack.i.l.bf16 %v6213_v15  ;;  %v4238_v44 = vsel %vm1959_vm7, %v9014_v8, %v6169_v50 }
 0x363   : > { %v9215_v11 = vsel %vm1893_vm5, %v4186_v9, %v6214_v53  ;;  %v9218_v49 = vsel %vm1893_vm5, %v4187_v47, %v6215_v1  ;;  %v9220_v41 = vpop.permute.xlu1 %6242  ;;  %v4239_v9 = vsel %vm1959_vm7, %v9017_v2, %v6170_v43 }
 0x364   : > { %v6218_v62 = vpop.permute.xlu0 %6217 }
 0x365   : > { %v6220_v29 = vunpack.i.h.bf16 %v6218_v62  ;;  %v6219_v52 = vunpack.i.l.bf16 %v6218_v62 }
 0x367   : > { %v9222_v54 = vpop.permute.xlu1 %6247  ;;  %v4271_v42 = vsel %vm2025_vm9, %v4239_v9, %v6220_v29  ;;  %v4270_v14 = vsel %vm2025_vm9, %v4238_v44, %v6219_v52  ;;  %v2863_v29 = vld [vmem:[#allocation3 + $0xd8] sm:$0xff] }
 0x368   : > { %v6228_v13 = vpop.permute.xlu0 %6227 }
 0x369   : > { %v6230_v15 = vunpack.i.h.bf16 %v6228_v13  ;;  %v6229_v1 = vunpack.i.l.bf16 %v6228_v13 }
 0x36b   : > { %v6253_v20 = vpop.permute.xlu1 %6252  ;;  %v4303_v43 = vsel %vm4286_vm13, %v4270_v14, %v6229_v1  ;;  %v4304_v8 = vsel %vm4286_vm13, %v4271_v42, %v6230_v15  ;;  %v9253_v1 = vpop.f32.mrb[36].mxu0 }
 0x36c   : > { %v6238_v16 = vpop.permute.xlu0 %6237  ;;  %v6255_v60 = vunpack.i.h.bf16 %v6253_v20  ;;  %v6254_v3 = vunpack.i.l.bf16 %v6253_v20 }
 0x36d   : > { %v6240_v47 = vunpack.i.h.bf16 %v6238_v16  ;;  %v6239_v32 = vunpack.i.l.bf16 %v6238_v16 }
 0x36e   : > { %v4188_v13 = vsel %vm1827_vm2, %v9026_v26, %v6254_v3  ;;  %v4189_v2 = vsel %vm1827_vm2, %v9009_v34, %v6255_v60  ;;  %v2864_v34 = vld [vmem:[#allocation3 + $0xe0] sm:$0xff]  ;;  %v4176_v60 = vsel %vm1827_vm2, %v2863_v29, %v6159_v61  ;;  %v6225_v61 = vunpack.i.h.bf16 %v9206_v51 }
 0x36f   : > { %v6258_v10 = vpop.permute.xlu1 %6257  ;;  %v4336_v52 = vsel %vm4319_vm14, %v4303_v43, %v6239_v32  ;;  %v4337_v9 = vsel %vm4319_vm14, %v4304_v8, %v6240_v47  ;;  %v6235_v43 = vunpack.i.h.bf16 %v9208_v24  ;;  %v6234_v8 = vunpack.i.l.bf16 %v9208_v24 }
 0x370   : > { %v6268_v53 = vpop.permute.xlu0 %6267  ;;  %v6260_v36 = vunpack.i.h.bf16 %v6258_v10  ;;  %v6259_v20 = vunpack.i.l.bf16 %v6258_v10  ;;  %v4208_v10 = vsel %vm1893_vm5, %v4176_v60, %v6164_v37  ;;  %v6154_v37 = vunpack.i.l.bf16 %v9060_v63 }
 0x371   : > { %v6270_v57 = vunpack.i.h.bf16 %v6268_v53  ;;  %v6269_v62 = vunpack.i.l.bf16 %v6268_v53 }
 0x372   : > { %v9243_v16 = vsel %vm1893_vm5, %v4188_v13, %v6259_v20  ;;  %v9246_v50 = vsel %vm1893_vm5, %v4189_v2, %v6260_v36  ;;  %v4177_v36 = vsel %vm1827_vm2, %v2864_v34, %v6160_v27  ;;  %v9259_v20 = vpop.f32.mrb[37].mxu0  ;;  %v6155_v27 = vunpack.i.h.bf16 %v9060_v63 }
 0x373   : > { %v6263_v44 = vpop.permute.xlu1 %6262  ;;  %v4369_v42 = vsel %vm4352_vm15, %v4336_v52, %v6269_v62  ;;  %v4370_v15 = vsel %vm4352_vm15, %v4337_v9, %v6270_v57  ;;  %v4209_v14 = vsel %vm1893_vm5, %v4177_v36, %v6165_v31  ;;  %v6224_v62 = vunpack.i.l.bf16 %v9206_v51  ;;  %v9264_v2 = vpop.f32.mrb[38].mxu0 }
 0x374   : > { %v6278_v53 = vpop.permute.xlu0 %6277  ;;  %v9270_v29 = vpop.f32.mrb[39].mxu0  ;;  %v6265_v31 = vunpack.i.h.bf16 %v6263_v44  ;;  %v6264_v52 = vunpack.i.l.bf16 %v6263_v44  ;;  %v4240_v51 = vsel %vm1959_vm7, %v4208_v10, %v6154_v37  ;;  %v4241_v9 = vsel %vm1959_vm7, %v4209_v14, %v6155_v27 }
 0x375   : > { %v6280_v26 = vunpack.i.h.bf16 %v6278_v53  ;;  %v6279_v3 = vunpack.i.l.bf16 %v6278_v53  ;;  %v4273_v34 = vsel %vm2025_vm9, %v4241_v9, %v6225_v61  ;;  %v4272_v63 = vsel %vm2025_vm9, %v4240_v51, %v6224_v62 }
 0x376   : > { %v4305_v24 = vsel %vm4286_vm13, %v4272_v63, %v6234_v8  ;;  %v6144_v8 = vunpack.i.l.bf16 %v9122_v21 }
 0x377   : > { %v4402_v32 = vsel %vm4385_vm0, %v4369_v42, %v6279_v3  ;;  %v4403_v47 = vsel %vm4385_vm0, %v4370_v15, %v6280_v26  ;;  %v6273_v53 = vpop.permute.xlu1 %6272  ;;  %v4306_v42 = vsel %vm4286_vm13, %v4273_v34, %v6235_v43  ;;  %v4338_v36 = vsel %vm4319_vm14, %v4305_v24, %v6264_v52  ;;  %v2866_v34 = vld [vmem:[#allocation3 + $0xf8] sm:$0xff] }
 0x378   : > { %v4426_v13 = vpack.c.bf16 %v4403_v47, %v4402_v32  ;;  %v6288_v57 = vpop.permute.xlu0 %6287  ;;  %v6275_v26 = vunpack.i.h.bf16 %v6273_v53  ;;  %v6274_v3 = vunpack.i.l.bf16 %v6273_v53  ;;  %v4339_v44 = vsel %vm4319_vm14, %v4306_v42, %v6265_v31 }
 0x379   : > { %v6145_v43 = vunpack.i.h.bf16 %v9122_v21  ;;  %v6150_v31 = vunpack.i.h.bf16 %v9141_v39  ;;  %v6149_v52 = vunpack.i.l.bf16 %v9141_v39  ;;  %v6290_v9 = vunpack.i.h.bf16 %v6288_v57 }
 0x37a   : > { %5143 = vmatprep.mubr.msk.bf16.mxu1 %vm4470_vm1, %v4426_v13  ;;  %v4371_v47 = vsel %vm4352_vm15, %v4338_v36, %v6274_v3  ;;  %v4372_v14 = vsel %vm4352_vm15, %v4339_v44, %v6275_v26  ;;  %v6289_v26 = vunpack.i.l.bf16 %v6288_v57  ;;  %v2865_v3 = vld [vmem:[#allocation3 + $0xf0] sm:$0xff] }
 0x37b   : > { %v6283_v15 = vpop.permute.xlu1 %6282  ;;  %v4178_v42 = vsel %vm1827_vm2, %v2865_v3, %v6144_v8  ;;  %v6199_v8 = vunpack.i.l.bf16 %v9173_v7 }
 0x37c   : > { %v6298_v60 = vpop.permute.xlu0 %6297  ;;  %v6285_v32 = vunpack.i.h.bf16 %v6283_v15  ;;  %v6284_v10 = vunpack.i.l.bf16 %v6283_v15  ;;  %v4179_v15 = vsel %vm1827_vm2, %v2866_v34, %v6145_v43 }
 0x37d   : > { %v6300_v63 = vunpack.i.h.bf16 %v6298_v60  ;;  %v6299_v24 = vunpack.i.l.bf16 %v6298_v60 }
 0x37e   : > { %v4404_v61 = vsel %vm4385_vm0, %v4371_v47, %v6284_v10  ;;  %v4405_v62 = vsel %vm4385_vm0, %v4372_v14, %v6285_v32  ;;  %v4210_v32 = vsel %vm1893_vm5, %v4178_v42, %v6149_v52  ;;  %v4211_v10 = vsel %vm1893_vm5, %v4179_v15, %v6150_v31 }
 0x37f   : > { %v4427_v27 = vpack.c.bf16 %v4405_v62, %v4404_v61  ;;  %v9285_v37 = vpop.permute.xlu1 %6292  ;;  %v4243_v57 = vsel %vm1959_vm7, %v4211_v10, %v6290_v9  ;;  %v4242_v61 = vsel %vm1959_vm7, %v4210_v32, %v6289_v26 }
 0x380   : > { %v6308_v13 = vpop.permute.xlu0 %6307  ;;  %v4275_v43 = vsel %vm2025_vm9, %v4243_v57, %v6300_v63  ;;  %v6204_v63 = vunpack.i.l.bf16 %v9188_v4 }
 0x381   : > { %5144 = vmatmul.mubr.msk.bf16.gmra.mrb[36].mxu1 %vm4470_vm1, %v4427_v27  ;;  %v6310_v44 = vunpack.i.h.bf16 %v6308_v13  ;;  %v6309_v36 = vunpack.i.l.bf16 %v6308_v13  ;;  %v4274_v27 = vsel %vm2025_vm9, %v4242_v61, %v6299_v24  ;;  %v6200_v13 = vunpack.i.h.bf16 %v9173_v7  ;;  %v6480_v61 = vld [vmem:[#allocation3 + $0x108] sm:$0xff] }
 0x382   : > { %v6205_v24 = vunpack.i.h.bf16 %v9188_v4  ;;  %v4180_v4 = vsel %vm1827_vm2, %v6480_v61, %v6199_v8 }
 0x383   : > { %v9292_v51 = vpop.permute.xlu1 %6302  ;;  %v4307_v52 = vsel %vm4286_vm13, %v4274_v27, %v6309_v36  ;;  %v4308_v31 = vsel %vm4286_vm13, %v4275_v43, %v6310_v44  ;;  %v6295_v36 = vunpack.i.h.bf16 %v9285_v37  ;;  %v6294_v44 = vunpack.i.l.bf16 %v9285_v37 }
 0x384   : > { %v6318_v53 = vpop.permute.xlu0 %6317  ;;  %v6305_v10 = vunpack.i.h.bf16 %v9292_v51  ;;  %v4212_v37 = vsel %vm1893_vm5, %v4180_v4, %v6204_v63 }
 0x385   : > { %v6320_v39 = vunpack.i.h.bf16 %v6318_v53  ;;  %v6319_v47 = vunpack.i.l.bf16 %v6318_v53 }
 0x387   : > { %v6313_v14 = vpop.permute.xlu1 %6312  ;;  %v4340_v3 = vsel %vm4319_vm14, %v4307_v52, %v6319_v47  ;;  %v4341_v9 = vsel %vm4319_vm14, %v4308_v31, %v6320_v39  ;;  %v6304_v39 = vunpack.i.l.bf16 %v9292_v51 }
 0x388   : > { %v6328_v21 = vpop.permute.xlu0 %6327  ;;  %v6315_v27 = vunpack.i.h.bf16 %v6313_v14  ;;  %v6314_v43 = vunpack.i.l.bf16 %v6313_v14 }
 0x389   : > { %v6330_v62 = vunpack.i.h.bf16 %v6328_v21  ;;  %v6329_v60 = vunpack.i.l.bf16 %v6328_v21 }
 0x38b   : > { %v6323_v42 = vpop.permute.xlu1 %6322  ;;  %v4373_v15 = vsel %vm4352_vm15, %v4340_v3, %v6329_v60  ;;  %v4374_v7 = vsel %vm4352_vm15, %v4341_v9, %v6330_v62  ;;  %v6481_v60 = vld [vmem:[#allocation3 + $0x110] sm:$0xff]  ;;  %v4244_v9 = vsel %vm1959_vm7, %v4212_v37, %v6294_v44 }
 0x38c   : > { %v6338_v53 = vpop.permute.xlu0 %6337  ;;  %v4181_v62 = vsel %vm1827_vm2, %v6481_v60, %v6200_v13  ;;  %v6324_v3 = vunpack.i.l.bf16 %v6323_v42 }
 0x38d   : > { %v6340_v26 = vunpack.i.h.bf16 %v6338_v53  ;;  %v6339_v34 = vunpack.i.l.bf16 %v6338_v53  ;;  %v4213_v31 = vsel %vm1893_vm5, %v4181_v62, %v6205_v24  ;;  %v6325_v53 = vunpack.i.h.bf16 %v6323_v42 }
 0x38e   : > { %v4245_v51 = vsel %vm1959_vm7, %v4213_v31, %v6295_v36 }
 0x38f   : > { %v4406_v21 = vsel %vm4385_vm0, %v4373_v15, %v6339_v34  ;;  %v4407_v32 = vsel %vm4385_vm0, %v4374_v7, %v6340_v26  ;;  %v6333_v52 = vpop.permute.xlu1 %6332  ;;  %v4276_v34 = vsel %vm2025_vm9, %v4244_v9, %v6304_v39  ;;  %v4277_v13 = vsel %vm2025_vm9, %v4245_v51, %v6305_v10 }
 0x390   : > { %v4428_v47 = vpack.c.bf16 %v4407_v32, %v4406_v21  ;;  %v6348_v57 = vpop.permute.xlu0 %6347  ;;  %v6335_v26 = vunpack.i.h.bf16 %v6333_v52  ;;  %v6334_v8 = vunpack.i.l.bf16 %v6333_v52  ;;  %v4309_v15 = vsel %vm4286_vm13, %v4276_v34, %v6314_v43  ;;  %v9331_v32 = vpop.f32.mrb[40].mxu0 }
 0x391   : > { %v4310_v63 = vsel %vm4286_vm13, %v4277_v13, %v6315_v27  ;;  %v4342_v42 = vsel %vm4319_vm14, %v4309_v15, %v6324_v3  ;;  %v6350_v31 = vunpack.i.h.bf16 %v6348_v57 }
 0x392   : > { %5147 = vmatprep.mubr.msk.bf16.mxu1 %vm4470_vm1, %v4428_v47  ;;  %v4343_v7 = vsel %vm4319_vm14, %v4310_v63, %v6325_v53  ;;  %v4375_v44 = vsel %vm4352_vm15, %v4342_v42, %v6334_v8  ;;  %v9335_v47 = vpop.f32.mrb[41].mxu0  ;;  %v6349_v53 = vunpack.i.l.bf16 %v6348_v57 }
 0x393   : > { %v6343_v24 = vpop.permute.xlu1 %6342  ;;  %v4376_v39 = vsel %vm4352_vm15, %v4343_v7, %v6335_v26  ;;  %v9339_v60 = vpop.f32.mrb[42].mxu0  ;;  %v4247_v63 = vsel %vm1959_vm7, %v9204_v46, %v6350_v31  ;;  %v6249_v31 = vunpack.i.l.bf16 %v9222_v54 }
 0x394   : > { %v6358_v14 = vpop.permute.xlu0 %6357  ;;  %v6345_v21 = vunpack.i.h.bf16 %v6343_v24  ;;  %v6344_v36 = vunpack.i.l.bf16 %v6343_v24  ;;  %v9341_v43 = vpop.f32.mrb[43].mxu0  ;;  %v4246_v24 = vsel %vm1959_vm7, %v9201_v30, %v6349_v53 }
 0x395   : > { %v6360_v3 = vunpack.i.h.bf16 %v6358_v14  ;;  %v6359_v51 = vunpack.i.l.bf16 %v6358_v14  ;;  %v6245_v14 = vunpack.i.h.bf16 %v9220_v41 }
 0x396   : > { %v4408_v10 = vsel %vm4385_vm0, %v4375_v44, %v6344_v36  ;;  %v4409_v61 = vsel %vm4385_vm0, %v4376_v39, %v6345_v21  ;;  %v6244_v36 = vunpack.i.l.bf16 %v9220_v41 }
 0x397   : > { %v4429_v62 = vpack.c.bf16 %v4409_v61, %v4408_v10  ;;  %v6353_v27 = vpop.permute.xlu1 %6352  ;;  %v4278_v21 = vsel %vm2025_vm9, %v4246_v24, %v6359_v51  ;;  %v4279_v57 = vsel %vm2025_vm9, %v4247_v63, %v6360_v3 }
 0x398   : > { %v6368_v4 = vpop.permute.xlu0 %6367  ;;  %v6355_v3 = vunpack.i.h.bf16 %v6353_v27  ;;  %v6354_v51 = vunpack.i.l.bf16 %v6353_v27  ;;  %v4184_v24 = vsel %vm1827_vm2, %v8925_v6, %v6244_v36 }
 0x399   : > { %5148 = vmatmul.mubr.msk.bf16.gmra.mrb[40].mxu1 %vm4470_vm1, %v4429_v62  ;;  %v6370_v9 = vunpack.i.h.bf16 %v6368_v4  ;;  %v6369_v26 = vunpack.i.l.bf16 %v6368_v4 }
 0x39b   : > { %v6363_v37 = vpop.permute.xlu1 %6362  ;;  %v4311_v44 = vsel %vm4286_vm13, %v4278_v21, %v6369_v26  ;;  %v4312_v39 = vsel %vm4286_vm13, %v4279_v57, %v6370_v9  ;;  %v6482_v21 = vld [vmem:[#allocation3 + $0x140] sm:$0xff] }
 0x39c   : > { %v6378_v52 = vpop.permute.xlu0 %6377 }
 0x39d   : > { %v6380_v34 = vunpack.i.h.bf16 %v6378_v52  ;;  %v6379_v13 = vunpack.i.l.bf16 %v6378_v52  ;;  %v6250_v52 = vunpack.i.h.bf16 %v9222_v54  ;;  %v4185_v54 = vsel %vm1827_vm2, %v6482_v21, %v6245_v14 }
 0x39f   : > { %v6373_v15 = vpop.permute.xlu1 %6372  ;;  %v4344_v46 = vsel %vm4319_vm14, %v4311_v44, %v6379_v13  ;;  %v4345_v61 = vsel %vm4319_vm14, %v4312_v39, %v6380_v34  ;;  %v6364_v13 = vunpack.i.l.bf16 %v6363_v37  ;;  %v4217_v27 = vsel %vm1893_vm5, %v4185_v54, %v6250_v52 }
 0x3a0   : > { %v6388_v8 = vpop.permute.xlu0 %6387  ;;  %v6375_v57 = vunpack.i.h.bf16 %v6373_v15 }
 0x3a1   : > { %v6390_v42 = vunpack.i.h.bf16 %v6388_v8  ;;  %v6389_v7 = vunpack.i.l.bf16 %v6388_v8  ;;  %v6365_v8 = vunpack.i.h.bf16 %v6363_v37  ;;  %v4249_v37 = vsel %vm1959_vm7, %v4217_v27, %v6355_v3 }
 0x3a3   : > { %v6383_v62 = vpop.permute.xlu1 %6382  ;;  %v4377_v53 = vsel %vm4352_vm15, %v4344_v46, %v6389_v7  ;;  %v4378_v41 = vsel %vm4352_vm15, %v4345_v61, %v6390_v42  ;;  %v6374_v7 = vunpack.i.l.bf16 %v6373_v15  ;;  %v4216_v42 = vsel %vm1893_vm5, %v4184_v24, %v6249_v31 }
 0x3a4   : > { %v6398_v10 = vpop.permute.xlu0 %6397  ;;  %v6385_v39 = vunpack.i.h.bf16 %v6383_v62  ;;  %v4248_v46 = vsel %vm1959_vm7, %v4216_v42, %v6354_v51  ;;  %v4281_v14 = vsel %vm2025_vm9, %v4249_v37, %v6365_v8 }
 0x3a5   : > { %v6400_v30 = vunpack.i.h.bf16 %v6398_v10  ;;  %v6399_v4 = vunpack.i.l.bf16 %v6398_v10  ;;  %v6384_v10 = vunpack.i.l.bf16 %v6383_v62  ;;  %v4280_v36 = vsel %vm2025_vm9, %v4248_v46, %v6364_v13 }
 0x3a7   : > { %v4410_v9 = vsel %vm4385_vm0, %v4377_v53, %v6399_v4  ;;  %v4411_v26 = vsel %vm4385_vm0, %v4378_v41, %v6400_v30  ;;  %v6393_v44 = vpop.permute.xlu1 %6392  ;;  %v4313_v30 = vsel %vm4286_vm13, %v4280_v36, %v6374_v7  ;;  %v4314_v4 = vsel %vm4286_vm13, %v4281_v14, %v6375_v57 }
 0x3a8   : > { %v4430_v34 = vpack.c.bf16 %v4411_v26, %v4410_v9  ;;  %v6408_v63 = vpop.permute.xlu0 %6407  ;;  %v6395_v61 = vunpack.i.h.bf16 %v6393_v44  ;;  %v6394_v6 = vunpack.i.l.bf16 %v6393_v44  ;;  %v4346_v62 = vsel %vm4319_vm14, %v4313_v30, %v6384_v10 }
 0x3a9   : > { %v4347_v31 = vsel %vm4319_vm14, %v4314_v4, %v6385_v39  ;;  %v6410_v54 = vunpack.i.h.bf16 %v6408_v63  ;;  %v6409_v57 = vunpack.i.l.bf16 %v6408_v63 }
 0x3aa   : > { %5151 = vmatprep.mubr.msk.bf16.mxu1 %vm4470_vm1, %v4430_v34  ;;  %v4379_v3 = vsel %vm4352_vm15, %v4346_v62, %v6394_v6  ;;  %v4380_v51 = vsel %vm4352_vm15, %v4347_v31, %v6395_v61 }
 0x3ab   : > { %v6403_v52 = vpop.permute.xlu1 %6402  ;;  %v4251_v61 = vsel %vm1959_vm7, %v9218_v49, %v6410_v54  ;;  %v4250_v6 = vsel %vm1959_vm7, %v9215_v11, %v6409_v57 }
 0x3ac   : > { %v6418_v15 = vpop.permute.xlu0 %6417  ;;  %v6405_v53 = vunpack.i.h.bf16 %v6403_v52  ;;  %v6404_v41 = vunpack.i.l.bf16 %v6403_v52 }
 0x3ad   : > { %v6420_v7 = vunpack.i.h.bf16 %v6418_v15  ;;  %v6419_v44 = vunpack.i.l.bf16 %v6418_v15 }
 0x3ae   : > { %v4412_v9 = vsel %vm4385_vm0, %v4379_v3, %v6404_v41  ;;  %v4413_v26 = vsel %vm4385_vm0, %v4380_v51, %v6405_v53 }
 0x3af   : > { %v4431_v13 = vpack.c.bf16 %v4413_v26, %v4412_v9  ;;  %v6413_v34 = vpop.permute.xlu1 %6412  ;;  %v4282_v30 = vsel %vm2025_vm9, %v4250_v6, %v6419_v44  ;;  %v4283_v63 = vsel %vm2025_vm9, %v4251_v61, %v6420_v7 }
 0x3b0   : > { %v6428_v8 = vpop.permute.xlu0 %6427  ;;  %v6415_v51 = vunpack.i.h.bf16 %v6413_v34  ;;  %v6414_v9 = vunpack.i.l.bf16 %v6413_v34 }
 0x3b1   : > { %5152 = vmatmul.mubr.msk.bf16.gmra.mrb[44].mxu1 %vm4470_vm1, %v4431_v13  ;;  %v6430_v42 = vunpack.i.h.bf16 %v6428_v8  ;;  %v6429_v27 = vunpack.i.l.bf16 %v6428_v8 }
 0x3b2   : > { %v4253_v34 = vsel %vm1959_vm7, %v9246_v50, %v6415_v51 }
 0x3b3   : > { %v6423_v21 = vpop.permute.xlu1 %6422  ;;  %v4315_v15 = vsel %vm4286_vm13, %v4282_v30, %v6429_v27  ;;  %v4316_v4 = vsel %vm4286_vm13, %v4283_v63, %v6430_v42 }
 0x3b4   : > { %v6438_v24 = vpop.permute.xlu0 %6437  ;;  %v6425_v13 = vunpack.i.h.bf16 %v6423_v21 }
 0x3b5   : > { %v6440_v10 = vunpack.i.h.bf16 %v6438_v24  ;;  %v6439_v37 = vunpack.i.l.bf16 %v6438_v24  ;;  %v6424_v24 = vunpack.i.l.bf16 %v6423_v21 }
 0x3b6   : > { %v4285_v21 = vsel %vm2025_vm9, %v4253_v34, %v6425_v13 }
 0x3b7   : > { %v6433_v46 = vpop.permute.xlu1 %6432  ;;  %v4348_v62 = vsel %vm4319_vm14, %v4315_v15, %v6439_v37  ;;  %v4349_v31 = vsel %vm4319_vm14, %v4316_v4, %v6440_v10 }
 0x3b8   : > { %v6448_v39 = vpop.permute.xlu0 %6447  ;;  %v6435_v57 = vunpack.i.h.bf16 %v6433_v46  ;;  %v6434_v7 = vunpack.i.l.bf16 %v6433_v46 }
 0x3b9   : > { %v6450_v36 = vunpack.i.h.bf16 %v6448_v39  ;;  %v6449_v14 = vunpack.i.l.bf16 %v6448_v39  ;;  %v4252_v39 = vsel %vm1959_vm7, %v9243_v16, %v6414_v9 }
 0x3ba   : > { %v4284_v61 = vsel %vm2025_vm9, %v4252_v39, %v6424_v24  ;;  %v4318_v46 = vsel %vm4286_vm13, %v4285_v21, %v6435_v57 }
 0x3bb   : > { %v6443_v41 = vpop.permute.xlu1 %6442  ;;  %v4381_v11 = vsel %vm4352_vm15, %v4348_v62, %v6449_v14  ;;  %v4382_v3 = vsel %vm4352_vm15, %v4349_v31, %v6450_v36  ;;  %v4317_v6 = vsel %vm4286_vm13, %v4284_v61, %v6434_v7  ;;  %v9413_v31 = vld [vmem:[%s9673_s8] ss:$0 sm:$0xff] }
 0x3bc   : > { %v6458_v52 = vpop.permute.xlu0 %6457  ;;  %v6445_v42 = vunpack.i.h.bf16 %v6443_v41  ;;  %v6444_v27 = vunpack.i.l.bf16 %v6443_v41  ;;  %v9426_v41 = vld [vmem:[%s9670_s5] ss:$0 sm:$0xff]  ;;  %v2775_v9 = vmul.f32 %v9413_v31, %v9192_v0 }
 0x3bd   : > { %v6460_v53 = vunpack.i.h.bf16 %v6458_v52  ;;  %v6459_v49 = vunpack.i.l.bf16 %v6458_v52 }
 0x3be   : > { %v4350_v14 = vsel %vm4319_vm14, %v4317_v6, %v6444_v27  ;;  %v4351_v30 = vsel %vm4319_vm14, %v4318_v46, %v6445_v42 }
 0x3bf   : > { %v4414_v26 = vsel %vm4385_vm0, %v4381_v11, %v6459_v49  ;;  %v4415_v8 = vsel %vm4385_vm0, %v4382_v3, %v6460_v53  ;;  %v6453_v44 = vpop.permute.xlu1 %6452  ;;  %v2776_v53 = vmul.f32 %v9177_v59, %v9413_v31  ;;  %v9421_v49 = vld [vmem:[%s9674_s9] ss:$0 sm:$0xff]  ;;  %v2774_v11 = vmul.f32 %v9413_v31, %v9182_v17 }
 0x3c0   : > { %v4432_v54 = vpack.c.bf16 %v4415_v8, %v4414_v26  ;;  %v6455_v10 = vunpack.i.h.bf16 %v6453_v44  ;;  %v6454_v37 = vunpack.i.l.bf16 %v6453_v44  ;;  %v2777_v3 = vmul.f32 %v9186_v23, %v9413_v31  ;;  %v9435_v59 = vld [vmem:[%s9671_s6] ss:$0 sm:$0xff] }
 0x3c1   : > { %v2815_v26 = vadd.f32 %v9421_v49, %v2776_v53  ;;  %v2813_v17 = vadd.f32 %v9421_v49, %v2774_v11  ;;  %v2814_v42 = vadd.f32 %v9421_v49, %v2775_v9 }
 0x3c2   : > { %5155 = vmatprep.mubr.msk.bf16.mxu1 %vm4470_vm1, %v4432_v54  ;;  %v4383_v15 = vsel %vm4352_vm15, %v4350_v14, %v6454_v37  ;;  %v4384_v50 = vsel %vm4352_vm15, %v4351_v30, %v6455_v10  ;;  %v2816_v57 = vadd.f32 %v9421_v49, %v2777_v3  ;;  %v2780_v30 = vmul.f32 %v9253_v1, %v9413_v31 }
 0x3c3   : > { %v6463_v36 = vpop.permute.xlu1 %6462 }
 0x3c4   : > { %v6465_v63 = vunpack.i.h.bf16 %v6463_v36  ;;  %v6464_v16 = vunpack.i.l.bf16 %v6463_v36 }
 0x3c6   : > { %v4416_v4 = vsel %vm4385_vm0, %v4383_v15, %v6464_v16  ;;  %v4417_v52 = vsel %vm4385_vm0, %v4384_v50, %v6465_v63  ;;  %v2778_v63 = vmul.f32 %v9413_v31, %v9259_v20  ;;  %v2781_v16 = vmul.f32 %v9264_v2, %v9413_v31 }
 0x3c7   : > { %v4433_v62 = vpack.c.bf16 %v4417_v52, %v4416_v4  ;;  %v2779_v50 = vmul.f32 %v9413_v31, %v9270_v29  ;;  %v2819_v4 = vadd.f32 %v9421_v49, %v2780_v30 }
 0x3c8   : > { %v2817_v53 = vadd.f32 %v9421_v49, %v2778_v63  ;;  %v2820_v3 = vadd.f32 %v9421_v49, %v2781_v16 }
 0x3c9   : > { %5156 = vmatmul.mubr.msk.bf16.gmra.mrb[48].mxu1 %vm4470_vm1, %v4433_v62  ;;  %v2818_v9 = vadd.f32 %v9421_v49, %v2779_v50 }
 0x3d0   : > { %v5129_v51 = vpop.f32.mrb[20].mxu1 }
 0x3d1   : > { %v4693_v8 = vmul.f32 %v5129_v51, %v9426_v41  ;;  %v4557_v13 = vpop.f32.mrb[21].mxu1 }
 0x3d2   : > { %v4691_v24 = vmul.f32 %v9426_v41, %v4557_v13  ;;  %v5130_v23 = vpop.f32.mrb[22].mxu1 }
 0x3d3   : > { %v4732_v54 = vadd.f32 %v9435_v59, %v4693_v8  ;;  %v4694_v7 = vmul.f32 %v5130_v23, %v9426_v41  ;;  %v4560_v44 = vpop.f32.mrb[23].mxu1 }
 0x3d4   : > { %v4730_v0 = vadd.f32 %v9435_v59, %v4691_v24  ;;  %v4692_v27 = vmul.f32 %v9426_v41, %v4560_v44 }
 0x3d5   : > { %v4764_v39 = vadd.f32 %v4732_v54, %v2815_v26  ;;  %v4733_v34 = vadd.f32 %v9435_v59, %v4694_v7 }
 0x3d6   : > { %v4762_v10 = vadd.f32 %v4730_v0, %v2813_v17  ;;  %v4731_v37 = vadd.f32 %v9435_v59, %v4692_v27  ;;  %v2782_v27 = vmul.f32 %v9413_v31, %v9335_v47 }
 0x3d7   : > { %v4796_v61 = vmax.f32 %v4764_v39, 0.0  ;;  %v4765_v21 = vadd.f32 %v4733_v34, %v2816_v57  ;;  %v2785_v39 = vmul.f32 %v9339_v60, %v9413_v31 }
 0x3d8   : > { %v4794_v6 = vmax.f32 %v4762_v10, 0.0  ;;  %v4763_v46 = vadd.f32 %v4731_v37, %v2814_v42  ;;  %v2784_v42 = vmul.f32 %v9331_v32, %v9413_v31  ;;  %v2783_v10 = vmul.f32 %v9413_v31, %v9341_v43 }
 0x3d9   : > { %4828 = vst.msk [vmem:[%s9455_s18 + $0x10] sm:$0xff] %vm1827_vm2, %v4796_v61  ;;  %v4797_v36 = vmax.f32 %v4765_v21, 0.0 }
 0x3da   : > { %4826 = vst.msk [vmem:[%s9455_s18] sm:$0xff] %vm1827_vm2, %v4794_v6  ;;  %v4795_v14 = vmax.f32 %v4763_v46, 0.0  ;;  %v2823_v37 = vadd.f32 %v9421_v49, %v2784_v42  ;;  %v2821_v6 = vadd.f32 %v9421_v49, %v2782_v27  ;;  %v2822_v30 = vadd.f32 %v9421_v49, %v2783_v10 }
 0x3db   : > { %4829 = vst.msk [vmem:[%s9455_s18 + $0x18] sm:$0xff] %vm1827_vm2, %v4797_v36  ;;  %v2824_v36 = vadd.f32 %v9421_v49, %v2785_v39 }
 0x3dc   : > { %4827 = vst.msk [vmem:[%s9455_s18 + $0x8] sm:$0xff] %vm1827_vm2, %v4795_v14 }
 0x3f0   : > { %v5133_v15 = vpop.f32.mrb[24].mxu1 }
 0x3f1   : > { %v4697_v52 = vmul.f32 %v5133_v15, %v9426_v41  ;;  %v4573_v62 = vpop.f32.mrb[25].mxu1 }
 0x3f2   : > { %v4695_v11 = vmul.f32 %v9426_v41, %v4573_v62  ;;  %v5134_v1 = vpop.f32.mrb[26].mxu1 }
 0x3f3   : > { %v4736_v20 = vadd.f32 %v9435_v59, %v4697_v52  ;;  %v4698_v2 = vmul.f32 %v5134_v1, %v9426_v41  ;;  %v4576_v51 = vpop.f32.mrb[27].mxu1 }
 0x3f4   : > { %v4734_v29 = vadd.f32 %v9435_v59, %v4695_v11  ;;  %v4696_v26 = vmul.f32 %v9426_v41, %v4576_v51  ;;  %v2789_v51 = vmul.f32 %v9092_v55, %v9413_v31 }
 0x3f5   : > { %v4768_v8 = vadd.f32 %v4736_v20, %v2819_v4  ;;  %v4737_v13 = vadd.f32 %v9435_v59, %v4698_v2  ;;  %v2786_v2 = vmul.f32 %v9413_v31, %v9085_v38 }
 0x3f6   : > { %v4766_v17 = vadd.f32 %v4734_v29, %v2817_v53  ;;  %v4735_v24 = vadd.f32 %v9435_v59, %v4696_v26  ;;  %v2787_v29 = vmul.f32 %v9413_v31, %v9102_v40  ;;  %v2828_v38 = vadd.f32 %v9421_v49, %v2789_v51 }
 0x3f7   : > { %v4800_v23 = vmax.f32 %v4768_v8, 0.0  ;;  %v4769_v54 = vadd.f32 %v4737_v13, %v2820_v3  ;;  %v2788_v3 = vmul.f32 %v9080_v58, %v9413_v31 }
 0x3f8   : > { %v4798_v57 = vmax.f32 %v4766_v17, 0.0  ;;  %v4767_v7 = vadd.f32 %v4735_v24, %v2818_v9  ;;  %v2825_v17 = vadd.f32 %v9421_v49, %v2786_v2 }
 0x3f9   : > { %4832 = vst.msk [vmem:[%s9455_s18 + $0x30] sm:$0xff] %vm1827_vm2, %v4800_v23  ;;  %v4801_v44 = vmax.f32 %v4769_v54, 0.0  ;;  %v2827_v26 = vadd.f32 %v9421_v49, %v2788_v3  ;;  %v2826_v54 = vadd.f32 %v9421_v49, %v2787_v29 }
 0x3fa   : > { %4830 = vst.msk [vmem:[%s9455_s18 + $0x20] sm:$0xff] %vm1827_vm2, %v4798_v57  ;;  %v4799_v0 = vmax.f32 %v4767_v7, 0.0 }
 0x3fb   : > { %4833 = vst.msk [vmem:[%s9455_s18 + $0x38] sm:$0xff] %vm1827_vm2, %v4801_v44 }
 0x3fc   : > { %4831 = vst.msk [vmem:[%s9455_s18 + $0x28] sm:$0xff] %vm1827_vm2, %v4799_v0 }
 0x410   : > { %v5137_v34 = vpop.f32.mrb[28].mxu1 }
 0x411   : > { %v4701_v61 = vmul.f32 %v5137_v34, %v9426_v41  ;;  %v4589_v21 = vpop.f32.mrb[29].mxu1 }
 0x412   : > { %v4699_v46 = vmul.f32 %v9426_v41, %v4589_v21  ;;  %v5138_v32 = vpop.f32.mrb[30].mxu1 }
 0x413   : > { %v4740_v47 = vadd.f32 %v9435_v59, %v4701_v61  ;;  %v4702_v60 = vmul.f32 %v5138_v32, %v9426_v41  ;;  %v4592_v14 = vpop.f32.mrb[31].mxu1 }
 0x414   : > { %v4738_v43 = vadd.f32 %v9435_v59, %v4699_v46  ;;  %v4700_v63 = vmul.f32 %v9426_v41, %v4592_v14  ;;  %v2790_v46 = vmul.f32 %v9413_v31, %v9116_v5  ;;  %v2791_v14 = vmul.f32 %v9413_v31, %v9133_v22 }
 0x415   : > { %v4772_v16 = vadd.f32 %v4740_v47, %v2823_v37  ;;  %v4741_v15 = vadd.f32 %v9435_v59, %v4702_v60  ;;  %v2793_v47 = vmul.f32 %v9126_v48, %v9413_v31 }
 0x416   : > { %v4770_v50 = vadd.f32 %v4738_v43, %v2821_v6  ;;  %v4739_v4 = vadd.f32 %v9435_v59, %v4700_v63  ;;  %v2792_v6 = vmul.f32 %v9109_v25, %v9413_v31  ;;  %v2829_v48 = vadd.f32 %v9421_v49, %v2790_v46 }
 0x417   : > { %v4804_v52 = vmax.f32 %v4772_v16, 0.0  ;;  %v4773_v62 = vadd.f32 %v4741_v15, %v2824_v36  ;;  %v2832_v22 = vadd.f32 %v9421_v49, %v2793_v47  ;;  %v2798_v46 = vmul.f32 %v9413_v31, %v9166_v28 }
 0x418   : > { %v4802_v53 = vmax.f32 %v4770_v50, 0.0  ;;  %v4771_v11 = vadd.f32 %v4739_v4, %v2822_v30  ;;  %v2831_v63 = vadd.f32 %v9421_v49, %v2792_v6  ;;  %v2800_v6 = vmul.f32 %v9162_v56, %v9413_v31 }
 0x419   : > { %4836 = vst.msk [vmem:[%s9455_s18 + $0x50] sm:$0xff] %vm1827_vm2, %v4804_v52  ;;  %v4805_v1 = vmax.f32 %v4773_v62, 0.0  ;;  %v2830_v62 = vadd.f32 %v9421_v49, %v2791_v14  ;;  %v2801_v47 = vmul.f32 %v9171_v35, %v9413_v31  ;;  %v2799_v14 = vmul.f32 %v9413_v31, %v9175_v18 }
 0x41a   : > { %4834 = vst.msk [vmem:[%s9455_s18 + $0x40] sm:$0xff] %vm1827_vm2, %v4802_v53  ;;  %v4803_v20 = vmax.f32 %v4771_v11, 0.0  ;;  %v2837_v35 = vadd.f32 %v9421_v49, %v2798_v46 }
 0x41b   : > { %4837 = vst.msk [vmem:[%s9455_s18 + $0x58] sm:$0xff] %vm1827_vm2, %v4805_v1  ;;  %v2840_v18 = vadd.f32 %v9421_v49, %v2801_v47 }
 0x41c   : > { %4835 = vst.msk [vmem:[%s9455_s18 + $0x48] sm:$0xff] %vm1827_vm2, %v4803_v20 }
 0x428   : > { %v5141_v9 = vpop.f32.mrb[32].mxu1 }
 0x429   : > { %v4705_v8 = vmul.f32 %v5141_v9, %v9426_v41  ;;  %v4605_v13 = vpop.f32.mrb[33].mxu1  ;;  %v2796_v9 = vmul.f32 %v9138_v33, %v9413_v31 }
 0x42a   : > { %v4703_v24 = vmul.f32 %v9426_v41, %v4605_v13  ;;  %v5142_v58 = vpop.f32.mrb[34].mxu1  ;;  %v2797_v13 = vmul.f32 %v9150_v19, %v9413_v31 }
 0x42b   : > { %v4744_v23 = vadd.f32 %v9435_v59, %v4705_v8  ;;  %v4706_v55 = vmul.f32 %v5142_v58, %v9426_v41  ;;  %v4608_v40 = vpop.f32.mrb[35].mxu1  ;;  %v2795_v58 = vmul.f32 %v9413_v31, %v9153_v45 }
 0x42c   : > { %v4742_v57 = vadd.f32 %v9435_v59, %v4703_v24  ;;  %v4704_v7 = vmul.f32 %v9426_v41, %v4608_v40  ;;  %v2836_v45 = vadd.f32 %v9421_v49, %v2797_v13 }
 0x42d   : > { %v4776_v44 = vadd.f32 %v4744_v23, %v2827_v26  ;;  %v4745_v0 = vadd.f32 %v9435_v59, %v4706_v55  ;;  %v2794_v26 = vmul.f32 %v9413_v31, %v9147_v12  ;;  %v2835_v55 = vadd.f32 %v9421_v49, %v2796_v9 }
 0x42e   : > { %v4774_v42 = vadd.f32 %v4742_v57, %v2825_v17  ;;  %v4743_v27 = vadd.f32 %v9435_v59, %v4704_v7 }
 0x42f   : > { %v4808_v39 = vmax.f32 %v4776_v44, 0.0  ;;  %v4777_v34 = vadd.f32 %v4745_v0, %v2828_v38  ;;  %v2833_v19 = vadd.f32 %v9421_v49, %v2794_v26  ;;  %v2834_v0 = vadd.f32 %v9421_v49, %v2795_v58  ;;  %v9900_v26 = vld [vmem:[#allocation23_spill] sm:$0xff] }
 0x430   : > { %v4806_v10 = vmax.f32 %v4774_v42, 0.0  ;;  %v4775_v37 = vadd.f32 %v4743_v27, %v2826_v54 }
 0x431   : > { %4840 = vst.msk [vmem:[%s9455_s18 + $0x70] sm:$0xff] %vm1827_vm2, %v4808_v39  ;;  %v4809_v61 = vmax.f32 %v4777_v34, 0.0 }
 0x432   : > { %4838 = vst.msk [vmem:[%s9455_s18 + $0x60] sm:$0xff] %vm1827_vm2, %v4806_v10  ;;  %v4807_v21 = vmax.f32 %v4775_v37, 0.0 }
 0x433   : > { %4841 = vst.msk [vmem:[%s9455_s18 + $0x78] sm:$0xff] %vm1827_vm2, %v4809_v61 }
 0x434   : > { %4839 = vst.msk [vmem:[%s9455_s18 + $0x68] sm:$0xff] %vm1827_vm2, %v4807_v21 }
 0x454   : > { %v5145_v32 = vpop.f32.mrb[36].mxu1 }
 0x455   : > { %v4709_v36 = vmul.f32 %v5145_v32, %v9426_v41  ;;  %v4621_v60 = vpop.f32.mrb[37].mxu1 }
 0x456   : > { %v4707_v43 = vmul.f32 %v9426_v41, %v4621_v60  ;;  %v5146_v30 = vpop.f32.mrb[38].mxu1 }
 0x457   : > { %v4748_v25 = vadd.f32 %v9435_v59, %v4709_v36  ;;  %v4710_v5 = vmul.f32 %v5146_v30, %v9426_v41  ;;  %v4624_v16 = vpop.f32.mrb[39].mxu1 }
 0x458   : > { %v4746_v15 = vadd.f32 %v9435_v59, %v4707_v43  ;;  %v4708_v50 = vmul.f32 %v9426_v41, %v4624_v16 }
 0x459   : > { %v4780_v4 = vadd.f32 %v4748_v25, %v2831_v63  ;;  %v4749_v52 = vadd.f32 %v9435_v59, %v4710_v5  ;;  %v2839_v63 = vadd.f32 %v9421_v49, %v2800_v6 }
 0x45a   : > { %v4778_v53 = vadd.f32 %v4746_v15, %v2829_v48  ;;  %v4747_v11 = vadd.f32 %v9435_v59, %v4708_v50  ;;  %v2838_v50 = vadd.f32 %v9421_v49, %v2799_v14 }
 0x45b   : > { %v4812_v1 = vmax.f32 %v4780_v4, 0.0  ;;  %v4781_v20 = vadd.f32 %v4749_v52, %v2832_v22 }
 0x45c   : > { %v4810_v3 = vmax.f32 %v4778_v53, 0.0  ;;  %v4779_v2 = vadd.f32 %v4747_v11, %v2830_v62 }
 0x45d   : > { %4844 = vst.msk [vmem:[%s9455_s18 + $0x90] sm:$0xff] %vm1827_vm2, %v4812_v1  ;;  %v4813_v51 = vmax.f32 %v4781_v20, 0.0 }
 0x45e   : > { %4842 = vst.msk [vmem:[%s9455_s18 + $0x80] sm:$0xff] %vm1827_vm2, %v4810_v3  ;;  %v4811_v29 = vmax.f32 %v4779_v2, 0.0  ;;  %v9898_v3 = vld [vmem:[#allocation21_spill] sm:$0xff] }
 0x45f   : > { %4845 = vst.msk [vmem:[%s9455_s18 + $0x98] sm:$0xff] %vm1827_vm2, %v4813_v51  ;;  %v2804_v2 = vmul.f32 %v9898_v3, %v9413_v31  ;;  %v9899_v51 = vld [vmem:[#allocation22_spill] sm:$0xff] }
 0x460   : > { %4843 = vst.msk [vmem:[%s9455_s18 + $0x88] sm:$0xff] %vm1827_vm2, %v4811_v29  ;;  %v2802_v29 = vmul.f32 %v9413_v31, %v9899_v51 }
 0x46c   : > { %v5149_v8 = vpop.f32.mrb[40].mxu1 }
 0x46d   : > { %v4713_v17 = vmul.f32 %v5149_v8, %v9426_v41  ;;  %v4637_v24 = vpop.f32.mrb[41].mxu1  ;;  %v2805_v8 = vmul.f32 %v9900_v26, %v9413_v31 }
 0x46e   : > { %v4711_v38 = vmul.f32 %v9426_v41, %v4637_v24  ;;  %v5150_v23 = vpop.f32.mrb[42].mxu1  ;;  %v9901_v24 = vld [vmem:[#allocation24_spill] sm:$0xff] }
 0x46f   : > { %v4752_v33 = vadd.f32 %v9435_v59, %v4713_v17  ;;  %v4714_v12 = vmul.f32 %v5150_v23, %v9426_v41  ;;  %v4640_v40 = vpop.f32.mrb[43].mxu1  ;;  %v2803_v58 = vmul.f32 %v9413_v31, %v9901_v24  ;;  %v2844_v31 = vadd.f32 %v9421_v49, %v2805_v8 }
 0x470   : > { %v4750_v54 = vadd.f32 %v9435_v59, %v4711_v38  ;;  %v4712_v57 = vmul.f32 %v9426_v41, %v4640_v40 }
 0x471   : > { %v4784_v7 = vadd.f32 %v4752_v33, %v2835_v55  ;;  %v4753_v44 = vadd.f32 %v9435_v59, %v4714_v12  ;;  %v2843_v55 = vadd.f32 %v9421_v49, %v2804_v2 }
 0x472   : > { %v4782_v42 = vadd.f32 %v4750_v54, %v2833_v19  ;;  %v4751_v27 = vadd.f32 %v9435_v59, %v4712_v57  ;;  %v2841_v19 = vadd.f32 %v9421_v49, %v2802_v29 }
 0x473   : > { %v4816_v39 = vmax.f32 %v4784_v7, 0.0  ;;  %v4785_v34 = vadd.f32 %v4753_v44, %v2836_v45  ;;  %v2842_v44 = vadd.f32 %v9421_v49, %v2803_v58 }
 0x474   : > { %v4814_v10 = vmax.f32 %v4782_v42, 0.0  ;;  %v4783_v37 = vadd.f32 %v4751_v27, %v2834_v0 }
 0x475   : > { %4848 = vst.msk [vmem:[%s9455_s18 + $0xb0] sm:$0xff] %vm1827_vm2, %v4816_v39  ;;  %v4817_v61 = vmax.f32 %v4785_v34, 0.0 }
 0x476   : > { %4846 = vst.msk [vmem:[%s9455_s18 + $0xa0] sm:$0xff] %vm1827_vm2, %v4814_v10  ;;  %v4815_v21 = vmax.f32 %v4783_v37, 0.0 }
 0x477   : > { %4849 = vst.msk [vmem:[%s9455_s18 + $0xb8] sm:$0xff] %vm1827_vm2, %v4817_v61 }
 0x478   : > { %4847 = vst.msk [vmem:[%s9455_s18 + $0xa8] sm:$0xff] %vm1827_vm2, %v4815_v21 }
 0x484   : > { %v5153_v32 = vpop.f32.mrb[44].mxu1 }
 0x485   : > { %v4717_v36 = vmul.f32 %v5153_v32, %v9426_v41  ;;  %v4653_v60 = vpop.f32.mrb[45].mxu1 }
 0x486   : > { %v4715_v43 = vmul.f32 %v9426_v41, %v4653_v60  ;;  %v5154_v30 = vpop.f32.mrb[46].mxu1 }
 0x487   : > { %v4756_v56 = vadd.f32 %v9435_v59, %v4717_v36  ;;  %v4718_v28 = vmul.f32 %v5154_v30, %v9426_v41  ;;  %v4656_v25 = vpop.f32.mrb[47].mxu1 }
 0x488   : > { %v4754_v5 = vadd.f32 %v9435_v59, %v4715_v43  ;;  %v4716_v16 = vmul.f32 %v9426_v41, %v4656_v25 }
 0x489   : > { %v4788_v48 = vadd.f32 %v4756_v56, %v2839_v63  ;;  %v4757_v15 = vadd.f32 %v9435_v59, %v4718_v28 }
 0x48a   : > { %v4786_v22 = vadd.f32 %v4754_v5, %v2837_v35  ;;  %v4755_v4 = vadd.f32 %v9435_v59, %v4716_v16 }
 0x48b   : > { %v4820_v52 = vmax.f32 %v4788_v48, 0.0  ;;  %v4789_v62 = vadd.f32 %v4757_v15, %v2840_v18 }
 0x48c   : > { %v4818_v53 = vmax.f32 %v4786_v22, 0.0  ;;  %v4787_v11 = vadd.f32 %v4755_v4, %v2838_v50 }
 0x48d   : > { %4852 = vst.msk [vmem:[%s9455_s18 + $0xd0] sm:$0xff] %vm1827_vm2, %v4820_v52  ;;  %v4821_v1 = vmax.f32 %v4789_v62, 0.0 }
 0x48e   : > { %4850 = vst.msk [vmem:[%s9455_s18 + $0xc0] sm:$0xff] %vm1827_vm2, %v4818_v53  ;;  %v4819_v20 = vmax.f32 %v4787_v11, 0.0 }
 0x48f   : > { %4853 = vst.msk [vmem:[%s9455_s18 + $0xd8] sm:$0xff] %vm1827_vm2, %v4821_v1 }
 0x490   : > { %4851 = vst.msk [vmem:[%s9455_s18 + $0xc8] sm:$0xff] %vm1827_vm2, %v4819_v20 }
 0x49c   : > { %v5157_v9 = vpop.f32.mrb[48].mxu1 }
 0x49d   : > { %v4721_v13 = vmul.f32 %v5157_v9, %v9426_v41  ;;  %v4669_v17 = vpop.f32.mrb[49].mxu1 }
 0x49e   : > { %v4719_v38 = vmul.f32 %v9426_v41, %v4669_v17  ;;  %v5158_v23 = vpop.f32.mrb[50].mxu1 }
 0x49f   : > { %v4760_v33 = vadd.f32 %v9435_v59, %v4721_v13  ;;  %v4722_v12 = vmul.f32 %v5158_v23, %v9426_v41  ;;  %v4672_v40 = vpop.f32.mrb[51].mxu1 }
 0x4a0   : > { %v4758_v54 = vadd.f32 %v9435_v59, %v4719_v38  ;;  %v4720_v57 = vmul.f32 %v9426_v41, %v4672_v40 }
 0x4a1   : > { %v4792_v45 = vadd.f32 %v4760_v33, %v2843_v55  ;;  %v4761_v7 = vadd.f32 %v9435_v59, %v4722_v12 }
 0x4a2   : > { %v4790_v0 = vadd.f32 %v4758_v54, %v2841_v19  ;;  %v4759_v42 = vadd.f32 %v9435_v59, %v4720_v57 }
 0x4a3   : > { %v4824_v27 = vmax.f32 %v4792_v45, 0.0  ;;  %v4793_v39 = vadd.f32 %v4761_v7, %v2844_v31 }
 0x4a4   : > { %v4822_v34 = vmax.f32 %v4790_v0, 0.0  ;;  %v4791_v10 = vadd.f32 %v4759_v42, %v2842_v44 }
 0x4a5   : > { %4856 = vst.msk [vmem:[%s9455_s18 + $0xf0] sm:$0xff] %vm1827_vm2, %v4824_v27  ;;  %v4825_v37 = vmax.f32 %v4793_v39, 0.0 }
 0x4a6   : > { %4854 = vst.msk [vmem:[%s9455_s18 + $0xe0] sm:$0xff] %vm1827_vm2, %v4822_v34  ;;  %v4823_v41 = vmax.f32 %v4791_v10, 0.0 }
 0x4a7   : > { %4857 = vst.msk [vmem:[%s9455_s18 + $0xf8] sm:$0xff] %vm1827_vm2, %v4825_v37 }
 0x4a8   : > { %4855 = vst.msk [vmem:[%s9455_s18 + $0xe8] sm:$0xff] %vm1827_vm2, %v4823_v41 }
 0x4a9 PF: > { %s20_s13 = sadd.s32 1, %s6489_s13  }
 0x4aa   : > { %p17_p4 = scmp.ge.s32.totalorder %s20_s13, 4  }
 0x4ac   :  { %19 = sbr.rel (!%p17_p4) target bundleno = 1 (0x1), region = 94 }

</bundles_post_ra>
